<compile_context>
chip_gen: v5e
topology: v5e:2x2
jax: 0.10.0
libtpu: 0.0.40
codegen_flags: <defaults>
</compile_context>

<pallas_src>
import functools

import jax
import jax.numpy as jnp
from jax import lax
from jax.experimental import pallas as pl
from jax.experimental.pallas import tpu as pltpu


def _round_up(x, m):
    return (x + m - 1) // m * m


def _pick_time_block(T, max_block=32):
    for tb in range(min(T, max_block), 0, -1):
        if T % tb == 0:
            return tb
    return 1


def _pad_gate_cols(w, H, Hp):
    """Pad the trailing 4H axis (PyTorch gate order i,f,g,o) to 4*Hp, per gate block."""
    lead = w.shape[:-1]
    w4 = w.reshape(lead + (4, H))
    w4 = jnp.pad(w4, [(0, 0)] * len(lead) + [(0, 0), (0, Hp - H)])
    return w4.reshape(lead + (4 * Hp,))


def _lstm_classifier_kernel(x_ref, wih_f_ref, whh_f_ref, b_f_ref,
                            wih_b_ref, b_b_ref,
                            wlin_f_ref, wlin_b_ref, b_lin_ref,
                            out_ref, h_scr, c_scr, *, num_classes):
    Tt, Bb, E = x_ref.shape
    Hp = whh_f_ref.shape[0]
    tb = pl.program_id(1)

    @pl.when(tb == 0)
    def _init():
        h_scr[...] = jnp.zeros_like(h_scr)
        c_scr[...] = jnp.zeros_like(c_scr)

    # Hoisted input projection (+ bias) for the whole time block: one big matmul
    # off the serial critical path.
    xw = (jnp.dot(x_ref[...].reshape(Tt * Bb, E), wih_f_ref[...],
                  preferred_element_type=jnp.float32)
          + b_f_ref[...]).reshape(Tt, Bb, 4 * Hp)

    whh = whh_f_ref[...]
    h = h_scr[...]
    c = c_scr[...]
    # Fully unrolled recurrence (static small trip count): only h @ W_hh per step,
    # gate slices are 128-lane aligned.
    for i in range(Tt):
        gates = xw[i] + jnp.dot(h, whh, preferred_element_type=jnp.float32)
        i_g = jax.nn.sigmoid(gates[:, 0 * Hp:1 * Hp])
        f_g = jax.nn.sigmoid(gates[:, 1 * Hp:2 * Hp])
        g_g = jnp.tanh(gates[:, 2 * Hp:3 * Hp])
        o_g = jax.nn.sigmoid(gates[:, 3 * Hp:4 * Hp])
        c = f_g * c + i_g * g_g
        h = o_g * jnp.tanh(c)
    h_scr[...] = h
    c_scr[...] = c

    @pl.when(tb == pl.num_programs(1) - 1)
    def _finalize():
        # Backward-direction contribution to lstm_out[:, -1]: exactly one cell step on
        # x[T-1] from the zero state (h0 = c0 = 0), so the h @ W_hh_b term vanishes.
        gb = (jnp.dot(x_ref[Tt - 1], wih_b_ref[...],
                      preferred_element_type=jnp.float32) + b_b_ref[...])
        i_b = jax.nn.sigmoid(gb[:, 0 * Hp:1 * Hp])
        g_b = jnp.tanh(gb[:, 2 * Hp:3 * Hp])
        o_b = jax.nn.sigmoid(gb[:, 3 * Hp:4 * Hp])
        h_bwd = o_b * jnp.tanh(i_b * g_b)

        # hidden2label as two half-dots (no lane concat of h_fwd / h_bwd).
        y = (jnp.dot(h, wlin_f_ref[...], preferred_element_type=jnp.float32)
             + jnp.dot(h_bwd, wlin_b_ref[...], preferred_element_type=jnp.float32)
             + b_lin_ref[...])

        # log_softmax over the real class lanes only; padded lanes masked out.
        lane = lax.broadcasted_iota(jnp.int32, y.shape, 1)
        y = jnp.where(lane < num_classes, y, jnp.float32(-1e30))
        m = jnp.max(y, axis=-1, keepdims=True)
        z = y - m
        lse = jnp.log(jnp.sum(jnp.exp(z), axis=-1, keepdims=True))
        out_ref[...] = z - lse


def lstm_classifier_forward(sentence, params):
    emb_tbl = params["embedding"]
    B, T = sentence.shape
    E = emb_tbl.shape[1]
    H = params["whh_f"].shape[0]
    C = params["w_lin"].shape[1]

    # Layout-friendly padded sizes.
    Hp = _round_up(H, 128)          # each gate gets its own lane-aligned block
    Cp = _round_up(C, 128)          # lane-dense output store
    Bp = _round_up(B, 8)            # sublane-dense batch
    if Bp > 128:
        Bb = 128
        Bp = _round_up(Bp, 128)
    else:
        Bb = Bp
    Tt = _pick_time_block(T)

    # Time-major embedding gather with no extra transpose pass; zero-pad batch rows.
    x = jnp.take(emb_tbl, sentence.T, axis=0).astype(jnp.float32)       # (T, B, E)
    x = jnp.pad(x, ((0, 0), (0, Bp - B), (0, 0)))                       # (T, Bp, E)

    # Per-gate lane padding of LSTM weights (PyTorch gate order i,f,g,o preserved).
    wih_f = _pad_gate_cols(params["wih_f"], H, Hp)                                   # (E, 4Hp)
    b_f = _pad_gate_cols(params["b_f"], H, Hp)                                       # (1, 4Hp)
    whh_f = _pad_gate_cols(jnp.pad(params["whh_f"], ((0, Hp - H), (0, 0))), H, Hp)   # (Hp, 4Hp)
    wih_b = _pad_gate_cols(params["wih_b"], H, Hp)                                   # (E, 4Hp)
    b_b = _pad_gate_cols(params["b_b"], H, Hp)                                       # (1, 4Hp)

    # hidden2label split into forward/backward halves, padded to (Hp, Cp).
    w_lin = params["w_lin"]
    wlin_f = jnp.pad(w_lin[:H], ((0, Hp - H), (0, Cp - C)))
    wlin_b = jnp.pad(w_lin[H:], ((0, Hp - H), (0, Cp - C)))
    b_lin = jnp.pad(params["b_lin"], ((0, 0), (0, Cp - C)))

    grid = (Bp // Bb, T // Tt)
    kernel = functools.partial(_lstm_classifier_kernel, num_classes=C)

    out = pl.pallas_call(
        kernel,
        out_shape=jax.ShapeDtypeStruct((Bp, Cp), jnp.float32),
        grid_spec=pltpu.PrefetchScalarGridSpec(
            num_scalar_prefetch=0,
            grid=grid,
            in_specs=[
                pl.BlockSpec((Tt, Bb, E), lambda b, t: (t, b, 0)),   # x, streamed over T
                pl.BlockSpec((E, 4 * Hp), lambda b, t: (0, 0)),      # W_ih forward
                pl.BlockSpec((Hp, 4 * Hp), lambda b, t: (0, 0)),     # W_hh forward (resident)
                pl.BlockSpec((1, 4 * Hp), lambda b, t: (0, 0)),      # bias forward
                pl.BlockSpec((E, 4 * Hp), lambda b, t: (0, 0)),      # W_ih backward
                pl.BlockSpec((1, 4 * Hp), lambda b, t: (0, 0)),      # bias backward
                pl.BlockSpec((Hp, Cp), lambda b, t: (0, 0)),         # W_lin forward half
                pl.BlockSpec((Hp, Cp), lambda b, t: (0, 0)),         # W_lin backward half
                pl.BlockSpec((1, Cp), lambda b, t: (0, 0)),          # b_lin
            ],
            out_specs=pl.BlockSpec((Bb, Cp), lambda b, t: (b, 0)),
            scratch_shapes=[pltpu.VMEM((Bb, Hp), jnp.float32),       # h carry
                            pltpu.VMEM((Bb, Hp), jnp.float32)],      # c carry
        ),
        compiler_params=pltpu.CompilerParams(
            dimension_semantics=("parallel", "arbitrary"),
            vmem_limit_bytes=32 * 1024 * 1024),
    )(x, wih_f, whh_f, b_f, wih_b, b_b, wlin_f, wlin_b, b_lin)

    return out[:B, :C]


def init_params(key, vocab_num, embedding_dim, hidden_dim, class_num):
    ks = jax.random.split(key, 12)
    k_lstm = 1.0 / jnp.sqrt(hidden_dim)
    k_lin = 1.0 / jnp.sqrt(2.0 * hidden_dim)

    def unif(k, shape, bound):
        return jax.random.uniform(k, shape, jnp.float32, -bound, bound)

    # Weights stored pre-transposed for (x @ W); gate order i,f,g,o; biases combined.
    return {
        "embedding": jax.random.normal(ks[0], (vocab_num, embedding_dim), jnp.float32),
        "wih_f": unif(ks[1], (embedding_dim, 4 * hidden_dim), k_lstm),
        "whh_f": unif(ks[2], (hidden_dim, 4 * hidden_dim), k_lstm),
        "b_f": (unif(ks[3], (1, 4 * hidden_dim), k_lstm)
                + unif(ks[4], (1, 4 * hidden_dim), k_lstm)),
        "wih_b": unif(ks[5], (embedding_dim, 4 * hidden_dim), k_lstm),
        "whh_b": unif(ks[6], (hidden_dim, 4 * hidden_dim), k_lstm),
        "b_b": (unif(ks[7], (1, 4 * hidden_dim), k_lstm)
                + unif(ks[8], (1, 4 * hidden_dim), k_lstm)),
        "w_lin": unif(ks[9], (2 * hidden_dim, class_num), k_lin),
        "b_lin": unif(ks[10], (1, class_num), k_lin),
    }


def reference_forward(sentence, params):
    """Plain-JAX bidirectional LSTM classifier (full reverse pass), for validation."""
    emb = jnp.take(params["embedding"], sentence, axis=0)   # (B, T, E)
    H = params["whh_f"].shape[0]
    B, T, _ = emb.shape

    def cell(x_t, h, c, wih, whh, b):
        g = x_t @ wih + h @ whh + b
        i = jax.nn.sigmoid(g[:, :H])
        f = jax.nn.sigmoid(g[:, H:2 * H])
        gg = jnp.tanh(g[:, 2 * H:3 * H])
        o = jax.nn.sigmoid(g[:, 3 * H:])
        c = f * c + i * gg
        return o * jnp.tanh(c), c

    h = jnp.zeros((B, H), jnp.float32)
    c = jnp.zeros((B, H), jnp.float32)
    for t in range(T):
        h, c = cell(emb[:, t], h, c, params["wih_f"], params["whh_f"], params["b_f"])
    h_fwd = h

    hb = jnp.zeros((B, H), jnp.float32)
    cb = jnp.zeros((B, H), jnp.float32)
    outs_b = [None] * T
    for t in range(T - 1, -1, -1):
        hb, cb = cell(emb[:, t], hb, cb, params["wih_b"], params["whh_b"], params["b_b"])
        outs_b[t] = hb
    h_bwd_last = outs_b[T - 1]

    y = jnp.concatenate([h_fwd, h_bwd_last], axis=-1) @ params["w_lin"] + params["b_lin"]
    return jax.nn.log_softmax(y, axis=-1)


if __name__ == "__main__":
    vocab_num, embedding_dim, hidden_dim, class_num = 50, 32, 32, 4
    batch_size, seq_len = 2, 8

    key = jax.random.PRNGKey(0)
    k_param, k_tok = jax.random.split(key)
    params = init_params(k_param, vocab_num, embedding_dim, hidden_dim, class_num)
    sentence = jax.random.randint(k_tok, (batch_size, seq_len), 0, vocab_num, jnp.int32)

    log_probs = jax.jit(lstm_classifier_forward)(sentence, params)
    jax.block_until_ready(log_probs)
    assert log_probs.shape == (batch_size, class_num)

    ref = reference_forward(sentence, params)
    assert bool(jnp.allclose(log_probs, ref, atol=1e-4, rtol=1e-4)), (log_probs, ref)

    print("KERNEL_OK")
</pallas_src>

<mosaic_0001>
module attributes {stable_mosaic.version = 11 : i64} {
  func.func @_lstm_classifier_kernel(%arg0: i32, %arg1: i32, %arg2: memref<8x8x32xf32, #tpu.memory_space<vmem>>, %arg3: memref<32x512xf32, #tpu.memory_space<vmem>>, %arg4: memref<128x512xf32, #tpu.memory_space<vmem>>, %arg5: memref<1x512xf32, #tpu.memory_space<vmem>>, %arg6: memref<32x512xf32, #tpu.memory_space<vmem>>, %arg7: memref<1x512xf32, #tpu.memory_space<vmem>>, %arg8: memref<128x128xf32, #tpu.memory_space<vmem>>, %arg9: memref<128x128xf32, #tpu.memory_space<vmem>>, %arg10: memref<1x128xf32, #tpu.memory_space<vmem>>, %arg11: memref<8x128xf32, #tpu.memory_space<vmem>>, %arg12: memref<8x128xf32, #tpu.memory_space<vmem>>, %arg13: memref<8x128xf32, #tpu.memory_space<vmem>>) attributes {dimension_semantics = [#tpu.dimension_semantics<parallel>, #tpu.dimension_semantics<arbitrary>], iteration_bounds = array<i64: 1, 1>, scalar_prefetch = 0 : i64, scratch_operands = 2 : i64, tpu.core_type = #tpu.core_type<tc>, window_params = [{transform_indices = @transform_0, window_bounds = array<i64: 8, 8, 32>}, {pipeline_mode = #tpu.pipeline_mode<synchronous>, transform_indices = @transform_1, window_bounds = array<i64: 32, 512>}, {pipeline_mode = #tpu.pipeline_mode<synchronous>, transform_indices = @transform_2, window_bounds = array<i64: 128, 512>}, {pipeline_mode = #tpu.pipeline_mode<synchronous>, transform_indices = @transform_3, window_bounds = array<i64: 1, 512>}, {pipeline_mode = #tpu.pipeline_mode<synchronous>, transform_indices = @transform_4, window_bounds = array<i64: 32, 512>}, {pipeline_mode = #tpu.pipeline_mode<synchronous>, transform_indices = @transform_5, window_bounds = array<i64: 1, 512>}, {pipeline_mode = #tpu.pipeline_mode<synchronous>, transform_indices = @transform_6, window_bounds = array<i64: 128, 128>}, {pipeline_mode = #tpu.pipeline_mode<synchronous>, transform_indices = @transform_7, window_bounds = array<i64: 128, 128>}, {pipeline_mode = #tpu.pipeline_mode<synchronous>, transform_indices = @transform_8, window_bounds = array<i64: 1, 128>}, {transform_indices = @transform_9, window_bounds = array<i64: 8, 128>}]} {
    %c0_i32 = arith.constant 0 : i32
    %0 = arith.cmpi eq, %arg1, %c0_i32 : i32
    %1 = arith.extui %0 : i1 to i32
    %c0_i32_0 = arith.constant 0 : i32
    %2 = arith.cmpi ne, %1, %c0_i32_0 : i32
    scf.if %2 {
      %cst_51 = arith.constant 0.000000e+00 : f32
      %251 = vector.broadcast %cst_51 : f32 to vector<8x128xf32>
      %c0_52 = arith.constant 0 : index
      %c0_53 = arith.constant 0 : index
      %252 = vector.load %arg12[%c0_52, %c0_53] : memref<8x128xf32, #tpu.memory_space<vmem>>, vector<8x128xf32>
      tpu.vector_store %arg12[%c0_52, %c0_53], %251 {strides = array<i32>} : memref<8x128xf32, #tpu.memory_space<vmem>>, vector<8x128xf32>,
      %cst_54 = arith.constant 0.000000e+00 : f32
      %253 = vector.broadcast %cst_54 : f32 to vector<8x128xf32>
      %c0_55 = arith.constant 0 : index
      %c0_56 = arith.constant 0 : index
      %254 = vector.load %arg13[%c0_55, %c0_56] : memref<8x128xf32, #tpu.memory_space<vmem>>, vector<8x128xf32>
      tpu.vector_store %arg13[%c0_55, %c0_56], %253 {strides = array<i32>} : memref<8x128xf32, #tpu.memory_space<vmem>>, vector<8x128xf32>,
    } else {
    }
    %c0 = arith.constant 0 : index
    %c0_1 = arith.constant 0 : index
    %c0_2 = arith.constant 0 : index
    %3 = vector.load %arg2[%c0, %c0_1, %c0_2] : memref<8x8x32xf32, #tpu.memory_space<vmem>>, vector<8x8x32xf32>
    %4 = vector.shape_cast %3 : vector<8x8x32xf32> to vector<64x32xf32>
    %c0_3 = arith.constant 0 : index
    %c0_4 = arith.constant 0 : index
    %5 = vector.load %arg3[%c0_3, %c0_4] : memref<32x512xf32, #tpu.memory_space<vmem>>, vector<32x512xf32>
    %cst = arith.constant dense<0.000000e+00> : vector<64x512xf32>
    %6 = tpu.matmul %4, %5, %cst {dimension_numbers = #tpu.dot_dimension_numbers<[1], [0], [0], [1], [0, 0, 1, 1], [], []>} : vector<64x32xf32>, vector<32x512xf32>, vector<64x512xf32> -> vector<64x512xf32>
    %c0_5 = arith.constant 0 : index
    %c0_6 = arith.constant 0 : index
    %7 = vector.load %arg5[%c0_5, %c0_6] : memref<1x512xf32, #tpu.memory_space<vmem>>, vector<1x512xf32>
    %8 = vector.broadcast %7 : vector<1x512xf32> to vector<64x512xf32>
    %9 = arith.addf %6, %8 : vector<64x512xf32>
    %10 = vector.shape_cast %9 : vector<64x512xf32> to vector<8x8x512xf32>
    %c0_7 = arith.constant 0 : index
    %c0_8 = arith.constant 0 : index
    %11 = vector.load %arg4[%c0_7, %c0_8] : memref<128x512xf32, #tpu.memory_space<vmem>>, vector<128x512xf32>
    %c0_9 = arith.constant 0 : index
    %c0_10 = arith.constant 0 : index
    %12 = vector.load %arg12[%c0_9, %c0_10] : memref<8x128xf32, #tpu.memory_space<vmem>>, vector<8x128xf32>
    %c0_11 = arith.constant 0 : index
    %c0_12 = arith.constant 0 : index
    %13 = vector.load %arg13[%c0_11, %c0_12] : memref<8x128xf32, #tpu.memory_space<vmem>>, vector<8x128xf32>
    %14 = vector.extract_strided_slice %10 {offsets = [0, 0, 0], sizes = [1, 8, 512], strides = [1, 1, 1]} : vector<8x8x512xf32> to vector<1x8x512xf32>
    %15 = vector.shape_cast %14 : vector<1x8x512xf32> to vector<8x512xf32>
    %cst_13 = arith.constant dense<0.000000e+00> : vector<8x512xf32>
    %16 = tpu.matmul %12, %11, %cst_13 {dimension_numbers = #tpu.dot_dimension_numbers<[1], [0], [0], [1], [0, 0, 1, 1], [], []>} : vector<8x128xf32>, vector<128x512xf32>, vector<8x512xf32> -> vector<8x512xf32>
    %17 = arith.addf %15, %16 : vector<8x512xf32>
    %18 = vector.extract_strided_slice %17 {offsets = [0, 0], sizes = [8, 128], strides = [1, 1]} : vector<8x512xf32> to vector<8x128xf32>
    %19 = arith.negf %18 : vector<8x128xf32>
    %20 = math.exp %19 : vector<8x128xf32>
    %cst_14 = arith.constant 1.000000e+00 : f32
    %21 = vector.broadcast %cst_14 : f32 to vector<8x128xf32>
    %22 = arith.addf %21, %20 : vector<8x128xf32>
    %23 = arith.divf %21, %22 : vector<8x128xf32>
    %24 = vector.extract_strided_slice %17 {offsets = [0, 128], sizes = [8, 128], strides = [1, 1]} : vector<8x512xf32> to vector<8x128xf32>
    %25 = arith.negf %24 : vector<8x128xf32>
    %26 = math.exp %25 : vector<8x128xf32>
    %cst_15 = arith.constant 1.000000e+00 : f32
    %27 = vector.broadcast %cst_15 : f32 to vector<8x128xf32>
    %28 = arith.addf %27, %26 : vector<8x128xf32>
    %29 = arith.divf %27, %28 : vector<8x128xf32>
    %30 = vector.extract_strided_slice %17 {offsets = [0, 256], sizes = [8, 128], strides = [1, 1]} : vector<8x512xf32> to vector<8x128xf32>
    %31 = math.tanh %30 : vector<8x128xf32>
    %32 = vector.extract_strided_slice %17 {offsets = [0, 384], sizes = [8, 128], strides = [1, 1]} : vector<8x512xf32> to vector<8x128xf32>
    %33 = arith.negf %32 : vector<8x128xf32>
    %34 = math.exp %33 : vector<8x128xf32>
    %cst_16 = arith.constant 1.000000e+00 : f32
    %35 = vector.broadcast %cst_16 : f32 to vector<8x128xf32>
    %36 = arith.addf %35, %34 : vector<8x128xf32>
    %37 = arith.divf %35, %36 : vector<8x128xf32>
    %38 = arith.mulf %29, %13 : vector<8x128xf32>
    %39 = arith.mulf %23, %31 : vector<8x128xf32>
    %40 = arith.addf %38, %39 : vector<8x128xf32>
    %41 = math.tanh %40 : vector<8x128xf32>
    %42 = arith.mulf %37, %41 : vector<8x128xf32>
    %43 = vector.extract_strided_slice %10 {offsets = [1, 0, 0], sizes = [1, 8, 512], strides = [1, 1, 1]} : vector<8x8x512xf32> to vector<1x8x512xf32>
    %44 = vector.shape_cast %43 : vector<1x8x512xf32> to vector<8x512xf32>
    %cst_17 = arith.constant dense<0.000000e+00> : vector<8x512xf32>
    %45 = tpu.matmul %42, %11, %cst_17 {dimension_numbers = #tpu.dot_dimension_numbers<[1], [0], [0], [1], [0, 0, 1, 1], [], []>} : vector<8x128xf32>, vector<128x512xf32>, vector<8x512xf32> -> vector<8x512xf32>
    %46 = arith.addf %44, %45 : vector<8x512xf32>
    %47 = vector.extract_strided_slice %46 {offsets = [0, 0], sizes = [8, 128], strides = [1, 1]} : vector<8x512xf32> to vector<8x128xf32>
    %48 = arith.negf %47 : vector<8x128xf32>
    %49 = math.exp %48 : vector<8x128xf32>
    %cst_18 = arith.constant 1.000000e+00 : f32
    %50 = vector.broadcast %cst_18 : f32 to vector<8x128xf32>
    %51 = arith.addf %50, %49 : vector<8x128xf32>
    %52 = arith.divf %50, %51 : vector<8x128xf32>
    %53 = vector.extract_strided_slice %46 {offsets = [0, 128], sizes = [8, 128], strides = [1, 1]} : vector<8x512xf32> to vector<8x128xf32>
    %54 = arith.negf %53 : vector<8x128xf32>
    %55 = math.exp %54 : vector<8x128xf32>
    %cst_19 = arith.constant 1.000000e+00 : f32
    %56 = vector.broadcast %cst_19 : f32 to vector<8x128xf32>
    %57 = arith.addf %56, %55 : vector<8x128xf32>
    %58 = arith.divf %56, %57 : vector<8x128xf32>
    %59 = vector.extract_strided_slice %46 {offsets = [0, 256], sizes = [8, 128], strides = [1, 1]} : vector<8x512xf32> to vector<8x128xf32>
    %60 = math.tanh %59 : vector<8x128xf32>
    %61 = vector.extract_strided_slice %46 {offsets = [0, 384], sizes = [8, 128], strides = [1, 1]} : vector<8x512xf32> to vector<8x128xf32>
    %62 = arith.negf %61 : vector<8x128xf32>
    %63 = math.exp %62 : vector<8x128xf32>
    %cst_20 = arith.constant 1.000000e+00 : f32
    %64 = vector.broadcast %cst_20 : f32 to vector<8x128xf32>
    %65 = arith.addf %64, %63 : vector<8x128xf32>
    %66 = arith.divf %64, %65 : vector<8x128xf32>
    %67 = arith.mulf %58, %40 : vector<8x128xf32>
    %68 = arith.mulf %52, %60 : vector<8x128xf32>
    %69 = arith.addf %67, %68 : vector<8x128xf32>
    %70 = math.tanh %69 : vector<8x128xf32>
    %71 = arith.mulf %66, %70 : vector<8x128xf32>
    %72 = vector.extract_strided_slice %10 {offsets = [2, 0, 0], sizes = [1, 8, 512], strides = [1, 1, 1]} : vector<8x8x512xf32> to vector<1x8x512xf32>
    %73 = vector.shape_cast %72 : vector<1x8x512xf32> to vector<8x512xf32>
    %cst_21 = arith.constant dense<0.000000e+00> : vector<8x512xf32>
    %74 = tpu.matmul %71, %11, %cst_21 {dimension_numbers = #tpu.dot_dimension_numbers<[1], [0], [0], [1], [0, 0, 1, 1], [], []>} : vector<8x128xf32>, vector<128x512xf32>, vector<8x512xf32> -> vector<8x512xf32>
    %75 = arith.addf %73, %74 : vector<8x512xf32>
    %76 = vector.extract_strided_slice %75 {offsets = [0, 0], sizes = [8, 128], strides = [1, 1]} : vector<8x512xf32> to vector<8x128xf32>
    %77 = arith.negf %76 : vector<8x128xf32>
    %78 = math.exp %77 : vector<8x128xf32>
    %cst_22 = arith.constant 1.000000e+00 : f32
    %79 = vector.broadcast %cst_22 : f32 to vector<8x128xf32>
    %80 = arith.addf %79, %78 : vector<8x128xf32>
    %81 = arith.divf %79, %80 : vector<8x128xf32>
    %82 = vector.extract_strided_slice %75 {offsets = [0, 128], sizes = [8, 128], strides = [1, 1]} : vector<8x512xf32> to vector<8x128xf32>
    %83 = arith.negf %82 : vector<8x128xf32>
    %84 = math.exp %83 : vector<8x128xf32>
    %cst_23 = arith.constant 1.000000e+00 : f32
    %85 = vector.broadcast %cst_23 : f32 to vector<8x128xf32>
    %86 = arith.addf %85, %84 : vector<8x128xf32>
    %87 = arith.divf %85, %86 : vector<8x128xf32>
    %88 = vector.extract_strided_slice %75 {offsets = [0, 256], sizes = [8, 128], strides = [1, 1]} : vector<8x512xf32> to vector<8x128xf32>
    %89 = math.tanh %88 : vector<8x128xf32>
    %90 = vector.extract_strided_slice %75 {offsets = [0, 384], sizes = [8, 128], strides = [1, 1]} : vector<8x512xf32> to vector<8x128xf32>
    %91 = arith.negf %90 : vector<8x128xf32>
    %92 = math.exp %91 : vector<8x128xf32>
    %cst_24 = arith.constant 1.000000e+00 : f32
    %93 = vector.broadcast %cst_24 : f32 to vector<8x128xf32>
    %94 = arith.addf %93, %92 : vector<8x128xf32>
    %95 = arith.divf %93, %94 : vector<8x128xf32>
    %96 = arith.mulf %87, %69 : vector<8x128xf32>
    %97 = arith.mulf %81, %89 : vector<8x128xf32>
    %98 = arith.addf %96, %97 : vector<8x128xf32>
    %99 = math.tanh %98 : vector<8x128xf32>
    %100 = arith.mulf %95, %99 : vector<8x128xf32>
    %101 = vector.extract_strided_slice %10 {offsets = [3, 0, 0], sizes = [1, 8, 512], strides = [1, 1, 1]} : vector<8x8x512xf32> to vector<1x8x512xf32>
    %102 = vector.shape_cast %101 : vector<1x8x512xf32> to vector<8x512xf32>
    %cst_25 = arith.constant dense<0.000000e+00> : vector<8x512xf32>
    %103 = tpu.matmul %100, %11, %cst_25 {dimension_numbers = #tpu.dot_dimension_numbers<[1], [0], [0], [1], [0, 0, 1, 1], [], []>} : vector<8x128xf32>, vector<128x512xf32>, vector<8x512xf32> -> vector<8x512xf32>
    %104 = arith.addf %102, %103 : vector<8x512xf32>
    %105 = vector.extract_strided_slice %104 {offsets = [0, 0], sizes = [8, 128], strides = [1, 1]} : vector<8x512xf32> to vector<8x128xf32>
    %106 = arith.negf %105 : vector<8x128xf32>
    %107 = math.exp %106 : vector<8x128xf32>
    %cst_26 = arith.constant 1.000000e+00 : f32
    %108 = vector.broadcast %cst_26 : f32 to vector<8x128xf32>
    %109 = arith.addf %108, %107 : vector<8x128xf32>
    %110 = arith.divf %108, %109 : vector<8x128xf32>
    %111 = vector.extract_strided_slice %104 {offsets = [0, 128], sizes = [8, 128], strides = [1, 1]} : vector<8x512xf32> to vector<8x128xf32>
    %112 = arith.negf %111 : vector<8x128xf32>
    %113 = math.exp %112 : vector<8x128xf32>
    %cst_27 = arith.constant 1.000000e+00 : f32
    %114 = vector.broadcast %cst_27 : f32 to vector<8x128xf32>
    %115 = arith.addf %114, %113 : vector<8x128xf32>
    %116 = arith.divf %114, %115 : vector<8x128xf32>
    %117 = vector.extract_strided_slice %104 {offsets = [0, 256], sizes = [8, 128], strides = [1, 1]} : vector<8x512xf32> to vector<8x128xf32>
    %118 = math.tanh %117 : vector<8x128xf32>
    %119 = vector.extract_strided_slice %104 {offsets = [0, 384], sizes = [8, 128], strides = [1, 1]} : vector<8x512xf32> to vector<8x128xf32>
    %120 = arith.negf %119 : vector<8x128xf32>
    %121 = math.exp %120 : vector<8x128xf32>
    %cst_28 = arith.constant 1.000000e+00 : f32
    %122 = vector.broadcast %cst_28 : f32 to vector<8x128xf32>
    %123 = arith.addf %122, %121 : vector<8x128xf32>
    %124 = arith.divf %122, %123 : vector<8x128xf32>
    %125 = arith.mulf %116, %98 : vector<8x128xf32>
    %126 = arith.mulf %110, %118 : vector<8x128xf32>
    %127 = arith.addf %125, %126 : vector<8x128xf32>
    %128 = math.tanh %127 : vector<8x128xf32>
    %129 = arith.mulf %124, %128 : vector<8x128xf32>
    %130 = vector.extract_strided_slice %10 {offsets = [4, 0, 0], sizes = [1, 8, 512], strides = [1, 1, 1]} : vector<8x8x512xf32> to vector<1x8x512xf32>
    %131 = vector.shape_cast %130 : vector<1x8x512xf32> to vector<8x512xf32>
    %cst_29 = arith.constant dense<0.000000e+00> : vector<8x512xf32>
    %132 = tpu.matmul %129, %11, %cst_29 {dimension_numbers = #tpu.dot_dimension_numbers<[1], [0], [0], [1], [0, 0, 1, 1], [], []>} : vector<8x128xf32>, vector<128x512xf32>, vector<8x512xf32> -> vector<8x512xf32>
    %133 = arith.addf %131, %132 : vector<8x512xf32>
    %134 = vector.extract_strided_slice %133 {offsets = [0, 0], sizes = [8, 128], strides = [1, 1]} : vector<8x512xf32> to vector<8x128xf32>
    %135 = arith.negf %134 : vector<8x128xf32>
    %136 = math.exp %135 : vector<8x128xf32>
    %cst_30 = arith.constant 1.000000e+00 : f32
    %137 = vector.broadcast %cst_30 : f32 to vector<8x128xf32>
    %138 = arith.addf %137, %136 : vector<8x128xf32>
    %139 = arith.divf %137, %138 : vector<8x128xf32>
    %140 = vector.extract_strided_slice %133 {offsets = [0, 128], sizes = [8, 128], strides = [1, 1]} : vector<8x512xf32> to vector<8x128xf32>
    %141 = arith.negf %140 : vector<8x128xf32>
    %142 = math.exp %141 : vector<8x128xf32>
    %cst_31 = arith.constant 1.000000e+00 : f32
    %143 = vector.broadcast %cst_31 : f32 to vector<8x128xf32>
    %144 = arith.addf %143, %142 : vector<8x128xf32>
    %145 = arith.divf %143, %144 : vector<8x128xf32>
    %146 = vector.extract_strided_slice %133 {offsets = [0, 256], sizes = [8, 128], strides = [1, 1]} : vector<8x512xf32> to vector<8x128xf32>
    %147 = math.tanh %146 : vector<8x128xf32>
    %148 = vector.extract_strided_slice %133 {offsets = [0, 384], sizes = [8, 128], strides = [1, 1]} : vector<8x512xf32> to vector<8x128xf32>
    %149 = arith.negf %148 : vector<8x128xf32>
    %150 = math.exp %149 : vector<8x128xf32>
    %cst_32 = arith.constant 1.000000e+00 : f32
    %151 = vector.broadcast %cst_32 : f32 to vector<8x128xf32>
    %152 = arith.addf %151, %150 : vector<8x128xf32>
    %153 = arith.divf %151, %152 : vector<8x128xf32>
    %154 = arith.mulf %145, %127 : vector<8x128xf32>
    %155 = arith.mulf %139, %147 : vector<8x128xf32>
    %156 = arith.addf %154, %155 : vector<8x128xf32>
    %157 = math.tanh %156 : vector<8x128xf32>
    %158 = arith.mulf %153, %157 : vector<8x128xf32>
    %159 = vector.extract_strided_slice %10 {offsets = [5, 0, 0], sizes = [1, 8, 512], strides = [1, 1, 1]} : vector<8x8x512xf32> to vector<1x8x512xf32>
    %160 = vector.shape_cast %159 : vector<1x8x512xf32> to vector<8x512xf32>
    %cst_33 = arith.constant dense<0.000000e+00> : vector<8x512xf32>
    %161 = tpu.matmul %158, %11, %cst_33 {dimension_numbers = #tpu.dot_dimension_numbers<[1], [0], [0], [1], [0, 0, 1, 1], [], []>} : vector<8x128xf32>, vector<128x512xf32>, vector<8x512xf32> -> vector<8x512xf32>
    %162 = arith.addf %160, %161 : vector<8x512xf32>
    %163 = vector.extract_strided_slice %162 {offsets = [0, 0], sizes = [8, 128], strides = [1, 1]} : vector<8x512xf32> to vector<8x128xf32>
    %164 = arith.negf %163 : vector<8x128xf32>
    %165 = math.exp %164 : vector<8x128xf32>
    %cst_34 = arith.constant 1.000000e+00 : f32
    %166 = vector.broadcast %cst_34 : f32 to vector<8x128xf32>
    %167 = arith.addf %166, %165 : vector<8x128xf32>
    %168 = arith.divf %166, %167 : vector<8x128xf32>
    %169 = vector.extract_strided_slice %162 {offsets = [0, 128], sizes = [8, 128], strides = [1, 1]} : vector<8x512xf32> to vector<8x128xf32>
    %170 = arith.negf %169 : vector<8x128xf32>
    %171 = math.exp %170 : vector<8x128xf32>
    %cst_35 = arith.constant 1.000000e+00 : f32
    %172 = vector.broadcast %cst_35 : f32 to vector<8x128xf32>
    %173 = arith.addf %172, %171 : vector<8x128xf32>
    %174 = arith.divf %172, %173 : vector<8x128xf32>
    %175 = vector.extract_strided_slice %162 {offsets = [0, 256], sizes = [8, 128], strides = [1, 1]} : vector<8x512xf32> to vector<8x128xf32>
    %176 = math.tanh %175 : vector<8x128xf32>
    %177 = vector.extract_strided_slice %162 {offsets = [0, 384], sizes = [8, 128], strides = [1, 1]} : vector<8x512xf32> to vector<8x128xf32>
    %178 = arith.negf %177 : vector<8x128xf32>
    %179 = math.exp %178 : vector<8x128xf32>
    %cst_36 = arith.constant 1.000000e+00 : f32
    %180 = vector.broadcast %cst_36 : f32 to vector<8x128xf32>
    %181 = arith.addf %180, %179 : vector<8x128xf32>
    %182 = arith.divf %180, %181 : vector<8x128xf32>
    %183 = arith.mulf %174, %156 : vector<8x128xf32>
    %184 = arith.mulf %168, %176 : vector<8x128xf32>
    %185 = arith.addf %183, %184 : vector<8x128xf32>
    %186 = math.tanh %185 : vector<8x128xf32>
    %187 = arith.mulf %182, %186 : vector<8x128xf32>
    %188 = vector.extract_strided_slice %10 {offsets = [6, 0, 0], sizes = [1, 8, 512], strides = [1, 1, 1]} : vector<8x8x512xf32> to vector<1x8x512xf32>
    %189 = vector.shape_cast %188 : vector<1x8x512xf32> to vector<8x512xf32>
    %cst_37 = arith.constant dense<0.000000e+00> : vector<8x512xf32>
    %190 = tpu.matmul %187, %11, %cst_37 {dimension_numbers = #tpu.dot_dimension_numbers<[1], [0], [0], [1], [0, 0, 1, 1], [], []>} : vector<8x128xf32>, vector<128x512xf32>, vector<8x512xf32> -> vector<8x512xf32>
    %191 = arith.addf %189, %190 : vector<8x512xf32>
    %192 = vector.extract_strided_slice %191 {offsets = [0, 0], sizes = [8, 128], strides = [1, 1]} : vector<8x512xf32> to vector<8x128xf32>
    %193 = arith.negf %192 : vector<8x128xf32>
    %194 = math.exp %193 : vector<8x128xf32>
    %cst_38 = arith.constant 1.000000e+00 : f32
    %195 = vector.broadcast %cst_38 : f32 to vector<8x128xf32>
    %196 = arith.addf %195, %194 : vector<8x128xf32>
    %197 = arith.divf %195, %196 : vector<8x128xf32>
    %198 = vector.extract_strided_slice %191 {offsets = [0, 128], sizes = [8, 128], strides = [1, 1]} : vector<8x512xf32> to vector<8x128xf32>
    %199 = arith.negf %198 : vector<8x128xf32>
    %200 = math.exp %199 : vector<8x128xf32>
    %cst_39 = arith.constant 1.000000e+00 : f32
    %201 = vector.broadcast %cst_39 : f32 to vector<8x128xf32>
    %202 = arith.addf %201, %200 : vector<8x128xf32>
    %203 = arith.divf %201, %202 : vector<8x128xf32>
    %204 = vector.extract_strided_slice %191 {offsets = [0, 256], sizes = [8, 128], strides = [1, 1]} : vector<8x512xf32> to vector<8x128xf32>
    %205 = math.tanh %204 : vector<8x128xf32>
    %206 = vector.extract_strided_slice %191 {offsets = [0, 384], sizes = [8, 128], strides = [1, 1]} : vector<8x512xf32> to vector<8x128xf32>
    %207 = arith.negf %206 : vector<8x128xf32>
    %208 = math.exp %207 : vector<8x128xf32>
    %cst_40 = arith.constant 1.000000e+00 : f32
    %209 = vector.broadcast %cst_40 : f32 to vector<8x128xf32>
    %210 = arith.addf %209, %208 : vector<8x128xf32>
    %211 = arith.divf %209, %210 : vector<8x128xf32>
    %212 = arith.mulf %203, %185 : vector<8x128xf32>
    %213 = arith.mulf %197, %205 : vector<8x128xf32>
    %214 = arith.addf %212, %213 : vector<8x128xf32>
    %215 = math.tanh %214 : vector<8x128xf32>
    %216 = arith.mulf %211, %215 : vector<8x128xf32>
    %217 = vector.extract_strided_slice %10 {offsets = [7, 0, 0], sizes = [1, 8, 512], strides = [1, 1, 1]} : vector<8x8x512xf32> to vector<1x8x512xf32>
    %218 = vector.shape_cast %217 : vector<1x8x512xf32> to vector<8x512xf32>
    %cst_41 = arith.constant dense<0.000000e+00> : vector<8x512xf32>
    %219 = tpu.matmul %216, %11, %cst_41 {dimension_numbers = #tpu.dot_dimension_numbers<[1], [0], [0], [1], [0, 0, 1, 1], [], []>} : vector<8x128xf32>, vector<128x512xf32>, vector<8x512xf32> -> vector<8x512xf32>
    %220 = arith.addf %218, %219 : vector<8x512xf32>
    %221 = vector.extract_strided_slice %220 {offsets = [0, 0], sizes = [8, 128], strides = [1, 1]} : vector<8x512xf32> to vector<8x128xf32>
    %222 = arith.negf %221 : vector<8x128xf32>
    %223 = math.exp %222 : vector<8x128xf32>
    %cst_42 = arith.constant 1.000000e+00 : f32
    %224 = vector.broadcast %cst_42 : f32 to vector<8x128xf32>
    %225 = arith.addf %224, %223 : vector<8x128xf32>
    %226 = arith.divf %224, %225 : vector<8x128xf32>
    %227 = vector.extract_strided_slice %220 {offsets = [0, 128], sizes = [8, 128], strides = [1, 1]} : vector<8x512xf32> to vector<8x128xf32>
    %228 = arith.negf %227 : vector<8x128xf32>
    %229 = math.exp %228 : vector<8x128xf32>
    %cst_43 = arith.constant 1.000000e+00 : f32
    %230 = vector.broadcast %cst_43 : f32 to vector<8x128xf32>
    %231 = arith.addf %230, %229 : vector<8x128xf32>
    %232 = arith.divf %230, %231 : vector<8x128xf32>
    %233 = vector.extract_strided_slice %220 {offsets = [0, 256], sizes = [8, 128], strides = [1, 1]} : vector<8x512xf32> to vector<8x128xf32>
    %234 = math.tanh %233 : vector<8x128xf32>
    %235 = vector.extract_strided_slice %220 {offsets = [0, 384], sizes = [8, 128], strides = [1, 1]} : vector<8x512xf32> to vector<8x128xf32>
    %236 = arith.negf %235 : vector<8x128xf32>
    %237 = math.exp %236 : vector<8x128xf32>
    %cst_44 = arith.constant 1.000000e+00 : f32
    %238 = vector.broadcast %cst_44 : f32 to vector<8x128xf32>
    %239 = arith.addf %238, %237 : vector<8x128xf32>
    %240 = arith.divf %238, %239 : vector<8x128xf32>
    %241 = arith.mulf %232, %214 : vector<8x128xf32>
    %242 = arith.mulf %226, %234 : vector<8x128xf32>
    %243 = arith.addf %241, %242 : vector<8x128xf32>
    %244 = math.tanh %243 : vector<8x128xf32>
    %245 = arith.mulf %240, %244 : vector<8x128xf32>
    %c0_45 = arith.constant 0 : index
    %c0_46 = arith.constant 0 : index
    %246 = vector.load %arg12[%c0_45, %c0_46] : memref<8x128xf32, #tpu.memory_space<vmem>>, vector<8x128xf32>
    tpu.vector_store %arg12[%c0_45, %c0_46], %245 {strides = array<i32>} : memref<8x128xf32, #tpu.memory_space<vmem>>, vector<8x128xf32>,
    %c0_47 = arith.constant 0 : index
    %c0_48 = arith.constant 0 : index
    %247 = vector.load %arg13[%c0_47, %c0_48] : memref<8x128xf32, #tpu.memory_space<vmem>>, vector<8x128xf32>
    tpu.vector_store %arg13[%c0_47, %c0_48], %243 {strides = array<i32>} : memref<8x128xf32, #tpu.memory_space<vmem>>, vector<8x128xf32>,
    %c0_i32_49 = arith.constant 0 : i32
    %248 = arith.cmpi eq, %arg1, %c0_i32_49 : i32
    %249 = arith.extui %248 : i1 to i32
    %c0_i32_50 = arith.constant 0 : i32
    %250 = arith.cmpi ne, %249, %c0_i32_50 : i32
    scf.if %250 {
      %c7 = arith.constant 7 : index
      %c0_51 = arith.constant 0 : index
      %c0_52 = arith.constant 0 : index
      %251 = vector.load %arg2[%c7, %c0_51, %c0_52] : memref<8x8x32xf32, #tpu.memory_space<vmem>>, vector<1x8x32xf32>
      %252 = vector.shape_cast %251 : vector<1x8x32xf32> to vector<8x32xf32>
      %c0_53 = arith.constant 0 : index
      %c0_54 = arith.constant 0 : index
      %253 = vector.load %arg6[%c0_53, %c0_54] : memref<32x512xf32, #tpu.memory_space<vmem>>, vector<32x512xf32>
      %cst_55 = arith.constant dense<0.000000e+00> : vector<8x512xf32>
      %254 = tpu.matmul %252, %253, %cst_55 {dimension_numbers = #tpu.dot_dimension_numbers<[1], [0], [0], [1], [0, 0, 1, 1], [], []>} : vector<8x32xf32>, vector<32x512xf32>, vector<8x512xf32> -> vector<8x512xf32>
      %c0_56 = arith.constant 0 : index
      %c0_57 = arith.constant 0 : index
      %255 = vector.load %arg7[%c0_56, %c0_57] : memref<1x512xf32, #tpu.memory_space<vmem>>, vector<1x512xf32>
      %256 = vector.broadcast %255 : vector<1x512xf32> to vector<8x512xf32>
      %257 = arith.addf %254, %256 : vector<8x512xf32>
      %258 = vector.extract_strided_slice %257 {offsets = [0, 0], sizes = [8, 128], strides = [1, 1]} : vector<8x512xf32> to vector<8x128xf32>
      %259 = arith.negf %258 : vector<8x128xf32>
      %260 = math.exp %259 : vector<8x128xf32>
      %cst_58 = arith.constant 1.000000e+00 : f32
      %261 = vector.broadcast %cst_58 : f32 to vector<8x128xf32>
      %262 = arith.addf %261, %260 : vector<8x128xf32>
      %263 = arith.divf %261, %262 : vector<8x128xf32>
      %264 = vector.extract_strided_slice %257 {offsets = [0, 256], sizes = [8, 128], strides = [1, 1]} : vector<8x512xf32> to vector<8x128xf32>
      %265 = math.tanh %264 : vector<8x128xf32>
      %266 = vector.extract_strided_slice %257 {offsets = [0, 384], sizes = [8, 128], strides = [1, 1]} : vector<8x512xf32> to vector<8x128xf32>
      %267 = arith.negf %266 : vector<8x128xf32>
      %268 = math.exp %267 : vector<8x128xf32>
      %cst_59 = arith.constant 1.000000e+00 : f32
      %269 = vector.broadcast %cst_59 : f32 to vector<8x128xf32>
      %270 = arith.addf %269, %268 : vector<8x128xf32>
      %271 = arith.divf %269, %270 : vector<8x128xf32>
      %272 = arith.mulf %263, %265 : vector<8x128xf32>
      %273 = math.tanh %272 : vector<8x128xf32>
      %274 = arith.mulf %271, %273 : vector<8x128xf32>
      %c0_60 = arith.constant 0 : index
      %c0_61 = arith.constant 0 : index
      %275 = vector.load %arg8[%c0_60, %c0_61] : memref<128x128xf32, #tpu.memory_space<vmem>>, vector<128x128xf32>
      %cst_62 = arith.constant dense<0.000000e+00> : vector<8x128xf32>
      %276 = tpu.matmul %245, %275, %cst_62 {dimension_numbers = #tpu.dot_dimension_numbers<[1], [0], [0], [1], [0, 0, 1, 1], [], []>} : vector<8x128xf32>, vector<128x128xf32>, vector<8x128xf32> -> vector<8x128xf32>
      %c0_63 = arith.constant 0 : index
      %c0_64 = arith.constant 0 : index
      %277 = vector.load %arg9[%c0_63, %c0_64] : memref<128x128xf32, #tpu.memory_space<vmem>>, vector<128x128xf32>
      %cst_65 = arith.constant dense<0.000000e+00> : vector<8x128xf32>
      %278 = tpu.matmul %274, %277, %cst_65 {dimension_numbers = #tpu.dot_dimension_numbers<[1], [0], [0], [1], [0, 0, 1, 1], [], []>} : vector<8x128xf32>, vector<128x128xf32>, vector<8x128xf32> -> vector<8x128xf32>
      %279 = arith.addf %276, %278 : vector<8x128xf32>
      %c0_66 = arith.constant 0 : index
      %c0_67 = arith.constant 0 : index
      %280 = vector.load %arg10[%c0_66, %c0_67] : memref<1x128xf32, #tpu.memory_space<vmem>>, vector<1x128xf32>
      %281 = vector.broadcast %280 : vector<1x128xf32> to vector<8x128xf32>
      %282 = arith.addf %279, %281 : vector<8x128xf32>
      %283 = tpu.iota {dimensions = array<i32: 1>} : vector<8x128xi32>
      %c4_i32 = arith.constant 4 : i32
      %284 = vector.broadcast %c4_i32 : i32 to vector<8x128xi32>
      %285 = arith.cmpi slt, %283, %284 : vector<8x128xi32>
      %cst_68 = arith.constant -1.000000e+30 : f32
      %286 = vector.broadcast %cst_68 : f32 to vector<8x128xf32>
      %287 = arith.select %285, %282, %286 : vector<8x128xi1>, vector<8x128xf32>
      %cst_69 = arith.constant dense<0xFF800000> : vector<8xf32>
      %288 = vector.multi_reduction <maximumf>, %287, %cst_69 [1] : vector<8x128xf32> to vector<8xf32>
      %289 = vector.shape_cast %288 : vector<8xf32> to vector<8x1xf32>
      %290 = vector.broadcast %289 : vector<8x1xf32> to vector<8x128xf32>
      %291 = arith.subf %287, %290 : vector<8x128xf32>
      %292 = math.exp %291 : vector<8x128xf32>
      %cst_70 = arith.constant dense<0.000000e+00> : vector<8xf32>
      %293 = vector.multi_reduction <add>, %292, %cst_70 [1] : vector<8x128xf32> to vector<8xf32>
      %294 = vector.shape_cast %293 : vector<8xf32> to vector<8x1xf32>
      %295 = math.log %294 : vector<8x1xf32>
      %296 = vector.broadcast %295 : vector<8x1xf32> to vector<8x128xf32>
      %297 = arith.subf %291, %296 : vector<8x128xf32>
      %c0_71 = arith.constant 0 : index
      %c0_72 = arith.constant 0 : index
      %298 = vector.load %arg11[%c0_71, %c0_72] : memref<8x128xf32, #tpu.memory_space<vmem>>, vector<8x128xf32>
      tpu.vector_store %arg11[%c0_71, %c0_72], %297 {strides = array<i32>} : memref<8x128xf32, #tpu.memory_space<vmem>>, vector<8x128xf32>,
    } else {
    }
    return
  }
  func.func @transform_0(%arg0: i32, %arg1: i32) -> (i32, i32, i32) {
    %c0_i32 = arith.constant 0 : i32
    %c0_i32_0 = arith.constant 0 : i32
    return %arg1, %arg0, %c0_i32 : i32, i32, i32
  }
  func.func @transform_1(%arg0: i32, %arg1: i32) -> (i32, i32) {
    %c0_i32 = arith.constant 0 : i32
    %c0_i32_0 = arith.constant 0 : i32
    %c0_i32_1 = arith.constant 0 : i32
    return %c0_i32, %c0_i32_0 : i32, i32
  }
  func.func @transform_2(%arg0: i32, %arg1: i32) -> (i32, i32) {
    %c0_i32 = arith.constant 0 : i32
    %c0_i32_0 = arith.constant 0 : i32
    %c0_i32_1 = arith.constant 0 : i32
    return %c0_i32, %c0_i32_0 : i32, i32
  }
  func.func @transform_3(%arg0: i32, %arg1: i32) -> (i32, i32) {
    %c0_i32 = arith.constant 0 : i32
    %c0_i32_0 = arith.constant 0 : i32
    %c0_i32_1 = arith.constant 0 : i32
    return %c0_i32, %c0_i32_0 : i32, i32
  }
  func.func @transform_4(%arg0: i32, %arg1: i32) -> (i32, i32) {
    %c0_i32 = arith.constant 0 : i32
    %c0_i32_0 = arith.constant 0 : i32
    %c0_i32_1 = arith.constant 0 : i32
    return %c0_i32, %c0_i32_0 : i32, i32
  }
  func.func @transform_5(%arg0: i32, %arg1: i32) -> (i32, i32) {
    %c0_i32 = arith.constant 0 : i32
    %c0_i32_0 = arith.constant 0 : i32
    %c0_i32_1 = arith.constant 0 : i32
    return %c0_i32, %c0_i32_0 : i32, i32
  }
  func.func @transform_6(%arg0: i32, %arg1: i32) -> (i32, i32) {
    %c0_i32 = arith.constant 0 : i32
    %c0_i32_0 = arith.constant 0 : i32
    %c0_i32_1 = arith.constant 0 : i32
    return %c0_i32, %c0_i32_0 : i32, i32
  }
  func.func @transform_7(%arg0: i32, %arg1: i32) -> (i32, i32) {
    %c0_i32 = arith.constant 0 : i32
    %c0_i32_0 = arith.constant 0 : i32
    %c0_i32_1 = arith.constant 0 : i32
    return %c0_i32, %c0_i32_0 : i32, i32
  }
  func.func @transform_8(%arg0: i32, %arg1: i32) -> (i32, i32) {
    %c0_i32 = arith.constant 0 : i32
    %c0_i32_0 = arith.constant 0 : i32
    %c0_i32_1 = arith.constant 0 : i32
    return %c0_i32, %c0_i32_0 : i32, i32
  }
  func.func @transform_9(%arg0: i32, %arg1: i32) -> (i32, i32) {
    %c0_i32 = arith.constant 0 : i32
    %c0_i32_0 = arith.constant 0 : i32
    return %arg0, %c0_i32 : i32, i32
  }
}

</mosaic_0001>

<bundles_post_ra>
// kernel: lstm_classifier_forward.1
= control target key start
LH: loop header
LB: loop body
LE: loop exit
PB: predicated region body
PF: predicated region fallthrough
CT: control target
= control target key end

     0   :  { %vm72_vm0 = vcmask 261120   ;;  %s3662_s1 = inlined_call_operand.vmem [shape: f32[32,512], index: 1, kind: input, shape index: {}]   ;;  %s3663_s0 = inlined_call_operand.vmem [shape: f32[8,8,32], index: 0, kind: input, shape index: {}]   ;;  %s3664_s2 = inlined_call_operand.vmem [shape: f32[128,512], index: 2, kind: input, shape index: {}]   ;;  %s3665_s3 = inlined_call_operand.vmem [shape: f32[1,512], index: 3, kind: input, shape index: {}]   ;;  %s3666_s4 = inlined_call_operand.vmem [shape: f32[32,512], index: 4, kind: input, shape index: {}]   ;;  %s3667_s6 = inlined_call_operand.vmem [shape: f32[128,128], index: 6, kind: input, shape index: {}]   ;;  %s3668_s7 = inlined_call_operand.vmem [shape: f32[128,128], index: 7, kind: input, shape index: {}]   ;;  %s3669_s5 = inlined_call_operand.vmem [shape: f32[1,512], index: 5, kind: input, shape index: {}]   ;;  %s3670_s8 = inlined_call_operand.vmem [shape: f32[1,128], index: 8, kind: input, shape index: {}]   ;;  %s3671_s9 = inlined_call_operand.vmem [shape: f32[8,128], index: 9, kind: output, shape index: {}]  }
   0x1   :  { %v58_v0 = vld [vmem:[%s3662_s1 + $0x60] sm:$0xff]  ;;  %v60_v1 = vld [vmem:[%s3662_s1 + $0x70] sm:$0xff]  ;;  %v61_v2 = vld [vmem:[%s3662_s1 + $0x78] sm:$0xff] }
   0x2   :  { %109 = vmatpush.msra.mxu0 %v58_v0  ;;  %1793 = vmatpush.msra.mxu1 %v58_v0  ;;  %v54_v3 = vld [vmem:[%s3662_s1 + $0x40] sm:$0xff]  ;;  %v56_v4 = vld [vmem:[%s3662_s1 + $0x50] sm:$0xff]  ;;  %v57_v5 = vld [vmem:[%s3662_s1 + $0x58] sm:$0xff] }
   0x3   :  { %191 = vmatpush.msra.mxu2 %v60_v1  ;;  %232 = vmatpush.msra.mxu3 %v61_v2  ;;  %v50_v6 = vld [vmem:[%s3662_s1 + $0x20] sm:$0xff]  ;;  %v52_v7 = vld [vmem:[%s3662_s1 + $0x30] sm:$0xff]  ;;  %v53_v8 = vld [vmem:[%s3662_s1 + $0x38] sm:$0xff] }
   0x4   :  { %110 = vmatpush.msra.mxu0 %v54_v3  ;;  %1794 = vmatpush.msra.mxu1 %v54_v3  ;;  %v46_v9 = vld [vmem:[%s3662_s1] sm:$0xff]  ;;  %v48_v10 = vld [vmem:[%s3662_s1 + $0x10] sm:$0xff]  ;;  %v49_v11 = vld [vmem:[%s3662_s1 + $0x18] sm:$0xff] }
   0x5   :  { %192 = vmatpush.msra.mxu2 %v56_v4  ;;  %233 = vmatpush.msra.mxu3 %v57_v5  ;;  %v2097_v12 = vld [vmem:[%s3663_s0] sm:$0xff]  ;;  %v2102_v13 = vld [vmem:[%s3663_s0 + $0x30] sm:$0xff]  ;;  %v59_v14 = vld [vmem:[%s3662_s1 + $0x68] sm:$0xff] }
   0x6   :  { %111 = vmatpush.msra.mxu0 %v50_v6  ;;  %1795 = vmatpush.msra.mxu1 %v50_v6  ;;  %v2110_v15 = vld [vmem:[%s3664_s2 + $0x1e0] sm:$0xff]  ;;  %v55_v16 = vld [vmem:[%s3662_s1 + $0x48] sm:$0xff]  ;;  %v2122_v17 = vld [vmem:[%s3664_s2 + $0x1f8] sm:$0xff] }
   0x7   :  { %193 = vmatpush.msra.mxu2 %v52_v7  ;;  %234 = vmatpush.msra.mxu3 %v53_v8  ;;  %3772 = vst [vmem:[#allocation4_spill] sm:$0xff] %v2110_v15  ;;  %v2129_v18 = vld [vmem:[%s3664_s2 + $0x1c0] sm:$0xff]  ;;  %v51_v19 = vld [vmem:[%s3662_s1 + $0x28] sm:$0xff]  ;;  %v2140_v20 = vld [vmem:[%s3664_s2 + $0x1d8] sm:$0xff] }
   0x8   :  { %112 = vmatpush.msra.mxu0 %v46_v9  ;;  %1796 = vmatpush.msra.mxu1 %v46_v9  ;;  %3773 = vst [vmem:[#allocation5_spill] sm:$0xff] %v2129_v18  ;;  %v2145_v21 = vld [vmem:[%s3664_s2 + $0x1a0] sm:$0xff]  ;;  %v2151_v22 = vld [vmem:[%s3664_s2 + $0x1f0] sm:$0xff]  ;;  %v47_v23 = vld [vmem:[%s3662_s1 + $0x8] sm:$0xff] }
   0x9   :  { %194 = vmatpush.msra.mxu2 %v48_v10  ;;  %235 = vmatpush.msra.mxu3 %v49_v11  ;;  %3774 = vst [vmem:[#allocation6_spill] sm:$0xff] %v2145_v21  ;;  %v2160_v24 = vld [vmem:[%s3664_s2 + $0x1b8] sm:$0xff]  ;;  %v2166_v25 = vld [vmem:[%s3663_s0 + $0x8] sm:$0xff]  ;;  %v2177_v27 = vld [vmem:[%s3664_s2 + $0x1d0] sm:$0xff] }
   0xa   :  { %1731 = vmatmul.msk.f32.vlgmr.msra.gmra.mxu0 %vm72_vm0, %v2097_v12  ;;  %1737 = vmatmul.msk.f32.vlgmr.msra.gmra.mxu1 %vm72_vm0, %v2102_v13  ;;  %v2171_v26 = vld [vmem:[%s3663_s0 + $0x38] sm:$0xff]  ;;  %v2182_v28 = vld [vmem:[%s3664_s2 + $0x1e8] sm:$0xff]  ;;  %v2189_v29 = vld [vmem:[%s3664_s2 + $0x180] sm:$0xff] }
   0xb   :  { %150 = vmatpush.msrb.mxu1 %v59_v14  ;;  %1747 = vmatmul.msk.f32.vlgmr.msra.gmra.mxu2 %vm72_vm0, %v2097_v12  ;;  %v2199_v30 = vld [vmem:[%s3664_s2 + $0x1c8] sm:$0xff]  ;;  %v2204_v31 = vld [vmem:[%s3664_s2 + $0x198] sm:$0xff]  ;;  %v2212_v32 = vld [vmem:[%s3664_s2 + $0x160] sm:$0xff] }
   0xc   :  { %1755 = vmatmul.msk.f32.vlgmr.msra.gmra.mxu3 %vm72_vm0, %v2097_v12  ;;  %327 = vmatpush.msrb.mxu0 %v2110_v15  ;;  %v2217_v33 = vld [vmem:[%s3664_s2 + $0x1b0] sm:$0xff]  ;;  %v2225_v34 = vld [vmem:[%s3664_s2 + $0x1a8] sm:$0xff]  ;;  %v2230_v35 = vld [vmem:[%s3664_s2 + $0x178] sm:$0xff] }
   0xd   :  { %151 = vmatpush.msrb.mxu1 %v55_v16  ;;  %387 = vmatpush.msrb.mxu3 %v2122_v17  ;;  %v2236_v36 = vld [vmem:[%s3664_s2 + $0x140] sm:$0xff]  ;;  %v2242_v37 = vld [vmem:[%s3664_s2 + $0x190] sm:$0xff]  ;;  %v2248_v38 = vld [vmem:[%s3664_s2 + $0x188] sm:$0xff] }
   0xe   :  { %328 = vmatpush.msrb.mxu0 %v2129_v18  ;;  %367 = vmatpush.msrb.mxu2 %v2151_v22  ;;  %v2254_v39 = vld [vmem:[%s3664_s2 + $0x158] sm:$0xff]  ;;  %v2259_v40 = vld [vmem:[%s3663_s0 + $0x10] sm:$0xff]  ;;  %v2267_v41 = vld [vmem:[%s3664_s2 + $0x120] sm:$0xff] }
   0xf   :  { %152 = vmatpush.msrb.mxu1 %v51_v19  ;;  %388 = vmatpush.msrb.mxu3 %v2140_v20  ;;  %v2274_v42 = vld [vmem:[%s3664_s2 + $0x168] sm:$0xff]  ;;  %v2284_v43 = vld [vmem:[%s3664_s2 + $0x100] sm:$0xff]  ;;  %v2289_v44 = vld [vmem:[%s3664_s2 + $0x170] sm:$0xff] }
  0x10   :  { %329 = vmatpush.msrb.mxu0 %v2145_v21  ;;  %368 = vmatpush.msrb.mxu2 %v2177_v27  ;;  %v2297_v45 = vld [vmem:[%s3664_s2 + $0x148] sm:$0xff]  ;;  %v2302_v46 = vld [vmem:[%s3664_s2 + $0x138] sm:$0xff]  ;;  %v2310_v47 = vld [vmem:[%s3664_s2 + $0xe0] sm:$0xff] }
  0x11   :  { %153 = vmatpush.msrb.mxu1 %v47_v23  ;;  %389 = vmatpush.msrb.mxu3 %v2160_v24  ;;  %v2315_v48 = vld [vmem:[%s3664_s2 + $0x150] sm:$0xff]  ;;  %v2321_v49 = vld [vmem:[%s3664_s2 + $0x128] sm:$0xff]  ;;  %v2327_v50 = vld [vmem:[%s3664_s2 + $0x118] sm:$0xff] }
  0x12   :  { %1732 = vmatmul.msk.f32.gmra.mxu0 %vm72_vm0, %v2166_v25  ;;  %1738 = vmatmul.msk.f32.gmra.mxu1 %vm72_vm0, %v2171_v26  ;;  %v2332_v51 = vld [vmem:[%s3664_s2 + $0xc0] sm:$0xff]  ;;  %v2338_v52 = vld [vmem:[%s3664_s2 + $0x130] sm:$0xff]  ;;  %v2344_v53 = vld [vmem:[%s3663_s0 + $0x18] sm:$0xff] }
  0x13   :  { %1748 = vmatmul.msk.f32.gmra.mxu2 %vm72_vm0, %v2166_v25  ;;  %347 = vmatpush.msra.mxu1 %v2182_v28  ;;  %v2351_v54 = vld [vmem:[%s3664_s2 + $0xa0] sm:$0xff]  ;;  %v2359_v55 = vld [vmem:[%s3664_s2 + $0x108] sm:$0xff]  ;;  %v2374_v57 = vld [vmem:[%s3664_s2 + $0x110] sm:$0xff] }
  0x14   :  { %1756 = vmatmul.msk.f32.gmra.mxu3 %vm72_vm0, %v2166_v25  ;;  %330 = vmatpush.msrb.mxu0 %v2189_v29  ;;  %3775 = vst [vmem:[#allocation7_spill] sm:$0xff] %v2351_v54  ;;  %v2369_v56 = vld [vmem:[%s3664_s2 + $0x80] sm:$0xff]  ;;  %v2382_v58 = vld [vmem:[%s3664_s2 + $0xe8] sm:$0xff]  ;;  %v2387_v59 = vld [vmem:[%s3664_s2 + $0xf8] sm:$0xff] }
  0x15   :  { %348 = vmatpush.msra.mxu1 %v2199_v30  ;;  %390 = vmatpush.msrb.mxu3 %v2204_v31  ;;  %3776 = vst [vmem:[#allocation8_spill] sm:$0xff] %v2369_v56  ;;  %v2394_v60 = vld [vmem:[%s3664_s2 + $0x60] sm:$0xff]  ;;  %v2400_v61 = vld [vmem:[%s3664_s2 + $0xf0] sm:$0xff]  ;;  %v2407_v62 = vld [vmem:[%s3664_s2 + $0xd8] sm:$0xff] }
  0x16   :  { %331 = vmatpush.msrb.mxu0 %v2212_v32  ;;  %369 = vmatpush.msrb.mxu2 %v2217_v33  ;;  %3777 = vst [vmem:[#allocation9_spill] sm:$0xff] %v2394_v60  ;;  %v2412_v63 = vld [vmem:[%s3664_s2 + $0xc8] sm:$0xff]  ;;  %v2417_v0 = vld [vmem:[%s3664_s2 + $0x40] sm:$0xff]  ;;  %v2424_v1 = vld [vmem:[%s3664_s2 + $0xd0] sm:$0xff] }
  0x17   :  { %349 = vmatpush.msra.mxu1 %v2225_v34  ;;  %391 = vmatpush.msrb.mxu3 %v2230_v35  ;;  %3778 = vst [vmem:[#allocation10_spill] sm:$0xff] %v2407_v62  ;;  %v42_v2 = vld [vmem:[%s3663_s0 + $0x20] sm:$0xff]  ;;  %v2443_v4 = vld [vmem:[%s3664_s2 + $0xb0] sm:$0xff]  ;;  %v2456_v6 = vld [vmem:[%s3664_s2 + $0xb8] sm:$0xff] }
  0x18   :  { %332 = vmatpush.msrb.mxu0 %v2236_v36  ;;  %370 = vmatpush.msrb.mxu2 %v2242_v37  ;;  %3779 = vst [vmem:[#allocation11_spill] sm:$0xff] %v2417_v0  ;;  %v2434_v3 = vld [vmem:[%s3664_s2 + $0x20] sm:$0xff]  ;;  %v2463_v7 = vld [vmem:[%s3664_s2 + $0x90] sm:$0xff]  ;;  %v2468_v8 = vld [vmem:[%s3664_s2 + $0xa8] sm:$0xff] }
  0x19   :  { %350 = vmatpush.msra.mxu1 %v2248_v38  ;;  %392 = vmatpush.msrb.mxu3 %v2254_v39  ;;  %3780 = vst [vmem:[#allocation12_spill] sm:$0xff] %v2424_v1  ;;  %v2451_v5 = vld [vmem:[%s3664_s2] sm:$0xff]  ;;  %v2475_v9 = vld [vmem:[%s3664_s2 + $0x98] sm:$0xff]  ;;  %v2482_v10 = vld [vmem:[%s3664_s2 + $0x70] sm:$0xff] }
  0x1a   :  { %1733 = vmatmul.msk.f32.gmra.mxu0 %vm72_vm0, %v2259_v40  ;;  %1739 = vmatmul.msk.f32.vlgmr.msrb.gmra.mxu1 %vm72_vm0, %v2097_v12  ;;  %3781 = vst [vmem:[#allocation13_spill] sm:$0xff] %v2434_v3  ;;  %v2487_v11 = vld [vmem:[%s3664_s2 + $0x88] sm:$0xff]  ;;  %v2494_v12 = vld [vmem:[%s3664_s2 + $0x78] sm:$0xff]  ;;  %v2512_v19 = vld [vmem:[%s3664_s2 + $0x50] sm:$0xff] }
  0x1b   :  { %1749 = vmatmul.msk.f32.gmra.mxu2 %vm72_vm0, %v2259_v40  ;;  %333 = vmatpush.msrb.mxu0 %v2267_v41  ;;  %3782 = vst [vmem:[#allocation14_spill] sm:$0xff] %v2443_v4  ;;  %v43_v14 = vld [vmem:[%s3663_s0 + $0x28] sm:$0xff]  ;;  %v2505_v16 = vld [vmem:[%s3664_s2 + $0x58] sm:$0xff] }
  0x1c   :  { %1757 = vmatmul.msk.f32.gmra.mxu3 %vm72_vm0, %v2259_v40  ;;  %351 = vmatpush.msra.mxu1 %v2274_v42  ;;  %3783 = vst [vmem:[#allocation15_spill] sm:$0xff] %v2451_v5  ;;  %v2521_v23 = vld [vmem:[%s3664_s2 + $0x38] sm:$0xff] }
  0x1d   :  { %334 = vmatpush.msrb.mxu0 %v2284_v43  ;;  %371 = vmatpush.msrb.mxu2 %v2289_v44  ;;  %3784 = vst [vmem:[#allocation16_spill] sm:$0xff] %v2456_v6 }
  0x1e   :  { %352 = vmatpush.msra.mxu1 %v2297_v45  ;;  %393 = vmatpush.msrb.mxu3 %v2302_v46  ;;  %3785 = vst [vmem:[#allocation17_spill] sm:$0xff] %v2463_v7 }
  0x1f   :  { %335 = vmatpush.msrb.mxu0 %v2310_v47  ;;  %372 = vmatpush.msrb.mxu2 %v2315_v48  ;;  %3786 = vst [vmem:[#allocation18_spill] sm:$0xff] %v2468_v8 }
  0x20   :  { %353 = vmatpush.msra.mxu1 %v2321_v49  ;;  %394 = vmatpush.msrb.mxu3 %v2327_v50  ;;  %3787 = vst [vmem:[#allocation19_spill] sm:$0xff] %v2475_v9 }
  0x21   :  { %336 = vmatpush.msrb.mxu0 %v2332_v51  ;;  %373 = vmatpush.msrb.mxu2 %v2338_v52  ;;  %3788 = vst [vmem:[#allocation20_spill] sm:$0xff] %v2482_v10 }
  0x22   :  { %1734 = vmatmul.msk.f32.gmra.mxu0 %vm72_vm0, %v2344_v53  ;;  %1740 = vmatmul.msk.f32.gmra.mxu1 %vm72_vm0, %v2166_v25  ;;  %3789 = vst [vmem:[#allocation21_spill] sm:$0xff] %v2487_v11  ;;  %v2526_v25 = vld [vmem:[%s3664_s2 + $0x68] sm:$0xff] }
  0x23   :  { %1750 = vmatmul.msk.f32.gmra.mxu2 %vm72_vm0, %v2344_v53  ;;  %337 = vmatpush.msrb.mxu0 %v2351_v54  ;;  %3790 = vst [vmem:[#allocation22_spill] sm:$0xff] %v2494_v12 }
  0x24   :  { %1758 = vmatmul.msk.f32.gmra.mxu3 %vm72_vm0, %v2344_v53  ;;  %354 = vmatpush.msra.mxu1 %v2359_v55  ;;  %3791 = vst [vmem:[#allocation23_spill] sm:$0xff] %v2505_v16 }
  0x25   :  { %338 = vmatpush.msrb.mxu0 %v2369_v56  ;;  %374 = vmatpush.msrb.mxu2 %v2374_v57  ;;  %3792 = vst [vmem:[#allocation24_spill] sm:$0xff] %v2512_v19 }
  0x26   :  { %355 = vmatpush.msra.mxu1 %v2382_v58  ;;  %395 = vmatpush.msrb.mxu3 %v2387_v59  ;;  %3793 = vst [vmem:[#allocation25_spill] sm:$0xff] %v2521_v23 }
  0x27   :  { %339 = vmatpush.msrb.mxu0 %v2394_v60  ;;  %375 = vmatpush.msrb.mxu2 %v2400_v61  ;;  %3794 = vst [vmem:[#allocation26_spill] sm:$0xff] %v2526_v25 }
  0x28   :  { %396 = vmatpush.msrb.mxu3 %v2407_v62  ;;  %356 = vmatpush.msra.mxu1 %v2412_v63 }
  0x29   :  { %340 = vmatpush.msrb.mxu0 %v2417_v0  ;;  %376 = vmatpush.msrb.mxu2 %v2424_v1 }
  0x2a   :  { %1735 = vmatmul.msk.f32.gmra.mxu0 %vm72_vm0, %v42_v2  ;;  %1741 = vmatmul.msk.f32.gmra.mxu1 %vm72_vm0, %v2259_v40  ;;  %v2533_v40 = vld [vmem:[%s3664_s2 + $0x30] sm:$0xff] }
  0x2b   :  { %1751 = vmatmul.msk.f32.gmra.mxu2 %vm72_vm0, %v42_v2  ;;  %341 = vmatpush.msrb.mxu0 %v2434_v3  ;;  %3795 = vst [vmem:[#allocation27_spill] sm:$0xff] %v2533_v40 }
  0x2c   :  { %1759 = vmatmul.msk.f32.gmra.mxu3 %vm72_vm0, %v42_v2  ;;  %377 = vmatpush.msrb.mxu2 %v2443_v4 }
  0x2d   :  { %342 = vmatpush.msrb.mxu0 %v2451_v5  ;;  %397 = vmatpush.msrb.mxu3 %v2456_v6  ;;  %v2558_v5 = vld [vmem:[%s3664_s2 + $0x28] sm:$0xff] }
  0x2e   :  { %378 = vmatpush.msrb.mxu2 %v2463_v7  ;;  %357 = vmatpush.msra.mxu1 %v2468_v8  ;;  %3799 = vst [vmem:[#allocation31_spill] sm:$0xff] %v2558_v5 }
  0x2f   :  { %398 = vmatpush.msrb.mxu3 %v2475_v9  ;;  %474 = vmatpush.msra.mxu0 %v2110_v15  ;;  %v2551_v15 = vld [vmem:[%s3664_s2 + $0x10] sm:$0xff] }
  0x30   :  { %379 = vmatpush.msrb.mxu2 %v2482_v10  ;;  %358 = vmatpush.msra.mxu1 %v2487_v11  ;;  %3798 = vst [vmem:[#allocation30_spill] sm:$0xff] %v2551_v15 }
  0x31   :  { %399 = vmatpush.msrb.mxu3 %v2494_v12  ;;  %475 = vmatpush.msra.mxu0 %v2129_v18  ;;  %v2545_v18 = vld [vmem:[%s3664_s2 + $0x48] sm:$0xff] }
  0x32   :  { %1736 = vmatmul.msk.f32.gmra.mxu0 %vm72_vm0, %v43_v14  ;;  %1742 = vmatmul.msk.f32.gmra.mxu1 %vm72_vm0, %v2344_v53  ;;  %v2540_v53 = vld [vmem:[%s3664_s2 + $0x18] sm:$0xff]  ;;  %3797 = vst [vmem:[#allocation29_spill] sm:$0xff] %v2545_v18 }
  0x33   :  { %1752 = vmatmul.msk.f32.gmra.mxu2 %vm72_vm0, %v43_v14  ;;  %400 = vmatpush.msrb.mxu3 %v2505_v16  ;;  %3796 = vst [vmem:[#allocation28_spill] sm:$0xff] %v2540_v53 }
  0x34   :  { %1760 = vmatmul.msk.f32.gmra.mxu3 %vm72_vm0, %v43_v14  ;;  %380 = vmatpush.msrb.mxu2 %v2512_v19 }
  0x35   :  { %401 = vmatpush.msrb.mxu3 %v2521_v23  ;;  %359 = vmatpush.msra.mxu1 %v2526_v25  ;;  %v2567_v23 = vld [vmem:[%s3664_s2 + $0x8] sm:$0xff] }
  0x36   :  { %381 = vmatpush.msrb.mxu2 %v2533_v40  ;;  %476 = vmatpush.msra.mxu0 %v2145_v21  ;;  %3800 = vst [vmem:[#allocation32_spill] sm:$0xff] %v2567_v23  ;;  %v2007_v21 = vmov 0.0  }
  0x37   :  { %402 = vmatpush.msrb.mxu3 %v2540_v53  ;;  %360 = vmatpush.msra.mxu1 %v2545_v18 }
  0x38   :  { %382 = vmatpush.msrb.mxu2 %v2551_v15  ;;  %477 = vmatpush.msra.mxu0 %v2189_v29 }
  0x39   :  { %534 = vmatpush.msra.mxu3 %v2122_v17  ;;  %361 = vmatpush.msra.mxu1 %v2558_v5 }
  0x3a   :  { %514 = vmatpush.msra.mxu2 %v2151_v22  ;;  %1743 = vmatmul.msk.f32.gmra.mxu1 %vm72_vm0, %v42_v2  ;;  %v3803_v2 = vld [vmem:[#allocation4_spill] sm:$0xff] }
  0x3b   :  { %343 = vmatmul.f32.vlgmr.msrb.gmra.mxu0 %v2007_v21  ;;  %1753 = vmatmul.msk.f32.gmra.mxu2 %vm72_vm0, %v2102_v13 }
  0x3c   :  { %362 = vmatpush.msra.mxu1 %v2567_v23  ;;  %1761 = vmatmul.msk.f32.gmra.mxu3 %vm72_vm0, %v2102_v13 }
  0x3d   :  { %515 = vmatpush.msra.mxu2 %v2177_v27  ;;  %535 = vmatpush.msra.mxu3 %v2140_v20 }
  0x3e   :  { %494 = vmatpush.msrb.mxu1 %v2182_v28  ;;  %478 = vmatpush.msra.mxu0 %v2212_v32 }
  0x3f   :  { %516 = vmatpush.msra.mxu2 %v2217_v33  ;;  %536 = vmatpush.msra.mxu3 %v2160_v24 }
  0x40   :  { %495 = vmatpush.msrb.mxu1 %v2199_v30  ;;  %479 = vmatpush.msra.mxu0 %v2236_v36 }
  0x41   :  { %517 = vmatpush.msra.mxu2 %v2242_v37  ;;  %537 = vmatpush.msra.mxu3 %v2204_v31 }
  0x42   :  { %496 = vmatpush.msrb.mxu1 %v2225_v34  ;;  %480 = vmatpush.msra.mxu0 %v2267_v41 }
  0x43   :  { %1744 = vmatmul.msk.f32.gmra.mxu1 %vm72_vm0, %v43_v14  ;;  %1754 = vmatmul.msk.f32.gmra.mxu2 %vm72_vm0, %v2171_v26  ;;  %v3805_v14 = vld [vmem:[#allocation6_spill] sm:$0xff] }
  0x44   :  { %497 = vmatpush.msrb.mxu1 %v2248_v38  ;;  %1762 = vmatmul.msk.f32.gmra.mxu3 %vm72_vm0, %v2171_v26 }
  0x45   :  { %518 = vmatpush.msra.mxu2 %v2289_v44  ;;  %538 = vmatpush.msra.mxu3 %v2230_v35 }
  0x46   :  { %498 = vmatpush.msrb.mxu1 %v2274_v42  ;;  %481 = vmatpush.msra.mxu0 %v2284_v43 }
  0x47   :  { %519 = vmatpush.msra.mxu2 %v2315_v48  ;;  %539 = vmatpush.msra.mxu3 %v2254_v39 }
  0x48   :  { %499 = vmatpush.msrb.mxu1 %v2297_v45  ;;  %482 = vmatpush.msra.mxu0 %v2310_v47 }
  0x49   :  { %520 = vmatpush.msra.mxu2 %v2338_v52  ;;  %540 = vmatpush.msra.mxu3 %v2302_v46 }
  0x4a   :  { %500 = vmatpush.msrb.mxu1 %v2321_v49  ;;  %483 = vmatpush.msra.mxu0 %v2332_v51 }
  0x4b   :  { %1745 = vmatmul.msk.f32.gmra.mxu1 %vm72_vm0, %v2102_v13  ;;  %521 = vmatpush.msra.mxu2 %v2374_v57  ;;  %v3801_v13 = vld [vmem:[#allocation25_spill] sm:$0xff] }
  0x4c   :  { %383 = vmatmul.f32.vlgmr.msrb.gmra.mxu2 %v2007_v21  ;;  %501 = vmatpush.msrb.mxu1 %v2359_v55 }
  0x4d   :  { %403 = vmatmul.f32.vlgmr.msrb.gmra.mxu3 %v2007_v21  ;;  %522 = vmatpush.msra.mxu2 %v2400_v61 }
  0x4e   :  { %541 = vmatpush.msra.mxu3 %v2327_v50  ;;  %502 = vmatpush.msrb.mxu1 %v2382_v58 }
  0x4f   :  { %523 = vmatpush.msra.mxu2 %v2424_v1  ;;  %484 = vmatpush.msra.mxu0 %v2351_v54 }
  0x50   :  { %542 = vmatpush.msra.mxu3 %v2387_v59  ;;  %503 = vmatpush.msrb.mxu1 %v2412_v63 }
  0x51   :  { %524 = vmatpush.msra.mxu2 %v2443_v4  ;;  %485 = vmatpush.msra.mxu0 %v2369_v56 }
  0x52   :  { %543 = vmatpush.msra.mxu3 %v2407_v62  ;;  %504 = vmatpush.msrb.mxu1 %v2468_v8 }
  0x53   :  { %1746 = vmatmul.msk.f32.gmra.mxu1 %vm72_vm0, %v2171_v26  ;;  %525 = vmatpush.msra.mxu2 %v2463_v7  ;;  %v3802_v26 = vld [vmem:[#allocation15_spill] sm:$0xff] }
  0x54   :  { %544 = vmatpush.msra.mxu3 %v2456_v6  ;;  %505 = vmatpush.msrb.mxu1 %v2487_v11 }
  0x55   :  { %486 = vmatpush.msra.mxu0 %v2394_v60  ;;  %526 = vmatpush.msra.mxu2 %v2482_v10 }
  0x56   :  { %545 = vmatpush.msra.mxu3 %v2475_v9  ;;  %506 = vmatpush.msrb.mxu1 %v2526_v25 }
  0x57   :  { %487 = vmatpush.msra.mxu0 %v2417_v0  ;;  %527 = vmatpush.msra.mxu2 %v2512_v19 }
  0x58   :  { %546 = vmatpush.msra.mxu3 %v2494_v12  ;;  %507 = vmatpush.msrb.mxu1 %v2545_v18 }
  0x59   :  { %488 = vmatpush.msra.mxu0 %v2434_v3  ;;  %528 = vmatpush.msra.mxu2 %v2533_v40 }
  0x5a   :  { %547 = vmatpush.msra.mxu3 %v2505_v16  ;;  %508 = vmatpush.msrb.mxu1 %v2558_v5 }
  0x5b   :  { %363 = vmatmul.f32.vlgmr.msra.gmra.mxu1 %v2007_v21  ;;  %489 = vmatpush.msra.mxu0 %v3802_v26  ;;  %v3804_v21 = vld [vmem:[#allocation5_spill] sm:$0xff] }
  0x5c   :  { %548 = vmatpush.msra.mxu3 %v3801_v13  ;;  %529 = vmatpush.msra.mxu2 %v2551_v15 }
  0x5d   :  { %509 = vmatpush.msrb.mxu1 %v2567_v23  ;;  %621 = vmatpush.msrb.mxu0 %v3803_v2 }
  0x5e   :  { %549 = vmatpush.msra.mxu3 %v2540_v53  ;;  %661 = vmatpush.msrb.mxu2 %v2151_v22 }
  0x5f   :  { %641 = vmatpush.msra.mxu1 %v2182_v28  ;;  %622 = vmatpush.msrb.mxu0 %v3804_v21 }
  0x60   :  { %681 = vmatpush.msrb.mxu3 %v2122_v17  ;;  %662 = vmatpush.msrb.mxu2 %v2177_v27 }
  0x61   :  { %642 = vmatpush.msra.mxu1 %v2199_v30  ;;  %623 = vmatpush.msrb.mxu0 %v3805_v14 }
  0x62   :  { %682 = vmatpush.msrb.mxu3 %v2140_v20  ;;  %663 = vmatpush.msrb.mxu2 %v2217_v33 }
  0x63   :  { %643 = vmatpush.msra.mxu1 %v2225_v34  ;;  %624 = vmatpush.msrb.mxu0 %v2189_v29 }
  0x64   :  { %683 = vmatpush.msrb.mxu3 %v2160_v24  ;;  %664 = vmatpush.msrb.mxu2 %v2242_v37 }
  0x65   :  { %644 = vmatpush.msra.mxu1 %v2248_v38  ;;  %625 = vmatpush.msrb.mxu0 %v2212_v32 }
  0x66   :  { %684 = vmatpush.msrb.mxu3 %v2204_v31  ;;  %665 = vmatpush.msrb.mxu2 %v2289_v44 }
  0x67   :  { %645 = vmatpush.msra.mxu1 %v2274_v42  ;;  %626 = vmatpush.msrb.mxu0 %v2236_v36 }
  0x68   :  { %685 = vmatpush.msrb.mxu3 %v2230_v35  ;;  %666 = vmatpush.msrb.mxu2 %v2315_v48 }
  0x69   :  { %646 = vmatpush.msra.mxu1 %v2297_v45  ;;  %627 = vmatpush.msrb.mxu0 %v2267_v41 }
  0x6a   :  { %686 = vmatpush.msrb.mxu3 %v2254_v39  ;;  %667 = vmatpush.msrb.mxu2 %v2338_v52 }
  0x6b   :  { %647 = vmatpush.msra.mxu1 %v2321_v49  ;;  %628 = vmatpush.msrb.mxu0 %v2284_v43 }
  0x6c   :  { %687 = vmatpush.msrb.mxu3 %v2302_v46  ;;  %668 = vmatpush.msrb.mxu2 %v2374_v57 }
  0x6d   :  { %648 = vmatpush.msra.mxu1 %v2359_v55  ;;  %629 = vmatpush.msrb.mxu0 %v2310_v47 }
  0x6e   :  { %688 = vmatpush.msrb.mxu3 %v2327_v50  ;;  %669 = vmatpush.msrb.mxu2 %v2400_v61 }
  0x6f   :  { %649 = vmatpush.msra.mxu1 %v2382_v58  ;;  %630 = vmatpush.msrb.mxu0 %v2332_v51 }
  0x70   :  { %689 = vmatpush.msrb.mxu3 %v2387_v59  ;;  %670 = vmatpush.msrb.mxu2 %v2424_v1 }
  0x71   :  { %650 = vmatpush.msra.mxu1 %v2412_v63  ;;  %631 = vmatpush.msrb.mxu0 %v2351_v54 }
  0x72   :  { %690 = vmatpush.msrb.mxu3 %v2407_v62  ;;  %671 = vmatpush.msrb.mxu2 %v2443_v4 }
  0x73   :  { %651 = vmatpush.msra.mxu1 %v2468_v8  ;;  %632 = vmatpush.msrb.mxu0 %v2369_v56 }
  0x74   :  { %691 = vmatpush.msrb.mxu3 %v2456_v6  ;;  %672 = vmatpush.msrb.mxu2 %v2463_v7 }
  0x75   :  { %652 = vmatpush.msra.mxu1 %v2487_v11  ;;  %633 = vmatpush.msrb.mxu0 %v2394_v60 }
  0x76   :  { %692 = vmatpush.msrb.mxu3 %v2475_v9  ;;  %673 = vmatpush.msrb.mxu2 %v2482_v10 }
  0x77   :  { %653 = vmatpush.msra.mxu1 %v2526_v25  ;;  %634 = vmatpush.msrb.mxu0 %v2417_v0 }
  0x78   :  { %693 = vmatpush.msrb.mxu3 %v2494_v12  ;;  %674 = vmatpush.msrb.mxu2 %v2512_v19 }
  0x79   :  { %654 = vmatpush.msra.mxu1 %v2545_v18  ;;  %635 = vmatpush.msrb.mxu0 %v2434_v3 }
  0x7a   :  { %694 = vmatpush.msrb.mxu3 %v2505_v16  ;;  %675 = vmatpush.msrb.mxu2 %v2533_v40  ;;  %v62_v16 = vld [vmem:[%s3665_s3] sm:$0xf] }
  0x7b   :  { %655 = vmatpush.msra.mxu1 %v2558_v5  ;;  %636 = vmatpush.msrb.mxu0 %v3802_v26  ;;  %v64_v19 = vperm.slane %v62_v16, 0 }
  0x7c   :  { %695 = vmatpush.msrb.mxu3 %v3801_v13  ;;  %676 = vmatpush.msrb.mxu2 %v2551_v15  ;;  %v2725_v15 = vperm.slane %v62_v16, 2 }
  0x7d   :  { %656 = vmatpush.msra.mxu1 %v2567_v23 }
  0x7e   :  { %696 = vmatpush.msrb.mxu3 %v2540_v53  ;;  %v67_v53 = vperm.slane %v62_v16, 3 }
  0x87   :  { %v114_v3 = vpop.f32.mrf.mxu0  ;;  %v132_v18 = vpop.f32.mrf.mxu1 }
  0x88   :  { %v2717_v5 = vadd.f32 %v132_v18, %v64_v19 }
  0x8a   :  { %3806 = vst [vmem:[#allocation4_spill] sm:$0xff] %v2717_v5 }
  0x8e   :  { %v2719_v40 = vpop.f32.mrf.mxu2 }
  0x8f   :  { %v237_v13 = vpop.f32.mrf.mxu3  ;;  %v117_v0 = vpop.f32.mrf.mxu0 }
  0x90   :  { %v2721_v26 = vadd.f32 %v117_v0, %v64_v19  ;;  %v135_v23 = vpop.f32.mrf.mxu1  ;;  %v65_v0 = vperm.slane %v62_v16, 1 }
  0x91   :  { %v2723_v12 = vadd.f32 %v135_v23, %v64_v19 }
  0x92   :  { %3807 = vst [vmem:[#allocation5_spill] sm:$0xff] %v2721_v26 }
  0x93   :  { %3808 = vst [vmem:[#allocation6_spill] sm:$0xff] %v2723_v12 }
  0x96   :  { %v199_v10 = vpop.f32.mrf.mxu2 }
  0x97   :  { %v2728_v25 = vadd.f32 %v199_v10, %v2725_v15  ;;  %v240_v60 = vpop.f32.mrf.mxu3  ;;  %v120_v9 = vpop.f32.mrf.mxu0 }
  0x98   :  { %v2730_v18 = vadd.f32 %v240_v60, %v67_v53  ;;  %v2732_v5 = vadd.f32 %v120_v9, %v64_v19  ;;  %v155_v7 = vpop.f32.mrf.mxu1 }
  0x99   :  { %3809 = vst [vmem:[#allocation33_spill] sm:$0xff] %v2728_v25 }
  0x9a   :  { %3810 = vst [vmem:[#allocation34_spill] sm:$0xff] %v2730_v18 }
  0x9b   :  { %3811 = vst [vmem:[#allocation35_spill] sm:$0xff] %v2732_v5 }
  0x9e   :  { %v202_v11 = vpop.f32.mrf.mxu2 }
  0x9f   :  { %v2735_v26 = vadd.f32 %v202_v11, %v2725_v15  ;;  %v243_v23 = vpop.f32.mrf.mxu3  ;;  %v123_v12 = vpop.f32.mrf.mxu0 }
  0xa0   :  { %v2737_v56 = vadd.f32 %v243_v23, %v67_v53  ;;  %v2739_v6 = vadd.f32 %v123_v12, %v64_v19  ;;  %v158_v10 = vpop.f32.mrf.mxu1 }
  0xa1   :  { %3812 = vst [vmem:[#allocation36_spill] sm:$0xff] %v2735_v26  ;;  %v2741_v25 = vadd.f32 %v158_v10, %v65_v0 }
  0xa2   :  { %3813 = vst [vmem:[#allocation37_spill] sm:$0xff] %v2737_v56 }
  0xa3   :  { %3814 = vst [vmem:[#allocation38_spill] sm:$0xff] %v2739_v6 }
  0xa4   :  { %3815 = vst [vmem:[#allocation39_spill] sm:$0xff] %v2741_v25 }
  0xa6   :  { %v205_v4 = vpop.f32.mrf.mxu2 }
  0xa7   :  { %v2744_v60 = vadd.f32 %v205_v4, %v2725_v15  ;;  %v246_v9 = vpop.f32.mrf.mxu3  ;;  %v126_v5 = vpop.f32.mrf.mxu0 }
  0xa8   :  { %v2746_v18 = vadd.f32 %v246_v9, %v67_v53  ;;  %v2748_v16 = vadd.f32 %v126_v5, %v64_v19  ;;  %v161_v11 = vpop.f32.mrf.mxu1 }
  0xa9   :  { %3816 = vst [vmem:[#allocation40_spill] sm:$0xff] %v2744_v60  ;;  %v2750_v26 = vadd.f32 %v161_v11, %v65_v0 }
  0xaa   :  { %3817 = vst [vmem:[#allocation41_spill] sm:$0xff] %v2746_v18 }
  0xab   :  { %3818 = vst [vmem:[#allocation42_spill] sm:$0xff] %v2748_v16 }
  0xac   :  { %3819 = vst [vmem:[#allocation43_spill] sm:$0xff] %v2750_v26 }
  0xae   :  { %v208_v23 = vpop.f32.mrf.mxu2 }
  0xaf   :  { %v2753_v12 = vadd.f32 %v208_v23, %v2725_v15  ;;  %v249_v6 = vpop.f32.mrf.mxu3  ;;  %v129_v10 = vpop.f32.mrf.mxu0 }
  0xb0   :  { %v2755_v56 = vadd.f32 %v249_v6, %v67_v53  ;;  %v2757_v25 = vadd.f32 %v129_v10, %v64_v19  ;;  %v164_v4 = vpop.f32.mrf.mxu1 }
  0xb1   :  { %3820 = vst [vmem:[#allocation44_spill] sm:$0xff] %v2753_v12  ;;  %v2759_v60 = vadd.f32 %v164_v4, %v65_v0 }
  0xb2   :  { %3821 = vst [vmem:[#allocation45_spill] sm:$0xff] %v2755_v56  ;;  %v115_v56 = vadd.f32 %v114_v3, %v64_v19 }
  0xb3   :  { %3822 = vst [vmem:[#allocation46_spill] sm:$0xff] %v2757_v25 }
  0xb4   :  { %3823 = vst [vmem:[#allocation47_spill] sm:$0xff] %v2759_v60 }
  0xb6   :  { %v211_v9 = vpop.f32.mrf.mxu2 }
  0xb7   :  { %v2762_v5 = vadd.f32 %v211_v9, %v2725_v15  ;;  %v252_v16 = vpop.f32.mrf.mxu3 }
  0xb8   :  { %v2764_v11 = vadd.f32 %v252_v16, %v67_v53  ;;  %v167_v18 = vpop.f32.mrf.mxu1  ;;  %v344_v10 = vpop.f32.mrf.mxu0 }
  0xb9   :  { %3824 = vst [vmem:[#allocation48_spill] sm:$0xff] %v2762_v5  ;;  %v2766_v26 = vadd.f32 %v167_v18, %v65_v0  ;;  %v407_v9 = vadd.f32 %v344_v10, %v115_v56 }
  0xba   :  { %3825 = vst [vmem:[#allocation49_spill] sm:$0xff] %v2764_v11 }
  0xbb   :  { %3826 = vst [vmem:[#allocation50_spill] sm:$0xff] %v2766_v26  ;;  %v1763_v8 = vmul.f32 -1.442695, %v407_v9 }
  0xbd   :  { %1799 = vpow2.f32 %v1763_v8 }
  0xbe   :  { %v214_v23 = vpop.f32.mrf.mxu2 }
  0xbf   :  { %v2769_v12 = vadd.f32 %v214_v23, %v2725_v15  ;;  %v255_v6 = vpop.f32.mrf.mxu3 }
  0xc0   :  { %v2771_v25 = vadd.f32 %v255_v6, %v67_v53  ;;  %v170_v4 = vpop.f32.mrf.mxu1 }
  0xc1   :  { %3827 = vst [vmem:[#allocation51_spill] sm:$0xff] %v2769_v12  ;;  %v2773_v60 = vadd.f32 %v170_v4, %v65_v0  ;;  %v238_v12 = vadd.f32 %v237_v13, %v67_v53  ;;  %v156_v4 = vadd.f32 %v155_v7, %v65_v0 }
  0xc2   :  { %3828 = vst [vmem:[#allocation52_spill] sm:$0xff] %v2771_v25 }
  0xc3   :  { %3829 = vst [vmem:[#allocation53_spill] sm:$0xff] %v2773_v60  ;;  %v1800_v54 = vpop.eup %1799 }
  0xc4   :  { %v414_v56 = vadd.f32 1.0, %v1800_v54  ;;  %v197_v54 = vadd.f32 %v2719_v40, %v2725_v15 }
  0xc6   :  { %v217_v5 = vpop.f32.mrf.mxu2  ;;  %1801 = vrcp.f32 %v414_v56  ;;  %vm420_vm2 = vweird.f32 %v414_v56 }
  0xc7   :  { %v2776_v16 = vadd.f32 %v217_v5, %v2725_v15  ;;  %v258_v18 = vpop.f32.mrf.mxu3 }
  0xc8   :  { %v2778_v11 = vadd.f32 %v258_v18, %v67_v53  ;;  %v173_v26 = vpop.f32.mrf.mxu1 }
  0xc9   :  { %3830 = vst [vmem:[#allocation54_spill] sm:$0xff] %v2776_v16  ;;  %v2780_v23 = vadd.f32 %v173_v26, %v65_v0 }
  0xca   :  { %3831 = vst [vmem:[#allocation55_spill] sm:$0xff] %v2778_v11 }
  0xcb   :  { %3832 = vst [vmem:[#allocation56_spill] sm:$0xff] %v2780_v23 }
  0xcc   :  { %v1802_v16 = vpop.eup %1801 }
  0xcd   :  { %v416_v11 = vmul.f32 %v1802_v16, %v414_v56  ;;  %vm421_vm1 = vweird.f32 %v1802_v16 }
  0xce   :  { %vm422_vm3 = vmor %vm420_vm2, %vm421_vm1 }
  0xcf   :  { %v417_v23 = vsub.f32 1.0, %v416_v11 }
  0xd0   :  { %v404_v6 = vpop.f32.mrf.mxu3  ;;  %v176_v25 = vpop.f32.mrf.mxu1 }
  0xd1   :  { %v410_v3 = vadd.f32 %v404_v6, %v238_v12  ;;  %v2782_v19 = vadd.f32 %v176_v25, %v65_v0  ;;  %v384_v25 = vpop.f32.mrf.mxu2  ;;  %v418_v7 = vmul.f32 %v1802_v16, %v417_v23 }
  0xd2   :  { %v409_v0 = vadd.f32 %v384_v25, %v197_v54 }
  0xd3   :  { %3833 = vst [vmem:[#allocation57_spill] sm:$0xff] %v2782_v19  ;;  %v1765_v10 = vmul.f32 -1.442695, %v410_v3  ;;  %v419_v3 = vadd.f32 %v1802_v16, %v418_v7 }
  0xd5   :  { %1803 = vpow2.f32 %v1765_v10 }
  0xd8   :  { %v364_v5 = vpop.f32.mrf.mxu1 }
  0xd9   :  { %v408_v9 = vadd.f32 %v364_v5, %v156_v4  ;;  %v426_v4 = vand.u32 2147483648, %v414_v56 }
  0xdb   :  { %v1764_v18 = vmul.f32 -1.442695, %v408_v9  ;;  %v1804_v26 = vpop.eup %1803  ;;  %v424_v9 = vand.u32 2147483647, %v414_v56  ;;  %v427_v15 = vor.u32 1.1754944e-38, %v426_v4 }
  0xdc   :  { %v453_v8 = vadd.f32 1.0, %v1804_v26  ;;  %v423_v26 = vsel %vm422_vm3, %v1802_v16, %v419_v3 }
  0xdd   :  { %1805 = vpow2.f32 %v1764_v18  ;;  %vm425_vm5 = vcmp.eq.f32.partialorder %v424_v9, 8.507059e+37 }
  0xde   :  { %1807 = vrcp.f32 %v453_v8  ;;  %v428_v54 = vsel %vm425_vm5, %v427_v15, %v423_v26  ;;  %v465_v3 = vand.u32 2147483648, %v453_v8  ;;  %vm459_vm10 = vweird.f32 %v453_v8  ;;  %v3863_v15 = vld [vmem:[#allocation33_spill] sm:$0xff] }
  0xdf   :  { %v463_v4 = vand.u32 2147483647, %v453_v8 }
  0xe1   :  { %vm464_vm12 = vcmp.eq.f32.partialorder %v463_v4, 8.507059e+37 }
  0xe3   :  { %v1806_v53 = vpop.eup %1805 }
  0xe4   :  { %v433_v13 = vadd.f32 1.0, %v1806_v53  ;;  %v1808_v12 = vpop.eup %1807 }
  0xe5   :  { %v455_v5 = vmul.f32 %v1808_v12, %v453_v8  ;;  %vm460_vm9 = vweird.f32 %v1808_v12 }
  0xe6   :  { %1809 = vrcp.f32 %v433_v13  ;;  %v445_v11 = vand.u32 2147483648, %v433_v13  ;;  %v443_v19 = vand.u32 2147483647, %v433_v13  ;;  %vm439_vm6 = vweird.f32 %v433_v13  ;;  %vm461_vm11 = vmor %vm459_vm10, %vm460_vm9 }
  0xe7   :  { %1811 = vtanh.f32 %v409_v0  ;;  %v456_v40 = vsub.f32 1.0, %v455_v5  ;;  %v466_v5 = vor.u32 1.1754944e-38, %v465_v3 }
  0xe8   :  { %v446_v7 = vor.u32 1.1754944e-38, %v445_v11  ;;  %vm444_vm8 = vcmp.eq.f32.partialorder %v443_v19, 8.507059e+37 }
  0xe9   :  { %v457_v56 = vmul.f32 %v1808_v12, %v456_v40 }
  0xeb   :  { %v458_v16 = vadd.f32 %v1808_v12, %v457_v56 }
  0xec   :  { %v1810_v6 = vpop.eup %1809 }
  0xed   :  { %v435_v10 = vmul.f32 %v1810_v6, %v433_v13  ;;  %vm440_vm4 = vweird.f32 %v1810_v6  ;;  %v1812_v25 = vpop.eup %1811  ;;  %v462_v13 = vsel %vm461_vm11, %v1808_v12, %v458_v16 }
  0xee   :  { %vm441_vm7 = vmor %vm439_vm6, %vm440_vm4 }
  0xef   :  { %v436_v18 = vsub.f32 1.0, %v435_v10  ;;  %v470_v10 = vmul.f32 %v1812_v25, %v428_v54 }
  0xf1   :  { %v437_v53 = vmul.f32 %v1810_v6, %v436_v18 }
  0xf3   :  { %v438_v23 = vadd.f32 %v1810_v6, %v437_v53 }
  0xf5   :  { %v442_v0 = vsel %vm441_vm7, %v1810_v6, %v438_v23  ;;  %v467_v6 = vsel %vm464_vm12, %v466_v5, %v462_v13 }
  0xf6   :  { %v447_v60 = vsel %vm444_vm8, %v446_v7, %v442_v0 }
  0xf7   :  { %v469_v62 = vmul.f32 0.0, %v447_v60 }
  0xf9   :  { %v2786_v1 = vadd.f32 %v470_v10, %v469_v62 }
  0xfb   :  { %1813 = vtanh.f32 %v2786_v1 }
 0x101   :  { %v1814_v9 = vpop.eup %1813 }
 0x102   :  { %v473_v19 = vmul.f32 %v1814_v9, %v467_v6 }
 0x104   :  { %490 = vmatmul.f32.vlgmr.msra.gmra.mxu0 %v473_v19  ;;  %510 = vmatmul.f32.vlgmr.msrb.gmra.mxu1 %v473_v19 }
 0x105   :  { %530 = vmatmul.f32.vlgmr.msra.gmra.mxu2 %v473_v19  ;;  %550 = vmatmul.f32.vlgmr.msra.gmra.mxu3 %v473_v19 }
 0x106   :  { %768 = vmatpush.msra.mxu0 %v3803_v2  ;;  %788 = vmatpush.msrb.mxu1 %v2182_v28  ;;  %v3839_v28 = vld [vmem:[#allocation16_spill] sm:$0xff] }
 0x107   :  { %808 = vmatpush.msra.mxu2 %v2151_v22  ;;  %828 = vmatpush.msra.mxu3 %v2122_v17  ;;  %v3834_v17 = vld [vmem:[#allocation12_spill] sm:$0xff]  ;;  %v3836_v22 = vld [vmem:[#allocation7_spill] sm:$0xff] }
 0x108   :  { %769 = vmatpush.msra.mxu0 %v3804_v21  ;;  %789 = vmatpush.msrb.mxu1 %v2199_v30  ;;  %v3841_v30 = vld [vmem:[#allocation21_spill] sm:$0xff] }
 0x109   :  { %809 = vmatpush.msra.mxu2 %v2177_v27  ;;  %829 = vmatpush.msra.mxu3 %v2140_v20  ;;  %v3835_v20 = vld [vmem:[#allocation10_spill] sm:$0xff] }
 0x10a   :  { %770 = vmatpush.msra.mxu0 %v3805_v14  ;;  %790 = vmatpush.msrb.mxu1 %v2225_v34  ;;  %v3838_v27 = vld [vmem:[#allocation14_spill] sm:$0xff] }
 0x10b   :  { %810 = vmatpush.msra.mxu2 %v2217_v33  ;;  %830 = vmatpush.msra.mxu3 %v2160_v24  ;;  %v3837_v24 = vld [vmem:[#allocation18_spill] sm:$0xff]  ;;  %v3844_v33 = vld [vmem:[#allocation9_spill] sm:$0xff] }
 0x10c   :  { %771 = vmatpush.msra.mxu0 %v2189_v29  ;;  %791 = vmatpush.msrb.mxu1 %v2248_v38  ;;  %v3840_v29 = vld [vmem:[#allocation8_spill] sm:$0xff]  ;;  %v3845_v34 = vld [vmem:[#allocation26_spill] sm:$0xff]  ;;  %v3849_v38 = vld [vmem:[#allocation29_spill] sm:$0xff] }
 0x10d   :  { %811 = vmatpush.msra.mxu2 %v2242_v37  ;;  %831 = vmatpush.msra.mxu3 %v2204_v31  ;;  %v3842_v31 = vld [vmem:[#allocation17_spill] sm:$0xff]  ;;  %v3848_v37 = vld [vmem:[#allocation11_spill] sm:$0xff] }
 0x10e   :  { %772 = vmatpush.msra.mxu0 %v2212_v32  ;;  %792 = vmatpush.msrb.mxu1 %v2274_v42  ;;  %v3843_v32 = vld [vmem:[#allocation19_spill] sm:$0xff]  ;;  %v3852_v42 = vld [vmem:[#allocation13_spill] sm:$0xff] }
 0x10f   :  { %812 = vmatpush.msra.mxu2 %v2289_v44  ;;  %832 = vmatpush.msra.mxu3 %v2230_v35  ;;  %v3846_v35 = vld [vmem:[#allocation20_spill] sm:$0xff]  ;;  %v3854_v44 = vld [vmem:[#allocation27_spill] sm:$0xff] }
 0x110   :  { %773 = vmatpush.msra.mxu0 %v2236_v36  ;;  %793 = vmatpush.msrb.mxu1 %v2297_v45  ;;  %v3847_v36 = vld [vmem:[#allocation22_spill] sm:$0xff]  ;;  %v3855_v45 = vld [vmem:[#allocation25_spill] sm:$0xff] }
 0x111   :  { %813 = vmatpush.msra.mxu2 %v2315_v48  ;;  %833 = vmatpush.msra.mxu3 %v2254_v39  ;;  %v3850_v39 = vld [vmem:[#allocation24_spill] sm:$0xff]  ;;  %v3858_v48 = vld [vmem:[#allocation30_spill] sm:$0xff] }
 0x112   :  { %774 = vmatpush.msra.mxu0 %v2267_v41  ;;  %794 = vmatpush.msrb.mxu1 %v2321_v49  ;;  %v3851_v41 = vld [vmem:[#allocation23_spill] sm:$0xff]  ;;  %v3859_v49 = vld [vmem:[#allocation28_spill] sm:$0xff] }
 0x113   :  { %814 = vmatpush.msra.mxu2 %v2338_v52  ;;  %834 = vmatpush.msra.mxu3 %v2302_v46  ;;  %v3856_v46 = vld [vmem:[#allocation15_spill] sm:$0xff]  ;;  %v3860_v52 = vld [vmem:[#allocation5_spill] sm:$0xff] }
 0x114   :  { %775 = vmatpush.msra.mxu0 %v2284_v43  ;;  %795 = vmatpush.msrb.mxu1 %v2359_v55  ;;  %v3853_v43 = vld [vmem:[#allocation31_spill] sm:$0xff] }
 0x115   :  { %815 = vmatpush.msra.mxu2 %v2374_v57  ;;  %835 = vmatpush.msra.mxu3 %v2327_v50  ;;  %v3861_v57 = vld [vmem:[#allocation39_spill] sm:$0xff] }
 0x116   :  { %776 = vmatpush.msra.mxu0 %v2310_v47  ;;  %796 = vmatpush.msrb.mxu1 %v2382_v58  ;;  %v3857_v47 = vld [vmem:[#allocation32_spill] sm:$0xff] }
 0x117   :  { %816 = vmatpush.msra.mxu2 %v2400_v61  ;;  %836 = vmatpush.msra.mxu3 %v2387_v59 }
 0x118   :  { %777 = vmatpush.msra.mxu0 %v2332_v51  ;;  %797 = vmatpush.msrb.mxu1 %v2412_v63  ;;  %v3862_v63 = vld [vmem:[#allocation34_spill] sm:$0xff] }
 0x119   :  { %817 = vmatpush.msra.mxu2 %v3834_v17  ;;  %837 = vmatpush.msra.mxu3 %v3835_v20 }
 0x11a   :  { %778 = vmatpush.msra.mxu0 %v3836_v22  ;;  %798 = vmatpush.msrb.mxu1 %v3837_v24 }
 0x11b   :  { %818 = vmatpush.msra.mxu2 %v3838_v27  ;;  %838 = vmatpush.msra.mxu3 %v3839_v28 }
 0x11c   :  { %779 = vmatpush.msra.mxu0 %v3840_v29  ;;  %799 = vmatpush.msrb.mxu1 %v3841_v30 }
 0x11d   :  { %819 = vmatpush.msra.mxu2 %v3842_v31  ;;  %839 = vmatpush.msra.mxu3 %v3843_v32 }
 0x11e   :  { %780 = vmatpush.msra.mxu0 %v3844_v33  ;;  %800 = vmatpush.msrb.mxu1 %v3845_v34 }
 0x11f   :  { %820 = vmatpush.msra.mxu2 %v3846_v35  ;;  %840 = vmatpush.msra.mxu3 %v3847_v36 }
 0x120   :  { %781 = vmatpush.msra.mxu0 %v3848_v37  ;;  %801 = vmatpush.msrb.mxu1 %v3849_v38 }
 0x121   :  { %821 = vmatpush.msra.mxu2 %v3850_v39  ;;  %841 = vmatpush.msra.mxu3 %v3851_v41 }
 0x122   :  { %782 = vmatpush.msra.mxu0 %v3852_v42  ;;  %802 = vmatpush.msrb.mxu1 %v3853_v43 }
 0x123   :  { %822 = vmatpush.msra.mxu2 %v3854_v44  ;;  %842 = vmatpush.msra.mxu3 %v3855_v45 }
 0x124   :  { %783 = vmatpush.msra.mxu0 %v3856_v46  ;;  %803 = vmatpush.msrb.mxu1 %v3857_v47 }
 0x125   :  { %823 = vmatpush.msra.mxu2 %v3858_v48  ;;  %843 = vmatpush.msra.mxu3 %v3859_v49 }
 0x181   :  { %v491_v50 = vpop.f32.mrf.mxu0  ;;  %v511_v51 = vpop.f32.mrf.mxu1 }
 0x182   :  { %v554_v55 = vadd.f32 %v491_v50, %v3860_v52  ;;  %v555_v58 = vadd.f32 %v511_v51, %v3861_v57 }
 0x184   :  { %v1766_v59 = vmul.f32 -1.442695, %v554_v55  ;;  %v1767_v61 = vmul.f32 -1.442695, %v555_v58 }
 0x186   :  { %1815 = vpow2.f32 %v1766_v59 }
 0x187   :  { %1817 = vpow2.f32 %v1767_v61  ;;  %v2870_v61 = vld [vmem:[%s3664_s2 + $0x1e8] sm:$0xff] }
 0x188   :  { %v551_v62 = vpop.f32.mrf.mxu3  ;;  %v531_v18 = vpop.f32.mrf.mxu2 }
 0x189   :  { %v557_v2 = vadd.f32 %v551_v62, %v3862_v63  ;;  %v556_v40 = vadd.f32 %v531_v18, %v3863_v15  ;;  %v2876_v62 = vld [vmem:[%s3664_s2 + $0x1f0] sm:$0xff]  ;;  %v2882_v63 = vld [vmem:[%s3664_s2 + $0x1f8] sm:$0xff] }
 0x18a   :  { %v2924_v18 = vld [vmem:[%s3664_s2 + $0x1b0] sm:$0xff] }
 0x18b   :  { %v1768_v21 = vmul.f32 -1.442695, %v557_v2  ;;  %v2888_v2 = vld [vmem:[%s3664_s2 + $0x1c0] sm:$0xff]  ;;  %v2948_v15 = vld [vmem:[%s3664_s2 + $0x190] sm:$0xff] }
 0x18c   :  { %v1816_v14 = vpop.eup %1815 }
 0x18d   :  { %v1818_v60 = vpop.eup %1817  ;;  %v561_v8 = vadd.f32 1.0, %v1816_v14  ;;  %1819 = vpow2.f32 %v1768_v21  ;;  %v2894_v21 = vld [vmem:[%s3664_s2 + $0x1c8] sm:$0xff]  ;;  %v2900_v14 = vld [vmem:[%s3664_s2 + $0x1d0] sm:$0xff] }
 0x18e   :  { %v580_v12 = vadd.f32 1.0, %v1818_v60  ;;  %v2906_v60 = vld [vmem:[%s3664_s2 + $0x1d8] sm:$0xff] }
 0x18f   :  { %1821 = vrcp.f32 %v561_v8  ;;  %v573_v56 = vand.u32 2147483648, %v561_v8  ;;  %v571_v3 = vand.u32 2147483647, %v561_v8  ;;  %vm567_vm15 = vweird.f32 %v561_v8 }
 0x190   :  { %1823 = vrcp.f32 %v580_v12  ;;  %v592_v10 = vand.u32 2147483648, %v580_v12  ;;  %v590_v13 = vand.u32 2147483647, %v580_v12  ;;  %vm586_vm1 = vweird.f32 %v580_v12 }
 0x191   :  { %v574_v6 = vor.u32 1.1754944e-38, %v573_v56  ;;  %vm572_vm4 = vcmp.eq.f32.partialorder %v571_v3, 8.507059e+37  ;;  %v2990_v56 = vld [vmem:[%s3664_s2 + $0x148] sm:$0xff]  ;;  %v3008_v3 = vld [vmem:[%s3664_s2 + $0x120] sm:$0xff] }
 0x192   :  { %v593_v20 = vor.u32 1.1754944e-38, %v592_v10  ;;  %vm591_vm5 = vcmp.eq.f32.partialorder %v590_v13, 8.507059e+37  ;;  %v2996_v10 = vld [vmem:[%s3664_s2 + $0x150] sm:$0xff] }
 0x193   :  { %v1820_v11 = vpop.eup %1819  ;;  %v3020_v13 = vld [vmem:[%s3664_s2 + $0x130] sm:$0xff] }
 0x194   :  { %v600_v26 = vadd.f32 1.0, %v1820_v11  ;;  %v2930_v11 = vld [vmem:[%s3664_s2 + $0x1b8] sm:$0xff] }
 0x195   :  { %v1822_v53 = vpop.eup %1821 }
 0x196   :  { %v1824_v23 = vpop.eup %1823  ;;  %v563_v25 = vmul.f32 %v1822_v53, %v561_v8  ;;  %1825 = vrcp.f32 %v600_v26  ;;  %vm568_vm13 = vweird.f32 %v1822_v53  ;;  %v612_v50 = vand.u32 2147483648, %v600_v26  ;;  %v2912_v8 = vld [vmem:[%s3664_s2 + $0x1a0] sm:$0xff] }
 0x197   :  { %v582_v54 = vmul.f32 %v1824_v23, %v580_v12  ;;  %1827 = vtanh.f32 %v556_v40  ;;  %vm587_vm14 = vweird.f32 %v1824_v23  ;;  %vm569_vm2 = vmor %vm567_vm15, %vm568_vm13  ;;  %vm606_vm7 = vweird.f32 %v600_v26  ;;  %v2918_v12 = vld [vmem:[%s3664_s2 + $0x1a8] sm:$0xff]  ;;  %v2954_v40 = vld [vmem:[%s3664_s2 + $0x198] sm:$0xff] }
 0x198   :  { %v564_v7 = vsub.f32 1.0, %v563_v25  ;;  %vm588_vm3 = vmor %vm586_vm1, %vm587_vm14  ;;  %v610_v51 = vand.u32 2147483647, %v600_v26  ;;  %v613_v55 = vor.u32 1.1754944e-38, %v612_v50  ;;  %v2966_v25 = vld [vmem:[%s3664_s2 + $0x168] sm:$0xff]  ;;  %v3123_v50 = vld [vmem:[%s3664_s2 + $0x80] sm:$0xff] }
 0x199   :  { %v583_v0 = vsub.f32 1.0, %v582_v54  ;;  %v2972_v54 = vld [vmem:[%s3664_s2 + $0x170] sm:$0xff]  ;;  %3869 = vst [vmem:[#allocation16_spill] sm:$0xff] %v3123_v50 }
 0x19a   :  { %v565_v16 = vmul.f32 %v1822_v53, %v564_v7  ;;  %vm611_vm9 = vcmp.eq.f32.partialorder %v610_v51, 8.507059e+37  ;;  %v2978_v7 = vld [vmem:[%s3664_s2 + $0x178] sm:$0xff] }
 0x19b   :  { %v584_v4 = vmul.f32 %v1824_v23, %v583_v0  ;;  %v2984_v0 = vld [vmem:[%s3664_s2 + $0x140] sm:$0xff]  ;;  %v3136_v51 = vld [vmem:[%s3664_s2 + $0x98] sm:$0xff] }
 0x19c   :  { %v1826_v5 = vpop.eup %1825  ;;  %v566_v9 = vadd.f32 %v1822_v53, %v565_v16  ;;  %v3002_v16 = vld [vmem:[%s3664_s2 + $0x158] sm:$0xff]  ;;  %3871 = vst [vmem:[#allocation21_spill] sm:$0xff] %v3136_v51 }
 0x19d   :  { %v585_v19 = vadd.f32 %v1824_v23, %v584_v4  ;;  %v602_v17 = vmul.f32 %v1826_v5, %v600_v26  ;;  %v1828_v27 = vpop.eup %1827  ;;  %vm607_vm6 = vweird.f32 %v1826_v5  ;;  %v2936_v26 = vld [vmem:[%s3664_s2 + $0x180] sm:$0xff]  ;;  %v3014_v4 = vld [vmem:[%s3664_s2 + $0x128] sm:$0xff] }
 0x19e   :  { %v570_v22 = vsel %vm569_vm2, %v1822_v53, %v566_v9  ;;  %vm608_vm8 = vmor %vm606_vm7, %vm607_vm6  ;;  %v2942_v53 = vld [vmem:[%s3664_s2 + $0x188] sm:$0xff]  ;;  %v3032_v9 = vld [vmem:[%s3664_s2 + $0x100] sm:$0xff] }
 0x19f   :  { %v575_v28 = vsel %vm572_vm4, %v574_v6, %v570_v22  ;;  %v589_v29 = vsel %vm588_vm3, %v1824_v23, %v585_v19  ;;  %v603_v31 = vsub.f32 1.0, %v602_v17  ;;  %v2960_v23 = vld [vmem:[%s3664_s2 + $0x160] sm:$0xff]  ;;  %v3038_v6 = vld [vmem:[%s3664_s2 + $0x108] sm:$0xff]  ;;  %v3044_v19 = vld [vmem:[%s3664_s2 + $0x110] sm:$0xff] }
 0x1a0   :  { %v594_v32 = vsel %vm591_vm5, %v593_v20, %v589_v29  ;;  %v617_v33 = vmul.f32 %v1828_v27, %v575_v28  ;;  %v3050_v17 = vld [vmem:[%s3664_s2 + $0x118] sm:$0xff]  ;;  %v3056_v20 = vld [vmem:[%s3664_s2 + $0xe0] sm:$0xff]  ;;  %v3062_v22 = vld [vmem:[%s3664_s2 + $0xe8] sm:$0xff] }
 0x1a1   :  { %v616_v35 = vmul.f32 %v594_v32, %v2786_v1  ;;  %v604_v37 = vmul.f32 %v1826_v5, %v603_v31  ;;  %v2864_v1 = vld [vmem:[%s3664_s2 + $0x1e0] sm:$0xff]  ;;  %v3068_v27 = vld [vmem:[%s3664_s2 + $0xf0] sm:$0xff]  ;;  %v3074_v28 = vld [vmem:[%s3664_s2 + $0xf8] sm:$0xff] }
 0x1a2   :  { %v3080_v29 = vld [vmem:[%s3664_s2 + $0xc0] sm:$0xff]  ;;  %v3086_v31 = vld [vmem:[%s3664_s2 + $0xc8] sm:$0xff]  ;;  %v3092_v32 = vld [vmem:[%s3664_s2 + $0xd0] sm:$0xff] }
 0x1a3   :  { %v2858_v42 = vadd.f32 %v617_v33, %v616_v35  ;;  %v605_v46 = vadd.f32 %v1826_v5, %v604_v37  ;;  %3864 = vst [vmem:[#allocation12_spill] sm:$0xff] %v3092_v32  ;;  %v3098_v33 = vld [vmem:[%s3664_s2 + $0xd8] sm:$0xff]  ;;  %v3104_v35 = vld [vmem:[%s3664_s2 + $0xa0] sm:$0xff]  ;;  %v3111_v37 = vld [vmem:[%s3664_s2 + $0xb0] sm:$0xff] }
 0x1a4   :  { %3865 = vst [vmem:[#allocation10_spill] sm:$0xff] %v3098_v33 }
 0x1a5   :  { %1829 = vtanh.f32 %v2858_v42  ;;  %v609_v52 = vsel %vm608_vm8, %v1826_v5, %v605_v46  ;;  %v3026_v5 = vld [vmem:[%s3664_s2 + $0x138] sm:$0xff]  ;;  %3866 = vst [vmem:[#allocation7_spill] sm:$0xff] %v3104_v35 }
 0x1a6   :  { %v614_v58 = vsel %vm611_vm9, %v613_v55, %v609_v52  ;;  %3867 = vst [vmem:[#allocation18_spill] sm:$0xff] %v3111_v37  ;;  %v3117_v46 = vld [vmem:[%s3664_s2 + $0xb8] sm:$0xff]  ;;  %v3142_v52 = vld [vmem:[%s3664_s2 + $0x60] sm:$0xff] }
 0x1a7   :  { %3868 = vst [vmem:[#allocation14_spill] sm:$0xff] %v3117_v46  ;;  %v3156_v55 = vld [vmem:[%s3664_s2 + $0x40] sm:$0xff] }
 0x1a8   :  { %3872 = vst [vmem:[#allocation17_spill] sm:$0xff] %v3142_v52 }
 0x1a9   :  { %3874 = vst [vmem:[#allocation9_spill] sm:$0xff] %v3156_v55 }
 0x1ab   :  { %v1830_v57 = vpop.eup %1829 }
 0x1ac   :  { %v620_v59 = vmul.f32 %v1830_v57, %v614_v58 }
 0x1ae   :  { %637 = vmatmul.f32.vlgmr.msrb.gmra.mxu0 %v620_v59  ;;  %657 = vmatmul.f32.vlgmr.msra.gmra.mxu1 %v620_v59 }
 0x1af   :  { %677 = vmatmul.f32.vlgmr.msrb.gmra.mxu2 %v620_v59  ;;  %697 = vmatmul.f32.vlgmr.msrb.gmra.mxu3 %v620_v59 }
 0x1b0   :  { %915 = vmatpush.msrb.mxu0 %v2864_v1  ;;  %935 = vmatpush.msra.mxu1 %v2870_v61 }
 0x1b1   :  { %955 = vmatpush.msrb.mxu2 %v2876_v62  ;;  %975 = vmatpush.msrb.mxu3 %v2882_v63 }
 0x1b2   :  { %916 = vmatpush.msrb.mxu0 %v2888_v2  ;;  %936 = vmatpush.msra.mxu1 %v2894_v21 }
 0x1b3   :  { %956 = vmatpush.msrb.mxu2 %v2900_v14  ;;  %976 = vmatpush.msrb.mxu3 %v2906_v60 }
 0x1b4   :  { %917 = vmatpush.msrb.mxu0 %v2912_v8  ;;  %937 = vmatpush.msra.mxu1 %v2918_v12 }
 0x1b5   :  { %957 = vmatpush.msrb.mxu2 %v2924_v18  ;;  %977 = vmatpush.msrb.mxu3 %v2930_v11 }
 0x1b6   :  { %918 = vmatpush.msrb.mxu0 %v2936_v26  ;;  %938 = vmatpush.msra.mxu1 %v2942_v53 }
 0x1b7   :  { %958 = vmatpush.msrb.mxu2 %v2948_v15  ;;  %978 = vmatpush.msrb.mxu3 %v2954_v40 }
 0x1b8   :  { %919 = vmatpush.msrb.mxu0 %v2960_v23  ;;  %939 = vmatpush.msra.mxu1 %v2966_v25 }
 0x1b9   :  { %959 = vmatpush.msrb.mxu2 %v2972_v54  ;;  %979 = vmatpush.msrb.mxu3 %v2978_v7 }
 0x1ba   :  { %920 = vmatpush.msrb.mxu0 %v2984_v0  ;;  %940 = vmatpush.msra.mxu1 %v2990_v56 }
 0x1bb   :  { %960 = vmatpush.msrb.mxu2 %v2996_v10  ;;  %980 = vmatpush.msrb.mxu3 %v3002_v16 }
 0x1bc   :  { %921 = vmatpush.msrb.mxu0 %v3008_v3  ;;  %941 = vmatpush.msra.mxu1 %v3014_v4 }
 0x1bd   :  { %961 = vmatpush.msrb.mxu2 %v3020_v13  ;;  %981 = vmatpush.msrb.mxu3 %v3026_v5 }
 0x1be   :  { %922 = vmatpush.msrb.mxu0 %v3032_v9  ;;  %942 = vmatpush.msra.mxu1 %v3038_v6 }
 0x1bf   :  { %962 = vmatpush.msrb.mxu2 %v3044_v19  ;;  %982 = vmatpush.msrb.mxu3 %v3050_v17 }
 0x1c0   :  { %923 = vmatpush.msrb.mxu0 %v3056_v20  ;;  %943 = vmatpush.msra.mxu1 %v3062_v22 }
 0x1c1   :  { %963 = vmatpush.msrb.mxu2 %v3068_v27  ;;  %983 = vmatpush.msrb.mxu3 %v3074_v28 }
 0x1c2   :  { %924 = vmatpush.msrb.mxu0 %v3080_v29  ;;  %944 = vmatpush.msra.mxu1 %v3086_v31 }
 0x1c3   :  { %964 = vmatpush.msrb.mxu2 %v3092_v32  ;;  %984 = vmatpush.msrb.mxu3 %v3098_v33 }
 0x1c4   :  { %925 = vmatpush.msrb.mxu0 %v3104_v35  ;;  %945 = vmatpush.msra.mxu1 %v3837_v24  ;;  %v3130_v24 = vld [vmem:[%s3664_s2 + $0x90] sm:$0xff] }
 0x1c5   :  { %965 = vmatpush.msrb.mxu2 %v3111_v37  ;;  %985 = vmatpush.msrb.mxu3 %v3117_v46  ;;  %3870 = vst [vmem:[#allocation8_spill] sm:$0xff] %v3130_v24 }
 0x1c6   :  { %926 = vmatpush.msrb.mxu0 %v3123_v50  ;;  %946 = vmatpush.msra.mxu1 %v3841_v30  ;;  %v3149_v30 = vld [vmem:[%s3664_s2 + $0x70] sm:$0xff] }
 0x1c7   :  { %966 = vmatpush.msrb.mxu2 %v3130_v24  ;;  %986 = vmatpush.msrb.mxu3 %v3136_v51  ;;  %3873 = vst [vmem:[#allocation19_spill] sm:$0xff] %v3149_v30 }
 0x1c8   :  { %927 = vmatpush.msrb.mxu0 %v3142_v52  ;;  %947 = vmatpush.msra.mxu1 %v3845_v34  ;;  %v3165_v34 = vld [vmem:[%s3664_s2 + $0x20] sm:$0xff] }
 0x1c9   :  { %967 = vmatpush.msrb.mxu2 %v3149_v30  ;;  %987 = vmatpush.msrb.mxu3 %v3847_v36  ;;  %3875 = vst [vmem:[#allocation26_spill] sm:$0xff] %v3165_v34  ;;  %v3174_v36 = vld [vmem:[%s3664_s2] sm:$0xff] }
 0x1ca   :  { %928 = vmatpush.msrb.mxu0 %v3156_v55  ;;  %948 = vmatpush.msra.mxu1 %v3849_v38  ;;  %3876 = vst [vmem:[#allocation20_spill] sm:$0xff] %v3174_v36 }
 0x1cb   :  { %968 = vmatpush.msrb.mxu2 %v3850_v39  ;;  %988 = vmatpush.msrb.mxu3 %v3851_v41  ;;  %v3877_v41 = vld [vmem:[#allocation35_spill] sm:$0xff] }
 0x1cc   :  { %929 = vmatpush.msrb.mxu0 %v3165_v34  ;;  %949 = vmatpush.msra.mxu1 %v3853_v43  ;;  %v3879_v34 = vld [vmem:[#allocation37_spill] sm:$0xff] }
 0x1cd   :  { %969 = vmatpush.msrb.mxu2 %v3854_v44  ;;  %989 = vmatpush.msrb.mxu3 %v3855_v45  ;;  %v3878_v44 = vld [vmem:[#allocation43_spill] sm:$0xff] }
 0x1ce   :  { %930 = vmatpush.msrb.mxu0 %v3174_v36  ;;  %950 = vmatpush.msra.mxu1 %v3857_v47 }
 0x1cf   :  { %970 = vmatpush.msrb.mxu2 %v3858_v48  ;;  %990 = vmatpush.msrb.mxu3 %v3859_v49 }
 0x22b   :  { %v638_v38 = vpop.f32.mrf.mxu0  ;;  %v658_v39 = vpop.f32.mrf.mxu1 }
 0x22c   :  { %v701_v43 = vadd.f32 %v638_v38, %v3877_v41  ;;  %v702_v57 = vadd.f32 %v658_v39, %v3878_v44  ;;  %v3880_v39 = vld [vmem:[#allocation36_spill] sm:$0xff] }
 0x22e   :  { %v1769_v45 = vmul.f32 -1.442695, %v701_v43  ;;  %v1770_v58 = vmul.f32 -1.442695, %v702_v57 }
 0x230   :  { %1831 = vpow2.f32 %v1769_v45 }
 0x231   :  { %1833 = vpow2.f32 %v1770_v58 }
 0x232   :  { %v698_v59 = vpop.f32.mrf.mxu3  ;;  %v678_v49 = vpop.f32.mrf.mxu2 }
 0x233   :  { %v704_v55 = vadd.f32 %v698_v59, %v3879_v34  ;;  %v703_v43 = vadd.f32 %v678_v49, %v3880_v39 }
 0x235   :  { %v1771_v36 = vmul.f32 -1.442695, %v704_v55 }
 0x236   :  { %v1832_v30 = vpop.eup %1831 }
 0x237   :  { %v1834_v47 = vpop.eup %1833  ;;  %v708_v52 = vadd.f32 1.0, %v1832_v30  ;;  %1835 = vpow2.f32 %v1771_v36 }
 0x238   :  { %v727_v48 = vadd.f32 1.0, %v1834_v47 }
 0x239   :  { %1837 = vrcp.f32 %v708_v52  ;;  %v720_v55 = vand.u32 2147483648, %v708_v52  ;;  %v718_v36 = vand.u32 2147483647, %v708_v52  ;;  %vm714_vm12 = vweird.f32 %v708_v52 }
 0x23a   :  { %1839 = vrcp.f32 %v727_v48  ;;  %v739_v59 = vand.u32 2147483648, %v727_v48  ;;  %v737_v24 = vand.u32 2147483647, %v727_v48  ;;  %vm733_vm13 = vweird.f32 %v727_v48 }
 0x23b   :  { %v721_v49 = vor.u32 1.1754944e-38, %v720_v55  ;;  %vm719_vm1 = vcmp.eq.f32.partialorder %v718_v36, 8.507059e+37 }
 0x23c   :  { %vm738_vm2 = vcmp.eq.f32.partialorder %v737_v24, 8.507059e+37 }
 0x23d   :  { %v1836_v51 = vpop.eup %1835 }
 0x23e   :  { %v747_v38 = vadd.f32 1.0, %v1836_v51 }
 0x23f   :  { %v1838_v41 = vpop.eup %1837 }
 0x240   :  { %v1840_v44 = vpop.eup %1839  ;;  %v710_v57 = vmul.f32 %v1838_v41, %v708_v52  ;;  %1841 = vrcp.f32 %v747_v38  ;;  %vm715_vm10 = vweird.f32 %v1838_v41  ;;  %v759_v55 = vand.u32 2147483648, %v747_v38 }
 0x241   :  { %v729_v45 = vmul.f32 %v1840_v44, %v727_v48  ;;  %1843 = vtanh.f32 %v703_v43  ;;  %vm734_vm11 = vweird.f32 %v1840_v44  ;;  %vm716_vm14 = vmor %vm714_vm12, %vm715_vm10  ;;  %vm753_vm4 = vweird.f32 %v747_v38 }
 0x242   :  { %v711_v58 = vsub.f32 1.0, %v710_v57  ;;  %vm735_vm15 = vmor %vm733_vm13, %vm734_vm11  ;;  %v740_v57 = vor.u32 1.1754944e-38, %v739_v59  ;;  %v760_v36 = vor.u32 1.1754944e-38, %v759_v55  ;;  %v3899_v55 = vld [vmem:[#allocation26_spill] sm:$0xff] }
 0x243   :  { %v730_v34 = vsub.f32 1.0, %v729_v45 }
 0x244   :  { %v712_v30 = vmul.f32 %v1838_v41, %v711_v58 }
 0x245   :  { %v731_v47 = vmul.f32 %v1840_v44, %v730_v34 }
 0x246   :  { %v1842_v50 = vpop.eup %1841  ;;  %v713_v51 = vadd.f32 %v1838_v41, %v712_v30 }
 0x247   :  { %v732_v39 = vadd.f32 %v1840_v44, %v731_v47  ;;  %v749_v46 = vmul.f32 %v1842_v50, %v747_v38  ;;  %v1844_v43 = vpop.eup %1843  ;;  %vm754_vm3 = vweird.f32 %v1842_v50  ;;  %v3241_v47 = vld [vmem:[%s3664_s2 + $0x88] sm:$0xff] }
 0x248   :  { %v717_v45 = vsel %vm716_vm14, %v1838_v41, %v713_v51  ;;  %v757_v41 = vand.u32 2147483647, %v747_v38  ;;  %vm755_vm5 = vmor %vm753_vm4, %vm754_vm3  ;;  %v3887_v38 = vld [vmem:[#allocation16_spill] sm:$0xff]  ;;  %3888 = vst [vmem:[#allocation11_spill] sm:$0xff] %v3241_v47 }
 0x249   :  { %v722_v37 = vsel %vm719_vm1, %v721_v49, %v717_v45  ;;  %v736_v58 = vsel %vm735_vm15, %v1840_v44, %v732_v39  ;;  %v750_v35 = vsub.f32 1.0, %v749_v46  ;;  %v3889_v51 = vld [vmem:[#allocation8_spill] sm:$0xff]  ;;  %v3890_v49 = vld [vmem:[#allocation21_spill] sm:$0xff]  ;;  %v3893_v45 = vld [vmem:[#allocation19_spill] sm:$0xff] }
 0x24a   :  { %v741_v34 = vsel %vm738_vm2, %v740_v57, %v736_v58  ;;  %v764_v33 = vmul.f32 %v1844_v43, %v722_v37  ;;  %vm758_vm6 = vcmp.eq.f32.partialorder %v757_v41, 8.507059e+37  ;;  %v3885_v37 = vld [vmem:[#allocation18_spill] sm:$0xff]  ;;  %v3891_v39 = vld [vmem:[#allocation17_spill] sm:$0xff]  ;;  %v3257_v43 = vld [vmem:[%s3664_s2 + $0x78] sm:$0xff] }
 0x24b   :  { %v763_v32 = vmul.f32 %v741_v34, %v2858_v42  ;;  %v751_v30 = vmul.f32 %v1842_v50, %v750_v35  ;;  %v3881_v42 = vld [vmem:[#allocation12_spill] sm:$0xff]  ;;  %v3232_v35 = vld [vmem:[%s3664_s2 + $0xa8] sm:$0xff]  ;;  %3894 = vst [vmem:[#allocation24_spill] sm:$0xff] %v3257_v43 }
 0x24c   :  { %3884 = vst [vmem:[#allocation22_spill] sm:$0xff] %v3232_v35  ;;  %v3250_v57 = vld [vmem:[%s3664_s2 + $0x68] sm:$0xff] }
 0x24d   :  { %v3185_v52 = vadd.f32 %v764_v33, %v763_v32  ;;  %v752_v48 = vadd.f32 %v1842_v50, %v751_v30  ;;  %v3882_v32 = vld [vmem:[#allocation10_spill] sm:$0xff]  ;;  %v3883_v33 = vld [vmem:[#allocation7_spill] sm:$0xff]  ;;  %3892 = vst [vmem:[#allocation29_spill] sm:$0xff] %v3250_v57  ;;  %v3895_v58 = vld [vmem:[#allocation9_spill] sm:$0xff] }
 0x24e   :  { %v3264_v34 = vld [vmem:[%s3664_s2 + $0x48] sm:$0xff]  ;;  %v3270_v30 = vld [vmem:[%s3664_s2 + $0x50] sm:$0xff] }
 0x24f   :  { %1845 = vtanh.f32 %v3185_v52  ;;  %v756_v59 = vsel %vm755_vm5, %v1842_v50, %v752_v48  ;;  %v3886_v50 = vld [vmem:[#allocation14_spill] sm:$0xff]  ;;  %3896 = vst [vmem:[#allocation23_spill] sm:$0xff] %v3264_v34  ;;  %v3276_v48 = vld [vmem:[%s3664_s2 + $0x58] sm:$0xff]  ;;  %v3283_v41 = vld [vmem:[%s3664_s2 + $0x28] sm:$0xff] }
 0x250   :  { %v761_v46 = vsel %vm758_vm6, %v760_v36, %v756_v59  ;;  %3897 = vst [vmem:[#allocation13_spill] sm:$0xff] %v3270_v30  ;;  %v3289_v59 = vld [vmem:[%s3664_s2 + $0x30] sm:$0xff]  ;;  %v3295_v36 = vld [vmem:[%s3664_s2 + $0x38] sm:$0xff] }
 0x251   :  { %3898 = vst [vmem:[#allocation31_spill] sm:$0xff] %v3276_v48 }
 0x252   :  { %3900 = vst [vmem:[#allocation27_spill] sm:$0xff] %v3283_v41 }
 0x253   :  { %3901 = vst [vmem:[#allocation25_spill] sm:$0xff] %v3289_v59 }
 0x254   :  { %3902 = vst [vmem:[#allocation15_spill] sm:$0xff] %v3295_v36 }
 0x255   :  { %v1846_v24 = vpop.eup %1845 }
 0x256   :  { %v767_v44 = vmul.f32 %v1846_v24, %v761_v46  ;;  %v3903_v24 = vld [vmem:[#allocation20_spill] sm:$0xff]  ;;  %v3302_v46 = vld [vmem:[%s3664_s2 + $0x8] sm:$0xff] }
 0x257   :  { %3904 = vst [vmem:[#allocation32_spill] sm:$0xff] %v3302_v46 }
 0x258   :  { %784 = vmatmul.f32.vlgmr.msra.gmra.mxu0 %v767_v44  ;;  %804 = vmatmul.f32.vlgmr.msrb.gmra.mxu1 %v767_v44 }
 0x259   :  { %824 = vmatmul.f32.vlgmr.msra.gmra.mxu2 %v767_v44  ;;  %844 = vmatmul.f32.vlgmr.msra.gmra.mxu3 %v767_v44  ;;  %v3308_v44 = vld [vmem:[%s3664_s2 + $0x10] sm:$0xff] }
 0x25a   :  { %1062 = vmatpush.msra.mxu0 %v2864_v1  ;;  %1082 = vmatpush.msrb.mxu1 %v2870_v61  ;;  %3905 = vst [vmem:[#allocation30_spill] sm:$0xff] %v3308_v44 }
 0x25b   :  { %1102 = vmatpush.msra.mxu2 %v2876_v62  ;;  %1122 = vmatpush.msra.mxu3 %v2882_v63 }
 0x25c   :  { %1063 = vmatpush.msra.mxu0 %v2888_v2  ;;  %1083 = vmatpush.msrb.mxu1 %v2894_v21 }
 0x25d   :  { %1103 = vmatpush.msra.mxu2 %v2900_v14  ;;  %1123 = vmatpush.msra.mxu3 %v2906_v60 }
 0x25e   :  { %1064 = vmatpush.msra.mxu0 %v2912_v8  ;;  %1084 = vmatpush.msrb.mxu1 %v2918_v12 }
 0x25f   :  { %1104 = vmatpush.msra.mxu2 %v2924_v18  ;;  %1124 = vmatpush.msra.mxu3 %v2930_v11 }
 0x260   :  { %1065 = vmatpush.msra.mxu0 %v2936_v26  ;;  %1085 = vmatpush.msrb.mxu1 %v2942_v53 }
 0x261   :  { %1105 = vmatpush.msra.mxu2 %v2948_v15  ;;  %1125 = vmatpush.msra.mxu3 %v2954_v40 }
 0x262   :  { %1066 = vmatpush.msra.mxu0 %v2960_v23  ;;  %1086 = vmatpush.msrb.mxu1 %v2966_v25 }
 0x263   :  { %1106 = vmatpush.msra.mxu2 %v2972_v54  ;;  %1126 = vmatpush.msra.mxu3 %v2978_v7 }
 0x264   :  { %1067 = vmatpush.msra.mxu0 %v2984_v0  ;;  %1087 = vmatpush.msrb.mxu1 %v2990_v56 }
 0x265   :  { %1107 = vmatpush.msra.mxu2 %v2996_v10  ;;  %1127 = vmatpush.msra.mxu3 %v3002_v16 }
 0x266   :  { %1068 = vmatpush.msra.mxu0 %v3008_v3  ;;  %1088 = vmatpush.msrb.mxu1 %v3014_v4 }
 0x267   :  { %1108 = vmatpush.msra.mxu2 %v3020_v13  ;;  %1128 = vmatpush.msra.mxu3 %v3026_v5 }
 0x268   :  { %1069 = vmatpush.msra.mxu0 %v3032_v9  ;;  %1089 = vmatpush.msrb.mxu1 %v3038_v6 }
 0x269   :  { %1109 = vmatpush.msra.mxu2 %v3044_v19  ;;  %1129 = vmatpush.msra.mxu3 %v3050_v17 }
 0x26a   :  { %1070 = vmatpush.msra.mxu0 %v3056_v20  ;;  %1090 = vmatpush.msrb.mxu1 %v3062_v22 }
 0x26b   :  { %1110 = vmatpush.msra.mxu2 %v3068_v27  ;;  %1130 = vmatpush.msra.mxu3 %v3074_v28 }
 0x26c   :  { %1071 = vmatpush.msra.mxu0 %v3080_v29  ;;  %1091 = vmatpush.msrb.mxu1 %v3086_v31 }
 0x26d   :  { %1111 = vmatpush.msra.mxu2 %v3881_v42  ;;  %1131 = vmatpush.msra.mxu3 %v3882_v32 }
 0x26e   :  { %1072 = vmatpush.msra.mxu0 %v3883_v33  ;;  %1092 = vmatpush.msrb.mxu1 %v3232_v35 }
 0x26f   :  { %1112 = vmatpush.msra.mxu2 %v3885_v37  ;;  %1132 = vmatpush.msra.mxu3 %v3886_v50 }
 0x270   :  { %1073 = vmatpush.msra.mxu0 %v3887_v38  ;;  %1093 = vmatpush.msrb.mxu1 %v3241_v47 }
 0x271   :  { %1113 = vmatpush.msra.mxu2 %v3889_v51  ;;  %1133 = vmatpush.msra.mxu3 %v3890_v49 }
 0x272   :  { %1074 = vmatpush.msra.mxu0 %v3891_v39  ;;  %1094 = vmatpush.msrb.mxu1 %v3250_v57 }
 0x273   :  { %1114 = vmatpush.msra.mxu2 %v3893_v45  ;;  %1134 = vmatpush.msra.mxu3 %v3257_v43  ;;  %v3909_v43 = vld [vmem:[#allocation41_spill] sm:$0xff] }
 0x274   :  { %1075 = vmatpush.msra.mxu0 %v3895_v58  ;;  %1095 = vmatpush.msrb.mxu1 %v3264_v34 }
 0x275   :  { %1115 = vmatpush.msra.mxu2 %v3270_v30  ;;  %1135 = vmatpush.msra.mxu3 %v3276_v48  ;;  %v3908_v48 = vld [vmem:[#allocation47_spill] sm:$0xff] }
 0x276   :  { %1076 = vmatpush.msra.mxu0 %v3899_v55  ;;  %1096 = vmatpush.msrb.mxu1 %v3283_v41  ;;  %v3907_v41 = vld [vmem:[#allocation38_spill] sm:$0xff] }
 0x277   :  { %1116 = vmatpush.msra.mxu2 %v3289_v59  ;;  %1136 = vmatpush.msra.mxu3 %v3295_v36  ;;  %v3314_v36 = vld [vmem:[%s3664_s2 + $0x18] sm:$0xff] }
 0x278   :  { %1077 = vmatpush.msra.mxu0 %v3903_v24  ;;  %1097 = vmatpush.msrb.mxu1 %v3302_v46  ;;  %3906 = vst [vmem:[#allocation28_spill] sm:$0xff] %v3314_v36 }
 0x279   :  { %1117 = vmatpush.msra.mxu2 %v3308_v44  ;;  %1137 = vmatpush.msra.mxu3 %v3314_v36 }
 0x2d5   :  { %v785_v24 = vpop.f32.mrf.mxu0  ;;  %v805_v59 = vpop.f32.mrf.mxu1 }
 0x2d6   :  { %v848_v55 = vadd.f32 %v785_v24, %v3907_v41  ;;  %v849_v46 = vadd.f32 %v805_v59, %v3908_v48  ;;  %v3910_v48 = vld [vmem:[#allocation40_spill] sm:$0xff] }
 0x2d8   :  { %v1772_v30 = vmul.f32 -1.442695, %v848_v55  ;;  %v1773_v34 = vmul.f32 -1.442695, %v849_v46 }
 0x2da   :  { %1847 = vpow2.f32 %v1772_v30 }
 0x2db   :  { %1849 = vpow2.f32 %v1773_v34 }
 0x2dc   :  { %v845_v58 = vpop.f32.mrf.mxu3  ;;  %v825_v36 = vpop.f32.mrf.mxu2 }
 0x2dd   :  { %v851_v44 = vadd.f32 %v845_v58, %v3909_v43  ;;  %v850_v55 = vadd.f32 %v825_v36, %v3910_v48 }
 0x2df   :  { %v1774_v45 = vmul.f32 -1.442695, %v851_v44 }
 0x2e0   :  { %v1848_v57 = vpop.eup %1847 }
 0x2e1   :  { %v1850_v39 = vpop.eup %1849  ;;  %v855_v49 = vadd.f32 1.0, %v1848_v57  ;;  %1851 = vpow2.f32 %v1774_v45 }
 0x2e2   :  { %v874_v51 = vadd.f32 1.0, %v1850_v39 }
 0x2e3   :  { %1853 = vrcp.f32 %v855_v49  ;;  %v867_v58 = vand.u32 2147483648, %v855_v49  ;;  %v865_v39 = vand.u32 2147483647, %v855_v49  ;;  %vm861_vm9 = vweird.f32 %v855_v49 }
 0x2e4   :  { %1855 = vrcp.f32 %v874_v51  ;;  %v886_v44 = vand.u32 2147483648, %v874_v51  ;;  %v884_v38 = vand.u32 2147483647, %v874_v51  ;;  %vm880_vm10 = vweird.f32 %v874_v51 }
 0x2e5   :  { %v868_v36 = vor.u32 1.1754944e-38, %v867_v58  ;;  %vm866_vm13 = vcmp.eq.f32.partialorder %v865_v39, 8.507059e+37 }
 0x2e6   :  { %vm885_vm14 = vcmp.eq.f32.partialorder %v884_v38, 8.507059e+37 }
 0x2e7   :  { %v1852_v47 = vpop.eup %1851 }
 0x2e8   :  { %v894_v41 = vadd.f32 1.0, %v1852_v47 }
 0x2e9   :  { %v1854_v24 = vpop.eup %1853 }
 0x2ea   :  { %v1856_v59 = vpop.eup %1855  ;;  %v857_v30 = vmul.f32 %v1854_v24, %v855_v49  ;;  %1857 = vrcp.f32 %v894_v41  ;;  %vm862_vm7 = vweird.f32 %v1854_v24  ;;  %v906_v58 = vand.u32 2147483648, %v894_v41 }
 0x2eb   :  { %v876_v34 = vmul.f32 %v1856_v59, %v874_v51  ;;  %1859 = vtanh.f32 %v850_v55  ;;  %vm881_vm8 = vweird.f32 %v1856_v59  ;;  %vm863_vm11 = vmor %vm861_vm9, %vm862_vm7  ;;  %vm900_vm1 = vweird.f32 %v894_v41 }
 0x2ec   :  { %v858_v46 = vsub.f32 1.0, %v857_v30  ;;  %vm882_vm12 = vmor %vm880_vm10, %vm881_vm8  ;;  %v887_v30 = vor.u32 1.1754944e-38, %v886_v44  ;;  %v907_v39 = vor.u32 1.1754944e-38, %v906_v58  ;;  %v3929_v58 = vld [vmem:[#allocation26_spill] sm:$0xff] }
 0x2ed   :  { %v877_v43 = vsub.f32 1.0, %v876_v34 }
 0x2ee   :  { %v859_v57 = vmul.f32 %v1854_v24, %v858_v46 }
 0x2ef   :  { %v878_v45 = vmul.f32 %v1856_v59, %v877_v43 }
 0x2f0   :  { %v1858_v50 = vpop.eup %1857  ;;  %v860_v47 = vadd.f32 %v1854_v24, %v859_v57 }
 0x2f1   :  { %v879_v48 = vadd.f32 %v1856_v59, %v878_v45  ;;  %v896_v37 = vmul.f32 %v1858_v50, %v894_v41  ;;  %v1860_v55 = vpop.eup %1859  ;;  %vm901_vm15 = vweird.f32 %v1858_v50  ;;  %v3918_v45 = vld [vmem:[#allocation11_spill] sm:$0xff] }
 0x2f2   :  { %v864_v34 = vsel %vm863_vm11, %v1854_v24, %v860_v47  ;;  %v904_v24 = vand.u32 2147483647, %v894_v41  ;;  %vm902_vm2 = vmor %vm900_vm1, %vm901_vm15  ;;  %v3917_v41 = vld [vmem:[#allocation16_spill] sm:$0xff] }
 0x2f3   :  { %v869_v35 = vsel %vm866_vm13, %v868_v36, %v864_v34  ;;  %v883_v46 = vsel %vm882_vm12, %v1856_v59, %v879_v48  ;;  %v897_v33 = vsub.f32 1.0, %v896_v37  ;;  %v3919_v47 = vld [vmem:[#allocation8_spill] sm:$0xff]  ;;  %v3920_v36 = vld [vmem:[#allocation21_spill] sm:$0xff]  ;;  %v3923_v34 = vld [vmem:[#allocation19_spill] sm:$0xff] }
 0x2f4   :  { %v888_v43 = vsel %vm885_vm14, %v887_v30, %v883_v46  ;;  %v911_v32 = vmul.f32 %v1860_v55, %v869_v35  ;;  %vm905_vm3 = vcmp.eq.f32.partialorder %v904_v24, 8.507059e+37  ;;  %v3915_v35 = vld [vmem:[#allocation18_spill] sm:$0xff]  ;;  %v3921_v48 = vld [vmem:[#allocation17_spill] sm:$0xff]  ;;  %v3924_v55 = vld [vmem:[#allocation24_spill] sm:$0xff] }
 0x2f5   :  { %v910_v42 = vmul.f32 %v888_v43, %v3185_v52  ;;  %v898_v57 = vmul.f32 %v1858_v50, %v897_v33  ;;  %v3911_v52 = vld [vmem:[#allocation12_spill] sm:$0xff]  ;;  %v3914_v33 = vld [vmem:[#allocation22_spill] sm:$0xff]  ;;  %v3922_v30 = vld [vmem:[#allocation29_spill] sm:$0xff] }
 0x2f6   :  { %v3925_v46 = vld [vmem:[#allocation9_spill] sm:$0xff]  ;;  %v3926_v43 = vld [vmem:[#allocation23_spill] sm:$0xff] }
 0x2f7   :  { %v3322_v49 = vadd.f32 %v911_v32, %v910_v42  ;;  %v899_v51 = vadd.f32 %v1858_v50, %v898_v57  ;;  %v3912_v42 = vld [vmem:[#allocation10_spill] sm:$0xff]  ;;  %v3913_v32 = vld [vmem:[#allocation7_spill] sm:$0xff]  ;;  %v3927_v57 = vld [vmem:[#allocation13_spill] sm:$0xff] }
 0x2f8   :  { %v3930_v24 = vld [vmem:[#allocation27_spill] sm:$0xff] }
 0x2f9   :  { %1861 = vtanh.f32 %v3322_v49  ;;  %v903_v44 = vsel %vm902_vm2, %v1858_v50, %v899_v51  ;;  %v3916_v50 = vld [vmem:[#allocation14_spill] sm:$0xff]  ;;  %v3928_v51 = vld [vmem:[#allocation31_spill] sm:$0xff] }
 0x2fa   :  { %v908_v37 = vsel %vm905_vm3, %v907_v39, %v903_v44  ;;  %v3931_v44 = vld [vmem:[#allocation25_spill] sm:$0xff]  ;;  %v3932_v39 = vld [vmem:[#allocation15_spill] sm:$0xff] }
 0x2ff   :  { %v1862_v38 = vpop.eup %1861 }
 0x300   :  { %v914_v59 = vmul.f32 %v1862_v38, %v908_v37  ;;  %v3933_v38 = vld [vmem:[#allocation20_spill] sm:$0xff] }
 0x301   :  { %v3934_v37 = vld [vmem:[#allocation32_spill] sm:$0xff] }
 0x302   :  { %931 = vmatmul.f32.vlgmr.msrb.gmra.mxu0 %v914_v59  ;;  %951 = vmatmul.f32.vlgmr.msra.gmra.mxu1 %v914_v59 }
 0x303   :  { %971 = vmatmul.f32.vlgmr.msrb.gmra.mxu2 %v914_v59  ;;  %991 = vmatmul.f32.vlgmr.msrb.gmra.mxu3 %v914_v59  ;;  %v3935_v59 = vld [vmem:[#allocation30_spill] sm:$0xff] }
 0x304   :  { %1209 = vmatpush.msrb.mxu0 %v2864_v1  ;;  %1229 = vmatpush.msra.mxu1 %v2870_v61 }
 0x305   :  { %1249 = vmatpush.msrb.mxu2 %v2876_v62  ;;  %1269 = vmatpush.msrb.mxu3 %v2882_v63 }
 0x306   :  { %1210 = vmatpush.msrb.mxu0 %v2888_v2  ;;  %1230 = vmatpush.msra.mxu1 %v2894_v21 }
 0x307   :  { %1250 = vmatpush.msrb.mxu2 %v2900_v14  ;;  %1270 = vmatpush.msrb.mxu3 %v2906_v60 }
 0x308   :  { %1211 = vmatpush.msrb.mxu0 %v2912_v8  ;;  %1231 = vmatpush.msra.mxu1 %v2918_v12 }
 0x309   :  { %1251 = vmatpush.msrb.mxu2 %v2924_v18  ;;  %1271 = vmatpush.msrb.mxu3 %v2930_v11 }
 0x30a   :  { %1212 = vmatpush.msrb.mxu0 %v2936_v26  ;;  %1232 = vmatpush.msra.mxu1 %v2942_v53 }
 0x30b   :  { %1252 = vmatpush.msrb.mxu2 %v2948_v15  ;;  %1272 = vmatpush.msrb.mxu3 %v2954_v40 }
 0x30c   :  { %1213 = vmatpush.msrb.mxu0 %v2960_v23  ;;  %1233 = vmatpush.msra.mxu1 %v2966_v25 }
 0x30d   :  { %1253 = vmatpush.msrb.mxu2 %v2972_v54  ;;  %1273 = vmatpush.msrb.mxu3 %v2978_v7 }
 0x30e   :  { %1214 = vmatpush.msrb.mxu0 %v2984_v0  ;;  %1234 = vmatpush.msra.mxu1 %v2990_v56 }
 0x30f   :  { %1254 = vmatpush.msrb.mxu2 %v2996_v10  ;;  %1274 = vmatpush.msrb.mxu3 %v3002_v16 }
 0x310   :  { %1215 = vmatpush.msrb.mxu0 %v3008_v3  ;;  %1235 = vmatpush.msra.mxu1 %v3014_v4 }
 0x311   :  { %1255 = vmatpush.msrb.mxu2 %v3020_v13  ;;  %1275 = vmatpush.msrb.mxu3 %v3026_v5 }
 0x312   :  { %1216 = vmatpush.msrb.mxu0 %v3032_v9  ;;  %1236 = vmatpush.msra.mxu1 %v3038_v6 }
 0x313   :  { %1256 = vmatpush.msrb.mxu2 %v3044_v19  ;;  %1276 = vmatpush.msrb.mxu3 %v3050_v17 }
 0x314   :  { %1217 = vmatpush.msrb.mxu0 %v3056_v20  ;;  %1237 = vmatpush.msra.mxu1 %v3062_v22 }
 0x315   :  { %1257 = vmatpush.msrb.mxu2 %v3068_v27  ;;  %1277 = vmatpush.msrb.mxu3 %v3074_v28 }
 0x316   :  { %1218 = vmatpush.msrb.mxu0 %v3080_v29  ;;  %1238 = vmatpush.msra.mxu1 %v3086_v31 }
 0x317   :  { %1258 = vmatpush.msrb.mxu2 %v3911_v52  ;;  %1278 = vmatpush.msrb.mxu3 %v3912_v42 }
 0x318   :  { %1219 = vmatpush.msrb.mxu0 %v3913_v32  ;;  %1239 = vmatpush.msra.mxu1 %v3914_v33 }
 0x319   :  { %1259 = vmatpush.msrb.mxu2 %v3915_v35  ;;  %1279 = vmatpush.msrb.mxu3 %v3916_v50 }
 0x31a   :  { %1220 = vmatpush.msrb.mxu0 %v3917_v41  ;;  %1240 = vmatpush.msra.mxu1 %v3918_v45 }
 0x31b   :  { %1260 = vmatpush.msrb.mxu2 %v3919_v47  ;;  %1280 = vmatpush.msrb.mxu3 %v3920_v36 }
 0x31c   :  { %1221 = vmatpush.msrb.mxu0 %v3921_v48  ;;  %1241 = vmatpush.msra.mxu1 %v3922_v30 }
 0x31d   :  { %1261 = vmatpush.msrb.mxu2 %v3923_v34  ;;  %1281 = vmatpush.msrb.mxu3 %v3924_v55  ;;  %v3937_v55 = vld [vmem:[#allocation42_spill] sm:$0xff] }
 0x31e   :  { %1222 = vmatpush.msrb.mxu0 %v3925_v46  ;;  %1242 = vmatpush.msra.mxu1 %v3926_v43  ;;  %v3936_v46 = vld [vmem:[#allocation28_spill] sm:$0xff]  ;;  %v3938_v34 = vld [vmem:[#allocation50_spill] sm:$0xff] }
 0x31f   :  { %1262 = vmatpush.msrb.mxu2 %v3927_v57  ;;  %1282 = vmatpush.msrb.mxu3 %v3928_v51 }
 0x320   :  { %1223 = vmatpush.msrb.mxu0 %v3929_v58  ;;  %1243 = vmatpush.msra.mxu1 %v3930_v24 }
 0x321   :  { %1263 = vmatpush.msrb.mxu2 %v3931_v44  ;;  %1283 = vmatpush.msrb.mxu3 %v3932_v39  ;;  %v3939_v39 = vld [vmem:[#allocation45_spill] sm:$0xff] }
 0x322   :  { %1224 = vmatpush.msrb.mxu0 %v3933_v38  ;;  %1244 = vmatpush.msra.mxu1 %v3934_v37 }
 0x323   :  { %1264 = vmatpush.msrb.mxu2 %v3935_v59  ;;  %1284 = vmatpush.msrb.mxu3 %v3936_v46 }
 0x37f   :  { %v932_v43 = vpop.f32.mrf.mxu0  ;;  %v952_v57 = vpop.f32.mrf.mxu1 }
 0x380   :  { %v995_v51 = vadd.f32 %v932_v43, %v3937_v55  ;;  %v996_v58 = vadd.f32 %v952_v57, %v3938_v34  ;;  %v3940_v34 = vld [vmem:[#allocation44_spill] sm:$0xff] }
 0x382   :  { %v1775_v30 = vmul.f32 -1.442695, %v995_v51  ;;  %v1776_v24 = vmul.f32 -1.442695, %v996_v58 }
 0x384   :  { %1863 = vpow2.f32 %v1775_v30 }
 0x385   :  { %1865 = vpow2.f32 %v1776_v24 }
 0x386   :  { %v992_v44 = vpop.f32.mrf.mxu3  ;;  %v972_v46 = vpop.f32.mrf.mxu2 }
 0x387   :  { %v998_v48 = vadd.f32 %v992_v44, %v3939_v39  ;;  %v997_v57 = vadd.f32 %v972_v46, %v3940_v34 }
 0x389   :  { %v1777_v38 = vmul.f32 -1.442695, %v998_v48 }
 0x38a   :  { %v1864_v36 = vpop.eup %1863 }
 0x38b   :  { %v1866_v37 = vpop.eup %1865  ;;  %v1002_v47 = vadd.f32 1.0, %v1864_v36  ;;  %1867 = vpow2.f32 %v1777_v38 }
 0x38c   :  { %v1021_v59 = vadd.f32 1.0, %v1866_v37 }
 0x38d   :  { %1869 = vrcp.f32 %v1002_v47  ;;  %v1014_v48 = vand.u32 2147483648, %v1002_v47  ;;  %v1012_v38 = vand.u32 2147483647, %v1002_v47  ;;  %vm1008_vm6 = vweird.f32 %v1002_v47 }
 0x38e   :  { %1871 = vrcp.f32 %v1021_v59  ;;  %v1033_v39 = vand.u32 2147483648, %v1021_v59  ;;  %v1031_v41 = vand.u32 2147483647, %v1021_v59  ;;  %vm1027_vm7 = vweird.f32 %v1021_v59 }
 0x38f   :  { %v1015_v46 = vor.u32 1.1754944e-38, %v1014_v48  ;;  %vm1013_vm10 = vcmp.eq.f32.partialorder %v1012_v38, 8.507059e+37 }
 0x390   :  { %vm1032_vm11 = vcmp.eq.f32.partialorder %v1031_v41, 8.507059e+37 }
 0x391   :  { %v1868_v45 = vpop.eup %1867 }
 0x392   :  { %v1041_v55 = vadd.f32 1.0, %v1868_v45 }
 0x393   :  { %v1870_v43 = vpop.eup %1869 }
 0x394   :  { %v1872_v51 = vpop.eup %1871  ;;  %v1004_v30 = vmul.f32 %v1870_v43, %v1002_v47  ;;  %1873 = vrcp.f32 %v1041_v55  ;;  %vm1009_vm4 = vweird.f32 %v1870_v43  ;;  %v1053_v48 = vand.u32 2147483648, %v1041_v55 }
 0x395   :  { %v1023_v58 = vmul.f32 %v1872_v51, %v1021_v59  ;;  %1875 = vtanh.f32 %v997_v57  ;;  %vm1028_vm5 = vweird.f32 %v1872_v51  ;;  %vm1010_vm8 = vmor %vm1008_vm6, %vm1009_vm4  ;;  %vm1047_vm13 = vweird.f32 %v1041_v55 }
 0x396   :  { %v1005_v24 = vsub.f32 1.0, %v1004_v30  ;;  %vm1029_vm9 = vmor %vm1027_vm7, %vm1028_vm5  ;;  %v1034_v30 = vor.u32 1.1754944e-38, %v1033_v39  ;;  %v1054_v38 = vor.u32 1.1754944e-38, %v1053_v48 }
 0x397   :  { %v1024_v44 = vsub.f32 1.0, %v1023_v58 }
 0x398   :  { %v1006_v36 = vmul.f32 %v1870_v43, %v1005_v24 }
 0x399   :  { %v1025_v37 = vmul.f32 %v1872_v51, %v1024_v44 }
 0x39a   :  { %v1874_v50 = vpop.eup %1873  ;;  %v1007_v45 = vadd.f32 %v1870_v43, %v1006_v36 }
 0x39b   :  { %v1026_v34 = vadd.f32 %v1872_v51, %v1025_v37  ;;  %v1043_v35 = vmul.f32 %v1874_v50, %v1041_v55  ;;  %v1876_v57 = vpop.eup %1875  ;;  %vm1048_vm12 = vweird.f32 %v1874_v50 }
 0x39c   :  { %v1011_v58 = vsel %vm1010_vm8, %v1870_v43, %v1007_v45  ;;  %v1051_v43 = vand.u32 2147483647, %v1041_v55  ;;  %vm1049_vm14 = vmor %vm1047_vm13, %vm1048_vm12  ;;  %v3970_v45 = vld [vmem:[#allocation48_spill] sm:$0xff] }
 0x39d   :  { %v1016_v33 = vsel %vm1013_vm10, %v1015_v46, %v1011_v58  ;;  %v1030_v24 = vsel %vm1029_vm9, %v1872_v51, %v1026_v34  ;;  %v1044_v32 = vsub.f32 1.0, %v1043_v35 }
 0x39e   :  { %v1035_v44 = vsel %vm1032_vm11, %v1034_v30, %v1030_v24  ;;  %v1058_v42 = vmul.f32 %v1876_v57, %v1016_v33  ;;  %vm1052_vm15 = vcmp.eq.f32.partialorder %v1051_v43, 8.507059e+37 }
 0x39f   :  { %v1057_v52 = vmul.f32 %v1035_v44, %v3322_v49  ;;  %v1045_v36 = vmul.f32 %v1874_v50, %v1044_v32 }
 0x3a1   :  { %v3394_v47 = vadd.f32 %v1058_v42, %v1057_v52  ;;  %v1046_v59 = vadd.f32 %v1874_v50, %v1045_v36 }
 0x3a3   :  { %1877 = vtanh.f32 %v3394_v47  ;;  %v1050_v39 = vsel %vm1049_vm14, %v1874_v50, %v1046_v59 }
 0x3a4   :  { %v1055_v35 = vsel %vm1052_vm15, %v1054_v38, %v1050_v39 }
 0x3a9   :  { %v1878_v41 = vpop.eup %1877 }
 0x3aa   :  { %v1061_v51 = vmul.f32 %v1878_v41, %v1055_v35 }
 0x3ac   :  { %1078 = vmatmul.f32.vlgmr.msra.gmra.mxu0 %v1061_v51  ;;  %1098 = vmatmul.f32.vlgmr.msrb.gmra.mxu1 %v1061_v51 }
 0x3ad   :  { %1118 = vmatmul.f32.vlgmr.msra.gmra.mxu2 %v1061_v51  ;;  %1138 = vmatmul.f32.vlgmr.msra.gmra.mxu3 %v1061_v51 }
 0x3ae   :  { %1356 = vmatpush.msra.mxu0 %v2864_v1  ;;  %1376 = vmatpush.msrb.mxu1 %v2870_v61  ;;  %v3941_v1 = vld [vmem:[#allocation12_spill] sm:$0xff]  ;;  %v3942_v61 = vld [vmem:[#allocation10_spill] sm:$0xff] }
 0x3af   :  { %1396 = vmatpush.msra.mxu2 %v2876_v62  ;;  %1416 = vmatpush.msra.mxu3 %v2882_v63  ;;  %v3943_v62 = vld [vmem:[#allocation7_spill] sm:$0xff]  ;;  %v3944_v63 = vld [vmem:[#allocation22_spill] sm:$0xff] }
 0x3b0   :  { %1357 = vmatpush.msra.mxu0 %v2888_v2  ;;  %1377 = vmatpush.msrb.mxu1 %v2894_v21  ;;  %v3945_v2 = vld [vmem:[#allocation18_spill] sm:$0xff] }
 0x3b1   :  { %1397 = vmatpush.msra.mxu2 %v2900_v14  ;;  %1417 = vmatpush.msra.mxu3 %v2906_v60  ;;  %v3946_v21 = vld [vmem:[#allocation14_spill] sm:$0xff]  ;;  %v3947_v14 = vld [vmem:[#allocation16_spill] sm:$0xff]  ;;  %v3948_v60 = vld [vmem:[#allocation11_spill] sm:$0xff] }
 0x3b2   :  { %1358 = vmatpush.msra.mxu0 %v2912_v8  ;;  %1378 = vmatpush.msrb.mxu1 %v2918_v12  ;;  %v3949_v8 = vld [vmem:[#allocation8_spill] sm:$0xff]  ;;  %v3950_v12 = vld [vmem:[#allocation21_spill] sm:$0xff] }
 0x3b3   :  { %1398 = vmatpush.msra.mxu2 %v2924_v18  ;;  %1418 = vmatpush.msra.mxu3 %v2930_v11  ;;  %v3951_v18 = vld [vmem:[#allocation17_spill] sm:$0xff] }
 0x3b4   :  { %1359 = vmatpush.msra.mxu0 %v2936_v26  ;;  %1379 = vmatpush.msrb.mxu1 %v2942_v53  ;;  %v3952_v11 = vld [vmem:[#allocation29_spill] sm:$0xff]  ;;  %v3953_v26 = vld [vmem:[#allocation19_spill] sm:$0xff]  ;;  %v3954_v53 = vld [vmem:[#allocation24_spill] sm:$0xff] }
 0x3b5   :  { %1399 = vmatpush.msra.mxu2 %v2948_v15  ;;  %1419 = vmatpush.msra.mxu3 %v2954_v40  ;;  %v3955_v15 = vld [vmem:[#allocation9_spill] sm:$0xff]  ;;  %v3956_v40 = vld [vmem:[#allocation23_spill] sm:$0xff] }
 0x3b6   :  { %1360 = vmatpush.msra.mxu0 %v2960_v23  ;;  %1380 = vmatpush.msrb.mxu1 %v2966_v25  ;;  %v3957_v23 = vld [vmem:[#allocation13_spill] sm:$0xff]  ;;  %v3958_v25 = vld [vmem:[#allocation31_spill] sm:$0xff] }
 0x3b7   :  { %1400 = vmatpush.msra.mxu2 %v2972_v54  ;;  %1420 = vmatpush.msra.mxu3 %v2978_v7  ;;  %v3959_v54 = vld [vmem:[#allocation26_spill] sm:$0xff]  ;;  %v3960_v7 = vld [vmem:[#allocation27_spill] sm:$0xff] }
 0x3b8   :  { %1361 = vmatpush.msra.mxu0 %v2984_v0  ;;  %1381 = vmatpush.msrb.mxu1 %v2990_v56  ;;  %v3961_v0 = vld [vmem:[#allocation25_spill] sm:$0xff]  ;;  %v3962_v56 = vld [vmem:[#allocation15_spill] sm:$0xff] }
 0x3b9   :  { %1401 = vmatpush.msra.mxu2 %v2996_v10  ;;  %1421 = vmatpush.msra.mxu3 %v3002_v16  ;;  %v3963_v10 = vld [vmem:[#allocation20_spill] sm:$0xff] }
 0x3ba   :  { %1362 = vmatpush.msra.mxu0 %v3008_v3  ;;  %1382 = vmatpush.msrb.mxu1 %v3014_v4  ;;  %v3964_v16 = vld [vmem:[#allocation32_spill] sm:$0xff]  ;;  %v3965_v3 = vld [vmem:[#allocation30_spill] sm:$0xff] }
 0x3bb   :  { %1402 = vmatpush.msra.mxu2 %v3020_v13  ;;  %1422 = vmatpush.msra.mxu3 %v3026_v5  ;;  %v3966_v4 = vld [vmem:[#allocation28_spill] sm:$0xff] }
 0x3bc   :  { %1363 = vmatpush.msra.mxu0 %v3032_v9  ;;  %1383 = vmatpush.msrb.mxu1 %v3038_v6  ;;  %v3967_v9 = vld [vmem:[#allocation46_spill] sm:$0xff] }
 0x3bd   :  { %1403 = vmatpush.msra.mxu2 %v3044_v19  ;;  %1423 = vmatpush.msra.mxu3 %v3050_v17  ;;  %v3968_v19 = vld [vmem:[#allocation53_spill] sm:$0xff] }
 0x3be   :  { %1364 = vmatpush.msra.mxu0 %v3056_v20  ;;  %1384 = vmatpush.msrb.mxu1 %v3062_v22 }
 0x3bf   :  { %1404 = vmatpush.msra.mxu2 %v3068_v27  ;;  %1424 = vmatpush.msra.mxu3 %v3074_v28  ;;  %v3969_v28 = vld [vmem:[#allocation49_spill] sm:$0xff] }
 0x3c0   :  { %1365 = vmatpush.msra.mxu0 %v3080_v29  ;;  %1385 = vmatpush.msrb.mxu1 %v3086_v31 }
 0x3c1   :  { %1405 = vmatpush.msra.mxu2 %v3941_v1  ;;  %1425 = vmatpush.msra.mxu3 %v3942_v61 }
 0x3c2   :  { %1366 = vmatpush.msra.mxu0 %v3943_v62  ;;  %1386 = vmatpush.msrb.mxu1 %v3944_v63 }
 0x3c3   :  { %1406 = vmatpush.msra.mxu2 %v3945_v2  ;;  %1426 = vmatpush.msra.mxu3 %v3946_v21 }
 0x3c4   :  { %1367 = vmatpush.msra.mxu0 %v3947_v14  ;;  %1387 = vmatpush.msrb.mxu1 %v3948_v60 }
 0x3c5   :  { %1407 = vmatpush.msra.mxu2 %v3949_v8  ;;  %1427 = vmatpush.msra.mxu3 %v3950_v12 }
 0x3c6   :  { %1368 = vmatpush.msra.mxu0 %v3951_v18  ;;  %1388 = vmatpush.msrb.mxu1 %v3952_v11 }
 0x3c7   :  { %1408 = vmatpush.msra.mxu2 %v3953_v26  ;;  %1428 = vmatpush.msra.mxu3 %v3954_v53 }
 0x3c8   :  { %1369 = vmatpush.msra.mxu0 %v3955_v15  ;;  %1389 = vmatpush.msrb.mxu1 %v3956_v40 }
 0x3c9   :  { %1409 = vmatpush.msra.mxu2 %v3957_v23  ;;  %1429 = vmatpush.msra.mxu3 %v3958_v25 }
 0x3ca   :  { %1370 = vmatpush.msra.mxu0 %v3959_v54  ;;  %1390 = vmatpush.msrb.mxu1 %v3960_v7 }
 0x3cb   :  { %1410 = vmatpush.msra.mxu2 %v3961_v0  ;;  %1430 = vmatpush.msra.mxu3 %v3962_v56  ;;  %v3971_v56 = vld [vmem:[#allocation4_spill] sm:$0xff] }
 0x3cc   :  { %1371 = vmatpush.msra.mxu0 %v3963_v10  ;;  %1391 = vmatpush.msrb.mxu1 %v3964_v16  ;;  %v3972_v16 = vld [vmem:[#allocation56_spill] sm:$0xff] }
 0x3cd   :  { %1411 = vmatpush.msra.mxu2 %v3965_v3  ;;  %1431 = vmatpush.msra.mxu3 %v3966_v4 }
 0x429   :  { %v1079_v13 = vpop.f32.mrf.mxu0  ;;  %v1099_v5 = vpop.f32.mrf.mxu1 }
 0x42a   :  { %v1142_v6 = vadd.f32 %v1079_v13, %v3967_v9  ;;  %v1143_v17 = vadd.f32 %v1099_v5, %v3968_v19  ;;  %v3973_v9 = vld [vmem:[#allocation52_spill] sm:$0xff] }
 0x42c   :  { %v1778_v20 = vmul.f32 -1.442695, %v1142_v6  ;;  %v1779_v22 = vmul.f32 -1.442695, %v1143_v17 }
 0x42e   :  { %1879 = vpow2.f32 %v1778_v20 }
 0x42f   :  { %1881 = vpow2.f32 %v1779_v22 }
 0x430   :  { %v1139_v27 = vpop.f32.mrf.mxu3  ;;  %v1119_v33 = vpop.f32.mrf.mxu2 }
 0x431   :  { %v1145_v29 = vadd.f32 %v1139_v27, %v3969_v28  ;;  %v1144_v46 = vadd.f32 %v1119_v33, %v3970_v45  ;;  %v1519_v28 = vld [vmem:[%s3666_s4 + $0x60] sm:$0xff] }
 0x433   :  { %v1780_v31 = vmul.f32 -1.442695, %v1145_v29  ;;  %v1521_v29 = vld [vmem:[%s3666_s4 + $0x78] sm:$0xff] }
 0x434   :  { %v1880_v49 = vpop.eup %1879 }
 0x435   :  { %v1882_v52 = vpop.eup %1881  ;;  %v1149_v42 = vadd.f32 1.0, %v1880_v49  ;;  %1883 = vpow2.f32 %v1780_v31  ;;  %v1516_v31 = vld [vmem:[%s3666_s4 + $0x40] sm:$0xff]  ;;  %v1518_v49 = vld [vmem:[%s3666_s4 + $0x58] sm:$0xff] }
 0x436   :  { %v1168_v32 = vadd.f32 1.0, %v1882_v52  ;;  %v1513_v52 = vld [vmem:[%s3666_s4 + $0x20] sm:$0xff] }
 0x437   :  { %1885 = vrcp.f32 %v1149_v42  ;;  %v1161_v44 = vand.u32 2147483648, %v1149_v42  ;;  %v1159_v48 = vand.u32 2147483647, %v1149_v42  ;;  %vm1155_vm3 = vweird.f32 %v1149_v42 }
 0x438   :  { %1887 = vrcp.f32 %v1168_v32  ;;  %v1180_v36 = vand.u32 2147483648, %v1168_v32  ;;  %v1178_v39 = vand.u32 2147483647, %v1168_v32  ;;  %vm1174_vm4 = vweird.f32 %v1168_v32 }
 0x439   :  { %v1162_v35 = vor.u32 1.1754944e-38, %v1161_v44  ;;  %vm1160_vm7 = vcmp.eq.f32.partialorder %v1159_v48, 8.507059e+37  ;;  %v1517_v44 = vld [vmem:[%s3666_s4 + $0x50] sm:$0xff] }
 0x43a   :  { %v1181_v61 = vor.u32 1.1754944e-38, %v1180_v36  ;;  %vm1179_vm8 = vcmp.eq.f32.partialorder %v1178_v39, 8.507059e+37 }
 0x43b   :  { %v1884_v50 = vpop.eup %1883 }
 0x43c   :  { %v1188_v55 = vadd.f32 1.0, %v1884_v50  ;;  %v1510_v50 = vld [vmem:[%s3666_s4] sm:$0xff] }
 0x43d   :  { %v1886_v37 = vpop.eup %1885 }
 0x43e   :  { %v1888_v34 = vpop.eup %1887  ;;  %v1151_v30 = vmul.f32 %v1886_v37, %v1149_v42  ;;  %1889 = vrcp.f32 %v1188_v55  ;;  %vm1156_vm1 = vweird.f32 %v1886_v37  ;;  %v1200_v53 = vand.u32 2147483648, %v1188_v55  ;;  %v1515_v42 = vld [vmem:[%s3666_s4 + $0x38] sm:$0xff] }
 0x43f   :  { %v1170_v58 = vmul.f32 %v1888_v34, %v1168_v32  ;;  %1891 = vtanh.f32 %v1144_v46  ;;  %vm1175_vm2 = vweird.f32 %v1888_v34  ;;  %vm1157_vm5 = vmor %vm1155_vm3, %vm1156_vm1  ;;  %vm1194_vm10 = vweird.f32 %v1188_v55  ;;  %v3974_v46 = vld [vmem:[#allocation51_spill] sm:$0xff] }
 0x440   :  { %v1152_v57 = vsub.f32 1.0, %v1151_v30  ;;  %vm1176_vm6 = vmor %vm1174_vm4, %vm1175_vm2  ;;  %v1198_v15 = vand.u32 2147483647, %v1188_v55  ;;  %v1201_v23 = vor.u32 1.1754944e-38, %v1200_v53 }
 0x441   :  { %v1171_v24 = vsub.f32 1.0, %v1170_v58 }
 0x442   :  { %v1153_v59 = vmul.f32 %v1886_v37, %v1152_v57  ;;  %vm1199_vm12 = vcmp.eq.f32.partialorder %v1198_v15, 8.507059e+37 }
 0x443   :  { %v1172_v43 = vmul.f32 %v1888_v34, %v1171_v24  ;;  %v1520_v24 = vld [vmem:[%s3666_s4 + $0x70] sm:$0xff] }
 0x444   :  { %v1890_v38 = vpop.eup %1889  ;;  %v1154_v41 = vadd.f32 %v1886_v37, %v1153_v59 }
 0x445   :  { %v1173_v51 = vadd.f32 %v1888_v34, %v1172_v43  ;;  %v1190_v1 = vmul.f32 %v1890_v38, %v1188_v55  ;;  %v1892_v63 = vpop.eup %1891  ;;  %vm1195_vm9 = vweird.f32 %v1890_v38  ;;  %v1512_v55 = vld [vmem:[%s3666_s4 + $0x18] sm:$0xff]  ;;  %v1514_v43 = vld [vmem:[%s3666_s4 + $0x30] sm:$0xff] }
 0x446   :  { %v1158_v62 = vsel %vm1157_vm5, %v1886_v37, %v1154_v41  ;;  %vm1196_vm11 = vmor %vm1194_vm10, %vm1195_vm9 }
 0x447   :  { %v1163_v2 = vsel %vm1160_vm7, %v1162_v35, %v1158_v62  ;;  %v1177_v21 = vsel %vm1176_vm6, %v1888_v34, %v1173_v51  ;;  %v1191_v14 = vsub.f32 1.0, %v1190_v1  ;;  %v1511_v1 = vld [vmem:[%s3666_s4 + $0x10] sm:$0xff] }
 0x448   :  { %v1182_v60 = vsel %vm1179_vm8, %v1181_v61, %v1177_v21  ;;  %v1205_v8 = vmul.f32 %v1892_v63, %v1163_v2 }
 0x449   :  { %v1204_v12 = vmul.f32 %v1182_v60, %v3394_v47  ;;  %v1192_v18 = vmul.f32 %v1890_v38, %v1191_v14 }
 0x44b   :  { %v3466_v11 = vadd.f32 %v1205_v8, %v1204_v12  ;;  %v1193_v26 = vadd.f32 %v1890_v38, %v1192_v18 }
 0x44d   :  { %1893 = vtanh.f32 %v3466_v11  ;;  %v1197_v40 = vsel %vm1196_vm11, %v1890_v38, %v1193_v26 }
 0x44e   :  { %v1202_v54 = vsel %vm1199_vm12, %v1201_v23, %v1197_v40 }
 0x453   :  { %v1894_v25 = vpop.eup %1893 }
 0x454   :  { %v1208_v7 = vmul.f32 %v1894_v25, %v1202_v54 }
 0x456   :  { %1225 = vmatmul.f32.vlgmr.msrb.gmra.mxu0 %v1208_v7  ;;  %1245 = vmatmul.f32.vlgmr.msra.gmra.mxu1 %v1208_v7 }
 0x457   :  { %1265 = vmatmul.f32.vlgmr.msrb.gmra.mxu2 %v1208_v7  ;;  %1285 = vmatmul.f32.vlgmr.msrb.gmra.mxu3 %v1208_v7 }
 0x458   :  { %1545 = vmatpush.msrb.mxu0 %v1519_v28  ;;  %1585 = vmatpush.msrb.mxu2 %v1521_v29  ;;  %v1644_v28 = vld [vmem:[%s3667_s6 + $0x48] sm:$0xff]  ;;  %v1662_v29 = vld [vmem:[%s3668_s7 + $0x58] sm:$0xff] }
 0x459   :  { %1565 = vmatpush.msra.mxu1 %v1520_v24 }
 0x45a   :  { %1546 = vmatpush.msrb.mxu0 %v1516_v31  ;;  %1586 = vmatpush.msrb.mxu2 %v1518_v49  ;;  %v1643_v31 = vld [vmem:[%s3667_s6 + $0x40] sm:$0xff]  ;;  %v1661_v49 = vld [vmem:[%s3668_s7 + $0x50] sm:$0xff] }
 0x45b   :  { %1566 = vmatpush.msra.mxu1 %v1517_v44  ;;  %v1658_v44 = vld [vmem:[%s3668_s7 + $0x38] sm:$0xff] }
 0x45c   :  { %1547 = vmatpush.msrb.mxu0 %v1513_v52  ;;  %1587 = vmatpush.msrb.mxu2 %v1515_v42  ;;  %v1642_v52 = vld [vmem:[%s3667_s6 + $0x38] sm:$0xff]  ;;  %v1660_v42 = vld [vmem:[%s3668_s7 + $0x48] sm:$0xff] }
 0x45d   :  { %1567 = vmatpush.msra.mxu1 %v1514_v43  ;;  %v1638_v43 = vld [vmem:[%s3667_s6 + $0x18] sm:$0xff] }
 0x45e   :  { %1548 = vmatpush.msrb.mxu0 %v1510_v50  ;;  %1588 = vmatpush.msrb.mxu2 %v1512_v55  ;;  %v3975_v55 = vld [vmem:[#allocation6_spill] sm:$0xff] }
 0x45f   :  { %1568 = vmatpush.msra.mxu1 %v1511_v1 }
 0x4d3   :  { %v1226_v47 = vpop.f32.mrf.mxu0  ;;  %v1246_v0 = vpop.f32.mrf.mxu1 }
 0x4d4   :  { %v1289_v10 = vadd.f32 %v1226_v47, %v3971_v56  ;;  %v1290_v3 = vadd.f32 %v1246_v0, %v3972_v16 }
 0x4d6   :  { %v1781_v4 = vmul.f32 -1.442695, %v1289_v10  ;;  %v1782_v13 = vmul.f32 -1.442695, %v1290_v3 }
 0x4d8   :  { %1895 = vpow2.f32 %v1781_v4  ;;  %v1650_v4 = vld [vmem:[%s3667_s6 + $0x78] sm:$0xff] }
 0x4d9   :  { %1897 = vpow2.f32 %v1782_v13  ;;  %v1649_v13 = vld [vmem:[%s3667_s6 + $0x70] sm:$0xff] }
 0x4da   :  { %v1286_v5 = vpop.f32.mrf.mxu3  ;;  %v1266_v32 = vpop.f32.mrf.mxu2 }
 0x4db   :  { %v1292_v6 = vadd.f32 %v1286_v5, %v3973_v9  ;;  %v1291_v34 = vadd.f32 %v1266_v32, %v3974_v46  ;;  %v1648_v5 = vld [vmem:[%s3667_s6 + $0x68] sm:$0xff]  ;;  %v1666_v9 = vld [vmem:[%s3668_s7 + $0x78] sm:$0xff]  ;;  %v1641_v32 = vld [vmem:[%s3667_s6 + $0x30] sm:$0xff] }
 0x4dc   :  { %1667 = vmatpush.msrb.mxu3 %v1666_v9 }
 0x4dd   :  { %v1783_v19 = vmul.f32 -1.442695, %v1292_v6  ;;  %v1647_v6 = vld [vmem:[%s3667_s6 + $0x60] sm:$0xff] }
 0x4de   :  { %v1896_v17 = vpop.eup %1895 }
 0x4df   :  { %v1898_v20 = vpop.eup %1897  ;;  %v1296_v22 = vadd.f32 1.0, %v1896_v17  ;;  %1899 = vpow2.f32 %v1783_v19  ;;  %v1665_v19 = vld [vmem:[%s3668_s7 + $0x70] sm:$0xff]  ;;  %v1646_v17 = vld [vmem:[%s3667_s6 + $0x58] sm:$0xff] }
 0x4e0   :  { %v3472_v27 = vadd.f32 1.0, %v1898_v20  ;;  %1668 = vmatpush.msrb.mxu3 %v1665_v19  ;;  %v1664_v20 = vld [vmem:[%s3668_s7 + $0x68] sm:$0xff] }
 0x4e1   :  { %1901 = vrcp.f32 %v1296_v22  ;;  %v1308_v48 = vand.u32 2147483648, %v1296_v22  ;;  %v1306_v41 = vand.u32 2147483647, %v1296_v22  ;;  %vm1302_vm15 = vweird.f32 %v1296_v22 }
 0x4e2   :  { %1903 = vrcp.f32 %v3472_v27  ;;  %v1327_v39 = vand.u32 2147483648, %v3472_v27  ;;  %v1325_v51 = vand.u32 2147483647, %v3472_v27  ;;  %vm1321_vm1 = vweird.f32 %v3472_v27  ;;  %1669 = vmatpush.msrb.mxu3 %v1664_v20 }
 0x4e3   :  { %v1309_v63 = vor.u32 1.1754944e-38, %v1308_v48  ;;  %vm1307_vm4 = vcmp.eq.f32.partialorder %v1306_v41, 8.507059e+37  ;;  %v1657_v48 = vld [vmem:[%s3668_s7 + $0x30] sm:$0xff]  ;;  %v1656_v41 = vld [vmem:[%s3668_s7 + $0x28] sm:$0xff] }
 0x4e4   :  { %v1328_v14 = vor.u32 1.1754944e-38, %v1327_v39  ;;  %vm1326_vm5 = vcmp.eq.f32.partialorder %v1325_v51, 8.507059e+37  ;;  %v3977_v51 = vld [vmem:[#allocation55_spill] sm:$0xff] }
 0x4e5   :  { %v1900_v33 = vpop.eup %1899 }
 0x4e6   :  { %v1335_v37 = vadd.f32 1.0, %v1900_v33 }
 0x4e7   :  { %v1902_v45 = vpop.eup %1901 }
 0x4e8   :  { %v1904_v30 = vpop.eup %1903  ;;  %v1298_v58 = vmul.f32 %v1902_v45, %v1296_v22  ;;  %1905 = vrcp.f32 %v1335_v37  ;;  %vm1303_vm13 = vweird.f32 %v1902_v45  ;;  %v1347_v7 = vand.u32 2147483648, %v1335_v37  ;;  %v1645_v22 = vld [vmem:[%s3667_s6 + $0x50] sm:$0xff] }
 0x4e9   :  { %v1317_v57 = vmul.f32 %v1904_v30, %v3472_v27  ;;  %1907 = vtanh.f32 %v1291_v34  ;;  %vm1322_vm14 = vweird.f32 %v1904_v30  ;;  %vm1304_vm2 = vmor %vm1302_vm15, %vm1303_vm13  ;;  %vm1341_vm7 = vweird.f32 %v1335_v37  ;;  %v1663_v27 = vld [vmem:[%s3668_s7 + $0x60] sm:$0xff] }
 0x4ea   :  { %v1299_v36 = vsub.f32 1.0, %v1298_v58  ;;  %vm1323_vm3 = vmor %vm1321_vm1, %vm1322_vm14  ;;  %v1345_v47 = vand.u32 2147483647, %v1335_v37  ;;  %v1348_v56 = vor.u32 1.1754944e-38, %v1347_v7  ;;  %1670 = vmatpush.msrb.mxu3 %v1663_v27  ;;  %v1659_v34 = vld [vmem:[%s3668_s7 + $0x40] sm:$0xff] }
 0x4eb   :  { %v1318_v59 = vsub.f32 1.0, %v1317_v57  ;;  %v3588_v58 = vld [vmem:[%s3669_s5] sm:$0xf] }
 0x4ec   :  { %v1300_v38 = vmul.f32 %v1902_v45, %v1299_v36  ;;  %vm1346_vm9 = vcmp.eq.f32.partialorder %v1345_v47, 8.507059e+37  ;;  %1671 = vmatpush.msrb.mxu3 %v1662_v29  ;;  %v1639_v36 = vld [vmem:[%s3667_s6 + $0x20] sm:$0xff] }
 0x4ed   :  { %v1319_v35 = vmul.f32 %v1904_v30, %v1318_v59  ;;  %v1524_v59 = vperm.slane %v3588_v58, 0  ;;  %v1651_v7 = vld [vmem:[%s3668_s7] sm:$0xff] }
 0x4ee   :  { %v1906_v61 = vpop.eup %1905  ;;  %v1301_v62 = vadd.f32 %v1902_v45, %v1300_v38  ;;  %1672 = vmatpush.msrb.mxu3 %v1661_v49 }
 0x4ef   :  { %v1320_v2 = vadd.f32 %v1904_v30, %v1319_v35  ;;  %v1337_v21 = vmul.f32 %v1906_v61, %v1335_v37  ;;  %v1908_v8 = vpop.eup %1907  ;;  %vm1342_vm6 = vweird.f32 %v1906_v61  ;;  %v1637_v35 = vld [vmem:[%s3667_s6 + $0x10] sm:$0xff] }
 0x4f0   :  { %v1305_v60 = vsel %vm1304_vm2, %v1902_v45, %v1301_v62  ;;  %vm1343_vm8 = vmor %vm1341_vm7, %vm1342_vm6  ;;  %1673 = vmatpush.msrb.mxu3 %v1660_v42  ;;  %v3976_v45 = vld [vmem:[#allocation57_spill] sm:$0xff] }
 0x4f1   :  { %v1310_v12 = vsel %vm1307_vm4, %v1309_v63, %v1305_v60  ;;  %v1324_v18 = vsel %vm1323_vm3, %v1904_v30, %v1320_v2  ;;  %v1338_v26 = vsub.f32 1.0, %v1337_v21  ;;  %v1640_v30 = vld [vmem:[%s3667_s6 + $0x28] sm:$0xff]  ;;  %v1655_v63 = vld [vmem:[%s3668_s7 + $0x20] sm:$0xff]  ;;  %v1654_v21 = vld [vmem:[%s3668_s7 + $0x18] sm:$0xff] }
 0x4f2   :  { %v1329_v53 = vsel %vm1326_vm5, %v1328_v14, %v1324_v18  ;;  %v1352_v15 = vmul.f32 %v1908_v8, %v1310_v12  ;;  %1674 = vmatpush.msrb.mxu3 %v1659_v34  ;;  %v1636_v2 = vld [vmem:[%s3667_s6 + $0x8] sm:$0xff]  ;;  %v1635_v60 = vld [vmem:[%s3667_s6] sm:$0xff] }
 0x4f3   :  { %v1351_v40 = vmul.f32 %v1329_v53, %v3466_v11  ;;  %v1339_v23 = vmul.f32 %v1906_v61, %v1338_v26  ;;  %v1787_v11 = vld [vmem:[%s3663_s0 + $0x38] sm:$0xff]  ;;  %v1526_v53 = vperm.slane %v3588_v58, 3 }
 0x4f4   :  { %1675 = vmatpush.msrb.mxu3 %v1658_v44 }
 0x4f5   :  { %v3517_v25 = vadd.f32 %v1352_v15, %v1351_v40  ;;  %v1340_v54 = vadd.f32 %v1906_v61, %v1339_v23  ;;  %v1653_v40 = vld [vmem:[%s3668_s7 + $0x10] sm:$0xff]  ;;  %v1652_v23 = vld [vmem:[%s3668_s7 + $0x8] sm:$0xff] }
 0x4f6   :  { %1676 = vmatpush.msrb.mxu3 %v1657_v48 }
 0x4f7   :  { %1909 = vtanh.f32 %v3517_v25  ;;  %v1344_v0 = vsel %vm1343_vm8, %v1906_v61, %v1340_v54 }
 0x4f8   :  { %v1349_v16 = vsel %vm1346_vm9, %v1348_v56, %v1344_v0  ;;  %1677 = vmatpush.msrb.mxu3 %v1656_v41 }
 0x4fa   :  { %1678 = vmatpush.msrb.mxu3 %v1655_v63 }
 0x4fc   :  { %1679 = vmatpush.msrb.mxu3 %v1654_v21 }
 0x4fd   :  { %v1910_v10 = vpop.eup %1909 }
 0x4fe   :  { %v1355_v3 = vmul.f32 %v1910_v10, %v1349_v16  ;;  %1680 = vmatpush.msrb.mxu3 %v1653_v40  ;;  %v1525_v10 = vperm.slane %v3588_v58, 2 }
 0x500   :  { %1372 = vmatmul.f32.vlgmr.msra.gmra.mxu0 %v1355_v3  ;;  %1392 = vmatmul.f32.vlgmr.msrb.gmra.mxu1 %v1355_v3 }
 0x501   :  { %1412 = vmatmul.f32.vlgmr.msra.gmra.mxu2 %v1355_v3  ;;  %1432 = vmatmul.f32.vlgmr.msra.gmra.mxu3 %v1355_v3 }
 0x502   :  { %1687 = vmatpush.msra.mxu0 %v1650_v4  ;;  %1681 = vmatpush.msrb.mxu3 %v1652_v23 }
 0x504   :  { %1688 = vmatpush.msra.mxu0 %v1649_v13  ;;  %1682 = vmatpush.msrb.mxu3 %v1651_v7  ;;  %v3978_v13 = vld [vmem:[#allocation54_spill] sm:$0xff] }
 0x506   :  { %1689 = vmatpush.msra.mxu0 %v1648_v5 }
 0x508   :  { %1788 = vmatmul.msk.f32.vlgmr.msrb.gmra.mxu0 %vm72_vm0, %v1787_v11  ;;  %1789 = vmatmul.msk.f32.vlgmr.msra.gmra.mxu1 %vm72_vm0, %v1787_v11 }
 0x509   :  { %1790 = vmatmul.msk.f32.vlgmr.msrb.gmra.mxu2 %vm72_vm0, %v1787_v11  ;;  %1690 = vmatpush.msra.mxu0 %v1647_v6 }
 0x50b   :  { %1691 = vmatpush.msra.mxu0 %v1646_v17 }
 0x50d   :  { %1692 = vmatpush.msra.mxu0 %v1645_v22 }
 0x50f   :  { %1693 = vmatpush.msra.mxu0 %v1644_v28 }
 0x511   :  { %1694 = vmatpush.msra.mxu0 %v1643_v31 }
 0x513   :  { %1695 = vmatpush.msra.mxu0 %v1642_v52 }
 0x515   :  { %1696 = vmatpush.msra.mxu0 %v1641_v32 }
 0x517   :  { %1697 = vmatpush.msra.mxu0 %v1640_v30 }
 0x519   :  { %1698 = vmatpush.msra.mxu0 %v1639_v36 }
 0x51b   :  { %1699 = vmatpush.msra.mxu0 %v1638_v43 }
 0x51d   :  { %1700 = vmatpush.msra.mxu0 %v1637_v35 }
 0x51f   :  { %1701 = vmatpush.msra.mxu0 %v1636_v2 }
 0x521   :  { %1702 = vmatpush.msra.mxu0 %v1635_v60 }
 0x57d   :  { %v1373_v33 = vpop.f32.mrf.mxu0  ;;  %v1393_v50 = vpop.f32.mrf.mxu1 }
 0x57e   :  { %v1436_v37 = vadd.f32 %v1373_v33, %v3975_v55  ;;  %v1437_v46 = vadd.f32 %v1393_v50, %v3976_v45 }
 0x580   :  { %v1784_v57 = vmul.f32 -1.442695, %v1436_v37  ;;  %v1785_v24 = vmul.f32 -1.442695, %v1437_v46 }
 0x582   :  { %1911 = vpow2.f32 %v1784_v57 }
 0x583   :  { %1913 = vpow2.f32 %v1785_v24 }
 0x584   :  { %v1413_v39 = vpop.f32.mrf.mxu2  ;;  %v1433_v38 = vpop.f32.mrf.mxu3 }
 0x585   :  { %v1439_v1 = vadd.f32 %v1433_v38, %v3977_v51  ;;  %v1550_v61 = vpop.f32.mrf.mxu0  ;;  %v1570_v11 = vpop.f32.mrf.mxu1  ;;  %v1438_v5 = vadd.f32 %v1413_v39, %v3978_v13 }
 0x586   :  { %v1551_v62 = vadd.f32 %v1550_v61, %v1524_v59  ;;  %v1571_v20 = vadd.f32 %v1570_v11, %v1525_v10 }
 0x587   :  { %v1786_v14 = vmul.f32 -1.442695, %v1439_v1 }
 0x588   :  { %v1912_v8 = vpop.eup %1911  ;;  %v1791_v12 = vmul.f32 -1.442695, %v1551_v62 }
 0x589   :  { %v1914_v18 = vpop.eup %1913  ;;  %v1443_v26 = vadd.f32 1.0, %v1912_v8  ;;  %1915 = vpow2.f32 %v1786_v14 }
 0x58a   :  { %v1462_v15 = vadd.f32 1.0, %v1914_v18  ;;  %1917 = vpow2.f32 %v1791_v12 }
 0x58b   :  { %1919 = vrcp.f32 %v1443_v26  ;;  %v1453_v28 = vand.u32 2147483647, %v1443_v26  ;;  %v1455_v29 = vand.u32 2147483648, %v1443_v26  ;;  %vm1449_vm12 = vweird.f32 %v1443_v26 }
 0x58c   :  { %1921 = vrcp.f32 %v1462_v15  ;;  %v1590_v54 = vpop.f32.mrf.mxu2  ;;  %v1474_v31 = vand.u32 2147483648, %v1462_v15  ;;  %v1472_v32 = vand.u32 2147483647, %v1462_v15  ;;  %vm1468_vm11 = vweird.f32 %v1462_v15 }
 0x58d   :  { %v1591_v47 = vadd.f32 %v1590_v54, %v1526_v53  ;;  %vm1454_vm14 = vcmp.eq.f32.partialorder %v1453_v28, 8.507059e+37  ;;  %v1456_v45 = vor.u32 1.1754944e-38, %v1455_v29 }
 0x58e   :  { %v1475_v30 = vor.u32 1.1754944e-38, %v1474_v31  ;;  %vm1473_vm1 = vcmp.eq.f32.partialorder %v1472_v32, 8.507059e+37 }
 0x58f   :  { %v1916_v0 = vpop.eup %1915  ;;  %v1792_v56 = vmul.f32 -1.442695, %v1591_v47 }
 0x590   :  { %v1918_v16 = vpop.eup %1917  ;;  %v3633_v3 = vadd.f32 1.0, %v1916_v0 }
 0x591   :  { %v1920_v4 = vpop.eup %1919  ;;  %v3636_v9 = vadd.f32 1.0, %v1918_v16  ;;  %1923 = vpow2.f32 %v1792_v56 }
 0x592   :  { %v1922_v6 = vpop.eup %1921  ;;  %v1445_v19 = vmul.f32 %v1920_v4, %v1443_v26  ;;  %1925 = vrcp.f32 %v3633_v3  ;;  %vm1450_vm0 = vweird.f32 %v1920_v4  ;;  %vm1488_vm7 = vweird.f32 %v3633_v3 }
 0x593   :  { %v1464_v17 = vmul.f32 %v1922_v6, %v1462_v15  ;;  %1927 = vrcp.f32 %v3636_v9  ;;  %vm1469_vm10 = vweird.f32 %v1922_v6  ;;  %vm1451_vm13 = vmor %vm1449_vm12, %vm1450_vm0  ;;  %v1608_v35 = vand.u32 2147483648, %v3636_v9 }
 0x594   :  { %v1446_v22 = vsub.f32 1.0, %v1445_v19  ;;  %1929 = vtanh.f32 %v1438_v5  ;;  %vm1470_vm15 = vmor %vm1468_vm11, %vm1469_vm10  ;;  %v1606_v61 = vand.u32 2147483647, %v3636_v9  ;;  %vm1602_vm3 = vweird.f32 %v3636_v9 }
 0x595   :  { %v1465_v27 = vsub.f32 1.0, %v1464_v17  ;;  %1931 = vtanh.f32 %v1571_v20  ;;  %v1609_v60 = vor.u32 1.1754944e-38, %v1608_v35  ;;  %v1492_v12 = vand.u32 2147483647, %v3633_v3 }
 0x596   :  { %v1447_v49 = vmul.f32 %v1920_v4, %v1446_v22  ;;  %vm1607_vm6 = vcmp.eq.f32.partialorder %v1606_v61, 8.507059e+37  ;;  %v1712_v5 = vlaneseq }
 0x597   :  { %v1924_v52 = vpop.eup %1923  ;;  %v1466_v42 = vmul.f32 %v1922_v6, %v1465_v27  ;;  %vm1493_vm0 = vcmp.eq.f32.partialorder %v1492_v12, 8.507059e+37 }
 0x598   :  { %v1926_v33 = vpop.eup %1925  ;;  %v1448_v50 = vadd.f32 %v1920_v4, %v1447_v49  ;;  %v3640_v55 = vadd.f32 1.0, %v1924_v52 }
 0x599   :  { %v1928_v37 = vpop.eup %1927  ;;  %v1467_v46 = vadd.f32 %v1922_v6, %v1466_v42  ;;  %v1484_v34 = vmul.f32 %v1926_v33, %v3633_v3  ;;  %vm1489_vm4 = vweird.f32 %v1926_v33 }
 0x59a   :  { %v1452_v58 = vsel %vm1451_vm13, %v1920_v4, %v1448_v50  ;;  %v1598_v57 = vmul.f32 %v1928_v37, %v3636_v9  ;;  %1933 = vrcp.f32 %v3640_v55  ;;  %v1930_v24 = vpop.eup %1929  ;;  %vm1603_vm2 = vweird.f32 %v1928_v37  ;;  %vm1490_vm8 = vmor %vm1488_vm7, %vm1489_vm4 }
 0x59b   :  { %v1457_v44 = vsel %vm1454_vm14, %v1456_v45, %v1452_v58  ;;  %v1471_v36 = vsel %vm1470_vm15, %v1922_v6, %v1467_v46  ;;  %v1485_v59 = vsub.f32 1.0, %v1484_v34  ;;  %v1932_v38 = vpop.eup %1931  ;;  %vm1604_vm5 = vmor %vm1602_vm3, %vm1603_vm2  ;;  %v1628_v54 = vand.u32 2147483648, %v3640_v55  ;;  %v1798_v6 = vld [vmem:[%s3670_s8] ss:$0 sm:$0xff] }
 0x59c   :  { %v1476_v48 = vsel %vm1473_vm1, %v1475_v30, %v1471_v36  ;;  %v1499_v43 = vmul.f32 %v1930_v24, %v1457_v44  ;;  %v1599_v39 = vsub.f32 1.0, %v1598_v57  ;;  %vm1622_vm10 = vweird.f32 %v3640_v55 }
 0x59d   :  { %v1498_v41 = vmul.f32 %v1476_v48, %v3517_v25  ;;  %v1486_v51 = vmul.f32 %v1926_v33, %v1485_v59  ;;  %v1494_v25 = vand.u32 2147483648, %v3633_v3  ;;  %v1626_v56 = vand.u32 2147483647, %v3640_v55 }
 0x59e   :  { %v1600_v1 = vmul.f32 %v1928_v37, %v1599_v39  ;;  %v1629_v3 = vor.u32 1.1754944e-38, %v1628_v54  ;;  %v1713_v9 = vand.u32 127, %v1712_v5 }
 0x59f   :  { %v1500_v62 = vadd.f32 %v1499_v43, %v1498_v41  ;;  %v1487_v21 = vadd.f32 %v1926_v33, %v1486_v51  ;;  %v1495_v40 = vor.u32 1.1754944e-38, %v1494_v25  ;;  %vm1627_vm12 = vcmp.eq.f32.partialorder %v1626_v56, 8.507059e+37 }
 0x5a0   :  { %v1934_v63 = vpop.eup %1933  ;;  %v1601_v2 = vadd.f32 %v1928_v37, %v1600_v1  ;;  %vm1714_vm13 = vcmp.lt.s32.totalorder %v1713_v9, 4 }
 0x5a1   :  { %1935 = vtanh.f32 %v1500_v62  ;;  %v1618_v14 = vmul.f32 %v1934_v63, %v3640_v55  ;;  %v1491_v15 = vsel %vm1490_vm8, %v1926_v33, %v1487_v21  ;;  %vm1623_vm9 = vweird.f32 %v1934_v63 }
 0x5a2   :  { %v1605_v8 = vsel %vm1604_vm5, %v1928_v37, %v1601_v2  ;;  %v1496_v47 = vsel %vm1493_vm0, %v1495_v40, %v1491_v15  ;;  %vm1624_vm11 = vmor %vm1622_vm10, %vm1623_vm9 }
 0x5a3   :  { %v1619_v18 = vsub.f32 1.0, %v1618_v14  ;;  %v1610_v26 = vsel %vm1607_vm6, %v1609_v60, %v1605_v8 }
 0x5a4   :  { %v1632_v53 = vmul.f32 %v1932_v38, %v1610_v26 }
 0x5a5   :  { %v1620_v23 = vmul.f32 %v1934_v63, %v1619_v18 }
 0x5a6   :  { %1937 = vtanh.f32 %v1632_v53 }
 0x5a7   :  { %v1936_v7 = vpop.eup %1935  ;;  %v1621_v0 = vadd.f32 %v1934_v63, %v1620_v23 }
 0x5a8   :  { %v1502_v10 = vmul.f32 %v1936_v7, %v1496_v47 }
 0x5a9   :  { %v1625_v16 = vsel %vm1624_vm11, %v1934_v63, %v1621_v0 }
 0x5aa   :  { %1703 = vmatmul.f32.vlgmr.msra.gmra.mxu0 %v1502_v10  ;;  %v1630_v4 = vsel %vm1627_vm12, %v1629_v3, %v1625_v16 }
 0x5ac   :  { %v1938_v11 = vpop.eup %1937 }
 0x5ad   :  { %v1634_v13 = vmul.f32 %v1938_v11, %v1630_v4 }
 0x5af   :  { %1683 = vmatmul.f32.vlgmr.msrb.gmra.mxu3 %v1634_v13 }
 0x627   :  { %v1704_v19 = vpop.f32.mrf.mxu0 }
 0x632   :  { %v1684_v17 = vpop.f32.mrf.mxu3 }
 0x633   :  { %v1705_v20 = vadd.f32 %v1704_v19, %v1684_v17 }
 0x635   :  { %v1711_v22 = vadd.f32 %v1798_v6, %v1705_v20 }
 0x637   :  { %v1715_v27 = vsel %vm1714_vm13, %v1711_v22, -1e+30 }
 0x638   :  { %1716 = vmax.xlane.f32.xlu0 %v1715_v27 }
 0x6ab   :  { %v1717_v28 = vpop.xlane.xlu0 %1716 }
 0x6ac   :  { %v1718_v29 = vsub.f32 %v1715_v27, %v1717_v28 }
 0x6ae   :  { %v1719_v31 = vmul.f32 1.442695, %v1718_v29 }
 0x6b0   :  { %1939 = vpow2.f32 %v1719_v31 }
 0x6b6   :  { %v1940_v49 = vpop.eup %1939 }
 0x6b7   :  { %1721 = vadd.xlane.f32.xlu0 %v1940_v49 }
 0x72a   :  { %v1722_v52 = vpop.xlane.xlu0 %1721 }
 0x72b   :  { %1941 = vlog2.f32 %v1722_v52 }
 0x731   :  { %v1942_v42 = vpop.eup %1941 }
 0x732   :  { %v1724_v32 = vmul.f32 0.6931472, %v1942_v42 }
 0x734   :  { %v1725_v33 = vsub.f32 %v1718_v29, %v1724_v32 }
 0x736   :  { %1726 = vst [vmem:[%s3671_s9] sm:$0xff] %v1725_v33 }

</bundles_post_ra>
